<compile_context>
chip_gen: v6e
topology: v6e:2x2x1
jax: 0.10.0
libtpu: 0.0.40
codegen_flags: <defaults>
</compile_context>

<pallas_src>
import functools

import jax
import jax.numpy as jnp
import numpy as np
from jax import lax
from jax.experimental import pallas as pl
from jax.experimental.pallas import tpu as pltpu


# ----------------------------------------------------------------------------
# Small helpers
# ----------------------------------------------------------------------------
def _vmem_limit(nbytes):
    # Never below the ~32 MiB scoped default, generous headroom, capped.
    return int(min(96 * 2 ** 20, max(int(nbytes) + 8 * 2 ** 20, 32 * 2 ** 20)))


def _choose_hw_tile(HW, target=1024):
    """Spatial tile (lane/row count) for the 1x1-conv kernels."""
    if HW <= target:
        return HW
    for t in range(target, 127, -128):            # prefer a 128-multiple divisor
        if HW % t == 0:
            return t
    return target                                  # ragged tail handled by cdiv


def _choose_row_block(H, W, target_rows=2048):
    """Row block TH (divisor of H, >=2 blocks when possible) for the bottleneck."""
    cap = max(1, target_rows // max(W, 1))
    cands = [d for d in range(1, H) if H % d == 0 and d <= cap]
    return max(cands) if cands else H


# ----------------------------------------------------------------------------
# Kernel 1: fused C3.cv1 | C3.cv2  (1x1 conv + folded BN + SiLU, two outputs).
# Reads the NCHW input directly; the layout change happens on-chip per tile.
# ----------------------------------------------------------------------------
def _cv12_kernel(x_ref, w1_ref, w2_ref, b1_ref, b2_ref, y1_ref, y2_ref):
    xt = jnp.transpose(x_ref[0]).astype(jnp.bfloat16)          # (thw, c1)
    a1 = jnp.dot(xt, w1_ref[...], preferred_element_type=jnp.float32) + b1_ref[...]
    a2 = jnp.dot(xt, w2_ref[...], preferred_element_type=jnp.float32) + b2_ref[...]
    y1_ref[0] = (a1 * jax.nn.sigmoid(a1)).astype(y1_ref.dtype)
    y2_ref[0] = (a2 * jax.nn.sigmoid(a2)).astype(y2_ref.dtype)


def fused_cv12(xf, w1, w2, b1, b2):
    """xf: (B, c1, HW) f32; w*: (c1, c_) bf16; b*: (1, c_) f32 -> two (B, HW, c_) bf16."""
    B, c1, HW = xf.shape
    c_ = w1.shape[1]
    thw = _choose_hw_tile(HW)
    nt = pl.cdiv(HW, thw)
    cost = pl.CostEstimate(
        flops=int(2 * B * HW * c1 * 2 * c_ + 4 * B * HW * c_),
        transcendentals=int(2 * B * HW * c_),
        bytes_accessed=int(xf.size * xf.dtype.itemsize
                           + 4 * c1 * c_ + 8 * c_ + 2 * B * HW * c_ * 2))
    need = (2 * (c1 * thw * xf.dtype.itemsize + 2 * thw * c_ * 2)
            + 2 * c1 * c_ * 2 + 6 * thw * max(c1, 2 * c_) * 4)
    y_shape = jax.ShapeDtypeStruct((B, HW, c_), jnp.bfloat16)
    return pl.pallas_call(
        _cv12_kernel,
        out_shape=(y_shape, y_shape),
        grid_spec=pltpu.PrefetchScalarGridSpec(
            num_scalar_prefetch=0,
            grid=(B, nt),
            in_specs=[
                pl.BlockSpec((1, c1, thw), lambda b, j: (b, 0, j)),
                pl.BlockSpec(w1.shape, lambda b, j: (0, 0)),
                pl.BlockSpec(w2.shape, lambda b, j: (0, 0)),
                pl.BlockSpec(b1.shape, lambda b, j: (0, 0)),
                pl.BlockSpec(b2.shape, lambda b, j: (0, 0)),
            ],
            out_specs=(pl.BlockSpec((1, thw, c_), lambda b, j: (b, j, 0)),
                       pl.BlockSpec((1, thw, c_), lambda b, j: (b, j, 0))),
        ),
        compiler_params=pltpu.CompilerParams(
            dimension_semantics=("parallel", "parallel"),
            vmem_limit_bytes=_vmem_limit(need)),
        cost_estimate=cost,
    )(xf, w1, w2, b1, b2)


# ----------------------------------------------------------------------------
# Kernel 2: full Bottleneck(c, c, shortcut=True, e=1.0), row-tiled with halo:
#   out = x + SiLU(BN(conv3x3(SiLU(BN(conv1x1(x))))))
# The cv1 result (with 1-row halo, zeroed outside the image) is staged in a
# VMEM scratch; each 3x3 tap is a static shifted pl.ds read (+ column mask),
# and the 3 column taps are folded into K -> 3 matmuls of K = 3*c_mid.
# ----------------------------------------------------------------------------
def _bottleneck_kernel(H, W, TH, x_ref, w1_ref, b1_ref, w2f_ref, b2_ref,
                       o_ref, t_ref):
    C = x_ref.shape[-1]
    c_mid = w1_ref.shape[-1]
    G = 8                                  # guard rows around the scratch window
    r = pl.program_id(1)
    R = pl.num_programs(1)
    r0 = r * TH

    def cv1(rows2d):                       # rows2d: (n, C) bf16 -> (n, c_mid) bf16
        a = jnp.dot(rows2d, w1_ref[...], preferred_element_type=jnp.float32)
        a = a + b1_ref[...]
        return (a * jax.nn.sigmoid(a)).astype(jnp.bfloat16)

    # cv1 over the TH output rows of this block.
    x_main = x_ref[0, pl.ds(r0, TH), :, :].reshape(TH * W, C)     # bf16
    t_ref[pl.ds(G + W, TH * W), :] = cv1(x_main)

    # cv1 over the 1-row halos; zeroed outside the image (3x3 'same' padding).
    top = x_ref[0, pl.ds(jnp.maximum(r0 - 1, 0), 1), :, :].reshape(W, C)
    t_top = cv1(top)
    t_ref[pl.ds(G, W), :] = jnp.where(r > 0, t_top, jnp.zeros_like(t_top))
    bot = x_ref[0, pl.ds(jnp.minimum(r0 + TH, H - 1), 1), :, :].reshape(W, C)
    t_bot = cv1(bot)
    t_ref[pl.ds(G + (TH + 1) * W, W), :] = jnp.where(
        r < R - 1, t_bot, jnp.zeros_like(t_bot))

    # 3x3 'same' conv: per row tap dr, one matmul with the kj taps folded in K.
    col = lax.broadcasted_iota(jnp.int32, (TH, W, c_mid), 1).reshape(TH * W, c_mid)
    left_ok = col >= 1                       # source column j-1 exists
    right_ok = col <= W - 2                  # source column j+1 exists
    zero = jnp.zeros((TH * W, c_mid), jnp.bfloat16)
    acc = jnp.zeros((TH * W, C), jnp.float32)
    for dr in (-1, 0, 1):
        base = G + (1 + dr) * W
        v_m1 = jnp.where(left_ok, t_ref[pl.ds(base - 1, TH * W), :], zero)
        v_0 = t_ref[pl.ds(base, TH * W), :]
        v_p1 = jnp.where(right_ok, t_ref[pl.ds(base + 1, TH * W), :], zero)
        taps = jnp.concatenate([v_m1, v_0, v_p1], axis=1)        # (TH*W, 3*c_mid)
        acc = acc + jnp.dot(taps, w2f_ref[dr + 1],
                            preferred_element_type=jnp.float32)
    acc = acc + b2_ref[...]
    acc = acc * jax.nn.sigmoid(acc)
    acc = acc + x_main.astype(jnp.float32)                        # shortcut in f32
    o_ref[0] = acc.reshape(TH, W, C).astype(o_ref.dtype)


def bottleneck_block(y, w1, b1, w2f, b2):
    """y: (B, H, W, C) bf16; w1: (C, c_mid) bf16; w2f: (3, 3*c_mid, C) bf16."""
    B, H, W, C = y.shape
    c_mid = w1.shape[1]
    TH = _choose_row_block(H, W)
    R = H // TH
    scratch_rows = 2 * 8 + (TH + 2) * W                # window + guard rows
    cost = pl.CostEstimate(
        flops=int(2 * B * H * W * c_mid * (C + 9 * C) + 6 * B * H * W * C),
        transcendentals=int(B * H * W * (c_mid + C)),
        bytes_accessed=int(2 * 2 * B * H * W * C
                           + 2 * (C * c_mid + 9 * c_mid * C) + 4 * (c_mid + C)))
    need = (2 * H * W * C * 2                      # resident input (dbl-buffered)
            + 2 * TH * W * C * 2                   # output blocks
            + scratch_rows * c_mid * 2             # staged cv1 scratch
            + TH * W * (8 * C + 12 * c_mid))       # in-flight f32/bf16 temps
    return pl.pallas_call(
        functools.partial(_bottleneck_kernel, H, W, TH),
        out_shape=jax.ShapeDtypeStruct((B, H, W, C), jnp.bfloat16),
        grid_spec=pltpu.PrefetchScalarGridSpec(
            num_scalar_prefetch=0,
            grid=(B, R),
            in_specs=[
                pl.BlockSpec((1, H, W, C), lambda b, r: (b, 0, 0, 0)),
                pl.BlockSpec(w1.shape, lambda b, r: (0, 0)),
                pl.BlockSpec(b1.shape, lambda b, r: (0, 0)),
                pl.BlockSpec(w2f.shape, lambda b, r: (0, 0, 0)),
                pl.BlockSpec(b2.shape, lambda b, r: (0, 0)),
            ],
            out_specs=pl.BlockSpec((1, TH, W, C), lambda b, r: (b, r, 0, 0)),
            scratch_shapes=[pltpu.VMEM((scratch_rows, c_mid), jnp.bfloat16)],
        ),
        compiler_params=pltpu.CompilerParams(
            dimension_semantics=("parallel", "parallel"),
            vmem_limit_bytes=_vmem_limit(need)),
        cost_estimate=cost,
    )(y, w1, b1, w2f, b2)


# ----------------------------------------------------------------------------
# Kernel 3: fused concat + C3.cv3 (split-K matmul, SiLU) writing NCHW output.
# ----------------------------------------------------------------------------
def _cv3_kernel(m_ref, y2_ref, w3a_ref, w3b_ref, b3_ref, o_ref):
    a = jnp.dot(m_ref[0], w3a_ref[...], preferred_element_type=jnp.float32)
    a = a + jnp.dot(y2_ref[0], w3b_ref[...], preferred_element_type=jnp.float32)
    a = a + b3_ref[...]
    a = a * jax.nn.sigmoid(a)
    o_ref[0] = jnp.transpose(a).astype(o_ref.dtype)   # (c2, thw) lane-dense store


def fused_cv3(m, y2, w3a, w3b, b3, out_dtype=jnp.float32):
    B, HW, c_ = m.shape
    c2 = w3a.shape[1]
    thw = _choose_hw_tile(HW)
    nt = pl.cdiv(HW, thw)
    cost = pl.CostEstimate(
        flops=int(2 * B * HW * 2 * c_ * c2 + 2 * B * HW * c2),
        transcendentals=int(B * HW * c2),
        bytes_accessed=int(2 * B * HW * c_ * 2 + 4 * c_ * c2
                           + B * HW * c2 * jnp.dtype(out_dtype).itemsize))
    need = (2 * (2 * thw * c_ * 2 + c2 * thw * jnp.dtype(out_dtype).itemsize)
            + 4 * c_ * c2 + 6 * thw * c2 * 4)
    return pl.pallas_call(
        _cv3_kernel,
        out_shape=jax.ShapeDtypeStruct((B, c2, HW), out_dtype),
        grid_spec=pltpu.PrefetchScalarGridSpec(
            num_scalar_prefetch=0,
            grid=(B, nt),
            in_specs=[
                pl.BlockSpec((1, thw, c_), lambda b, j: (b, j, 0)),
                pl.BlockSpec((1, thw, c_), lambda b, j: (b, j, 0)),
                pl.BlockSpec(w3a.shape, lambda b, j: (0, 0)),
                pl.BlockSpec(w3b.shape, lambda b, j: (0, 0)),
                pl.BlockSpec(b3.shape, lambda b, j: (0, 0)),
            ],
            out_specs=pl.BlockSpec((1, c2, thw), lambda b, j: (b, 0, j)),
        ),
        compiler_params=pltpu.CompilerParams(
            dimension_semantics=("parallel", "parallel"),
            vmem_limit_bytes=_vmem_limit(need)),
        cost_estimate=cost,
    )(m, y2, w3a, w3b, b3)


# ----------------------------------------------------------------------------
# Deterministic parameter init (Conv2d weight + BatchNorm2d, BN folded).
# ----------------------------------------------------------------------------
def make_conv_params(key, c_in, c_out, k):
    k1, k2, k3, k4, k5 = jax.random.split(key, 5)
    w = 0.1 * jax.random.normal(k1, (c_out, c_in, k, k), jnp.float32)     # OIHW
    gamma = 1.0 + 0.1 * jax.random.normal(k2, (c_out,), jnp.float32)
    beta = 0.1 * jax.random.normal(k3, (c_out,), jnp.float32)
    mean = 0.1 * jax.random.normal(k4, (c_out,), jnp.float32)
    var = 1.0 + jax.random.uniform(k5, (c_out,), jnp.float32)
    eps = 1e-5                                     # nn.BatchNorm2d default
    scale = gamma / jnp.sqrt(var + eps)
    w_hwio = jnp.transpose(w, (2, 3, 1, 0))        # (kh, kw, Cin, Cout)
    return dict(
        w=w_hwio.reshape(k * k * c_in, c_out) * scale[None, :],   # folded 1x1 weight
        b=beta - mean * scale,                                     # folded bias
        w_hwio=w_hwio * scale[None, None, None, :],                # folded k x k weight
    )


def init_c3_params(key, c1, c2, n=1, e=0.5):
    c_ = int(c2 * e)
    keys = jax.random.split(key, 3 + 2 * n)
    return dict(
        cv1=make_conv_params(keys[0], c1, c_, 1),
        cv2=make_conv_params(keys[1], c1, c_, 1),
        cv3=make_conv_params(keys[2], 2 * c_, c2, 1),
        m=[dict(cv1=make_conv_params(keys[3 + 2 * i], c_, c_, 1),
                cv2=make_conv_params(keys[4 + 2 * i], c_, c_, 3))
           for i in range(n)],
    )


def prepare_c3_weights(params):
    """One-time (outside jit) kernel-ready weight transforms: bf16 casts,
    cv3 split, 3x3 weights folded to (3, 3*c_mid, C), bias reshapes."""
    def bf(x):
        return x.astype(jnp.bfloat16)
    c_ = params['cv1']['w'].shape[1]
    prepped = dict(
        w1=bf(params['cv1']['w']), b1=params['cv1']['b'].reshape(1, -1),
        w2=bf(params['cv2']['w']), b2=params['cv2']['b'].reshape(1, -1),
        w3a=bf(params['cv3']['w'][:c_]), w3b=bf(params['cv3']['w'][c_:]),
        b3=params['cv3']['b'].reshape(1, -1),
        m=[],
    )
    for bp in params['m']:
        c_mid = bp['cv1']['w'].shape[1]
        c_out = bp['cv2']['w_hwio'].shape[-1]
        prepped['m'].append(dict(
            w1=bf(bp['cv1']['w']), b1=bp['cv1']['b'].reshape(1, -1),
            w2f=bf(bp['cv2']['w_hwio'].reshape(3, 3 * c_mid, c_out)),
            b2=bp['cv2']['b'].reshape(1, -1),
        ))
    return prepped


# ----------------------------------------------------------------------------
# C3 forward (Pallas) and pure-JAX f32 reference.
# ----------------------------------------------------------------------------
def c3_pallas(x_nchw, wts):
    B, c1, H, W = x_nchw.shape
    HW = H * W
    xf = x_nchw.reshape(B, c1, HW)                  # free reshape, NCHW kept
    y1, y2 = fused_cv12(xf, wts['w1'], wts['w2'], wts['b1'], wts['b2'])
    m = y1.reshape(B, H, W, y1.shape[-1])
    # TODO(synk): for n > 1 chain all Bottlenecks inside one pallas_call (row
    # tile stays VMEM-resident; halo grows by 1 row per chained block).
    # TODO(synk): grouped conv (g > 1) in Bottleneck.cv2 is not implemented.
    for bw in wts['m']:
        m = bottleneck_block(m, bw['w1'], bw['b1'], bw['w2f'], bw['b2'])
    m_flat = m.reshape(B, HW, m.shape[-1])
    out = fused_cv3(m_flat, y2, wts['w3a'], wts['w3b'], wts['b3'])
    return out.reshape(B, out.shape[1], H, W)       # already NCHW


def _conv_ref(x, p, act=True):
    y = jax.lax.conv_general_dilated(
        x, p['w_hwio'], (1, 1), 'SAME',
        dimension_numbers=('NHWC', 'HWIO', 'NHWC'),
        precision=jax.lax.Precision.HIGHEST)
    y = y + p['b']
    return y * jax.nn.sigmoid(y) if act else y


def c3_ref(x_nchw, params):
    x = jnp.transpose(x_nchw, (0, 2, 3, 1))
    y1 = _conv_ref(x, params['cv1'])
    m = y1
    for bp in params['m']:
        m = m + _conv_ref(_conv_ref(m, bp['cv1']), bp['cv2'])
    y2 = _conv_ref(x, params['cv2'])
    out = _conv_ref(jnp.concatenate([m, y2], axis=-1), params['cv3'])
    return jnp.transpose(out, (0, 3, 1, 2))


# ----------------------------------------------------------------------------
if __name__ == "__main__":
    c1, c2, n = 4, 8, 1
    kp, kx = jax.random.split(jax.random.PRNGKey(0))
    params = init_c3_params(kp, c1, c2, n=n, e=0.5)
    wts = prepare_c3_weights(params)                # weight prep once, outside jit
    x = jax.random.normal(kx, (2, c1, 16, 16), jnp.float32)

    fwd = jax.jit(c3_pallas)
    out = jax.block_until_ready(fwd(x, wts))
    ref = jax.block_until_ready(c3_ref(x, params))

    assert out.shape == (2, c2, 16, 16), out.shape
    # bf16 activations/weights vs f32 HIGHEST-precision conv reference.
    np.testing.assert_allclose(np.asarray(out, dtype=np.float32),
                               np.asarray(ref), rtol=2e-2, atol=2e-2)
    print("KERNEL_OK")
</pallas_src>

<mosaic_0001>
module attributes {stable_mosaic.version = 11 : i64} {
  func.func @_cv12_kernel(%arg0: i32, %arg1: i32, %arg2: memref<1x4x256xf32, #tpu.memory_space<vmem>>, %arg3: memref<4x4xbf16, #tpu.memory_space<vmem>>, %arg4: memref<4x4xbf16, #tpu.memory_space<vmem>>, %arg5: memref<1x4xf32, #tpu.memory_space<vmem>>, %arg6: memref<1x4xf32, #tpu.memory_space<vmem>>, %arg7: memref<1x256x4xbf16, #tpu.memory_space<vmem>>, %arg8: memref<1x256x4xbf16, #tpu.memory_space<vmem>>) attributes {dimension_semantics = [#tpu.dimension_semantics<parallel>, #tpu.dimension_semantics<parallel>], iteration_bounds = array<i64: 2, 1>, scalar_prefetch = 0 : i64, scratch_operands = 0 : i64, tpu.core_type = #tpu.core_type<tc>, window_params = [{transform_indices = @transform_0, window_bounds = array<i64: 1, 4, 256>}, {pipeline_mode = #tpu.pipeline_mode<synchronous>, transform_indices = @transform_1, window_bounds = array<i64: 4, 4>}, {pipeline_mode = #tpu.pipeline_mode<synchronous>, transform_indices = @transform_2, window_bounds = array<i64: 4, 4>}, {pipeline_mode = #tpu.pipeline_mode<synchronous>, transform_indices = @transform_3, window_bounds = array<i64: 1, 4>}, {pipeline_mode = #tpu.pipeline_mode<synchronous>, transform_indices = @transform_4, window_bounds = array<i64: 1, 4>}, {transform_indices = @transform_5, window_bounds = array<i64: 1, 256, 4>}, {transform_indices = @transform_6, window_bounds = array<i64: 1, 256, 4>}]} {
    %c0 = arith.constant 0 : index
    %c0_0 = arith.constant 0 : index
    %c0_1 = arith.constant 0 : index
    %0 = vector.load %arg2[%c0, %c0_0, %c0_1] : memref<1x4x256xf32, #tpu.memory_space<vmem>>, vector<1x4x256xf32>
    %1 = vector.shape_cast %0 : vector<1x4x256xf32> to vector<4x256xf32>
    %2 = tpu.transpose %1, [1, 0] : vector<4x256xf32> -> vector<256x4xf32>
    %3 = arith.truncf %2 : vector<256x4xf32> to vector<256x4xbf16>
    %c0_2 = arith.constant 0 : index
    %c0_3 = arith.constant 0 : index
    %4 = vector.load %arg3[%c0_2, %c0_3] : memref<4x4xbf16, #tpu.memory_space<vmem>>, vector<4x4xbf16>
    %cst = arith.constant dense<0.000000e+00> : vector<256x4xf32>
    %5 = tpu.matmul %3, %4, %cst {dimension_numbers = #tpu.dot_dimension_numbers<[1], [0], [0], [1], [0, 0, 1, 1], [], []>} : vector<256x4xbf16>, vector<4x4xbf16>, vector<256x4xf32> -> vector<256x4xf32>
    %c0_4 = arith.constant 0 : index
    %c0_5 = arith.constant 0 : index
    %6 = vector.load %arg5[%c0_4, %c0_5] : memref<1x4xf32, #tpu.memory_space<vmem>>, vector<1x4xf32>
    %7 = vector.broadcast %6 : vector<1x4xf32> to vector<256x4xf32>
    %8 = arith.addf %5, %7 : vector<256x4xf32>
    %c0_6 = arith.constant 0 : index
    %c0_7 = arith.constant 0 : index
    %9 = vector.load %arg4[%c0_6, %c0_7] : memref<4x4xbf16, #tpu.memory_space<vmem>>, vector<4x4xbf16>
    %cst_8 = arith.constant dense<0.000000e+00> : vector<256x4xf32>
    %10 = tpu.matmul %3, %9, %cst_8 {dimension_numbers = #tpu.dot_dimension_numbers<[1], [0], [0], [1], [0, 0, 1, 1], [], []>} : vector<256x4xbf16>, vector<4x4xbf16>, vector<256x4xf32> -> vector<256x4xf32>
    %c0_9 = arith.constant 0 : index
    %c0_10 = arith.constant 0 : index
    %11 = vector.load %arg6[%c0_9, %c0_10] : memref<1x4xf32, #tpu.memory_space<vmem>>, vector<1x4xf32>
    %12 = vector.broadcast %11 : vector<1x4xf32> to vector<256x4xf32>
    %13 = arith.addf %10, %12 : vector<256x4xf32>
    %14 = arith.negf %8 : vector<256x4xf32>
    %15 = math.exp %14 : vector<256x4xf32>
    %cst_11 = arith.constant 1.000000e+00 : f32
    %16 = vector.broadcast %cst_11 : f32 to vector<256x4xf32>
    %17 = arith.addf %16, %15 : vector<256x4xf32>
    %18 = arith.divf %16, %17 : vector<256x4xf32>
    %19 = arith.mulf %8, %18 : vector<256x4xf32>
    %20 = arith.truncf %19 : vector<256x4xf32> to vector<256x4xbf16>
    %c0_12 = arith.constant 0 : index
    %c0_13 = arith.constant 0 : index
    %c0_14 = arith.constant 0 : index
    %21 = vector.load %arg7[%c0_12, %c0_13, %c0_14] : memref<1x256x4xbf16, #tpu.memory_space<vmem>>, vector<1x256x4xbf16>
    %22 = vector.shape_cast %21 : vector<1x256x4xbf16> to vector<256x4xbf16>
    %23 = vector.shape_cast %20 : vector<256x4xbf16> to vector<1x256x4xbf16>
    tpu.vector_store %arg7[%c0_12, %c0_13, %c0_14], %23 {strides = array<i32>} : memref<1x256x4xbf16, #tpu.memory_space<vmem>>, vector<1x256x4xbf16>,
    %24 = arith.negf %13 : vector<256x4xf32>
    %25 = math.exp %24 : vector<256x4xf32>
    %cst_15 = arith.constant 1.000000e+00 : f32
    %26 = vector.broadcast %cst_15 : f32 to vector<256x4xf32>
    %27 = arith.addf %26, %25 : vector<256x4xf32>
    %28 = arith.divf %26, %27 : vector<256x4xf32>
    %29 = arith.mulf %13, %28 : vector<256x4xf32>
    %30 = arith.truncf %29 : vector<256x4xf32> to vector<256x4xbf16>
    %c0_16 = arith.constant 0 : index
    %c0_17 = arith.constant 0 : index
    %c0_18 = arith.constant 0 : index
    %31 = vector.load %arg8[%c0_16, %c0_17, %c0_18] : memref<1x256x4xbf16, #tpu.memory_space<vmem>>, vector<1x256x4xbf16>
    %32 = vector.shape_cast %31 : vector<1x256x4xbf16> to vector<256x4xbf16>
    %33 = vector.shape_cast %30 : vector<256x4xbf16> to vector<1x256x4xbf16>
    tpu.vector_store %arg8[%c0_16, %c0_17, %c0_18], %33 {strides = array<i32>} : memref<1x256x4xbf16, #tpu.memory_space<vmem>>, vector<1x256x4xbf16>,
    return
  }
  func.func @transform_0(%arg0: i32, %arg1: i32) -> (i32, i32, i32) {
    %c0_i32 = arith.constant 0 : i32
    %c0_i32_0 = arith.constant 0 : i32
    return %arg0, %c0_i32, %arg1 : i32, i32, i32
  }
  func.func @transform_1(%arg0: i32, %arg1: i32) -> (i32, i32) {
    %c0_i32 = arith.constant 0 : i32
    %c0_i32_0 = arith.constant 0 : i32
    %c0_i32_1 = arith.constant 0 : i32
    return %c0_i32, %c0_i32_0 : i32, i32
  }
  func.func @transform_2(%arg0: i32, %arg1: i32) -> (i32, i32) {
    %c0_i32 = arith.constant 0 : i32
    %c0_i32_0 = arith.constant 0 : i32
    %c0_i32_1 = arith.constant 0 : i32
    return %c0_i32, %c0_i32_0 : i32, i32
  }
  func.func @transform_3(%arg0: i32, %arg1: i32) -> (i32, i32) {
    %c0_i32 = arith.constant 0 : i32
    %c0_i32_0 = arith.constant 0 : i32
    %c0_i32_1 = arith.constant 0 : i32
    return %c0_i32, %c0_i32_0 : i32, i32
  }
  func.func @transform_4(%arg0: i32, %arg1: i32) -> (i32, i32) {
    %c0_i32 = arith.constant 0 : i32
    %c0_i32_0 = arith.constant 0 : i32
    %c0_i32_1 = arith.constant 0 : i32
    return %c0_i32, %c0_i32_0 : i32, i32
  }
  func.func @transform_5(%arg0: i32, %arg1: i32) -> (i32, i32, i32) {
    %c0_i32 = arith.constant 0 : i32
    %c0_i32_0 = arith.constant 0 : i32
    return %arg0, %arg1, %c0_i32 : i32, i32, i32
  }
  func.func @transform_6(%arg0: i32, %arg1: i32) -> (i32, i32, i32) {
    %c0_i32 = arith.constant 0 : i32
    %c0_i32_0 = arith.constant 0 : i32
    return %arg0, %arg1, %c0_i32 : i32, i32, i32
  }
}

module attributes {stable_mosaic.version = 11 : i64} {
  func.func @_bottleneck_kernel(%arg0: i32, %arg1: i32, %arg2: memref<1x16x16x4xbf16, #tpu.memory_space<vmem>>, %arg3: memref<4x4xbf16, #tpu.memory_space<vmem>>, %arg4: memref<1x4xf32, #tpu.memory_space<vmem>>, %arg5: memref<3x12x4xbf16, #tpu.memory_space<vmem>>, %arg6: memref<1x4xf32, #tpu.memory_space<vmem>>, %arg7: memref<1x8x16x4xbf16, #tpu.memory_space<vmem>>, %arg8: memref<176x4xbf16, #tpu.memory_space<vmem>>) attributes {dimension_semantics = [#tpu.dimension_semantics<parallel>, #tpu.dimension_semantics<parallel>], iteration_bounds = array<i64: 2, 2>, scalar_prefetch = 0 : i64, scratch_operands = 1 : i64, tpu.core_type = #tpu.core_type<tc>, window_params = [{transform_indices = @transform_0, window_bounds = array<i64: 1, 16, 16, 4>}, {pipeline_mode = #tpu.pipeline_mode<synchronous>, transform_indices = @transform_1, window_bounds = array<i64: 4, 4>}, {pipeline_mode = #tpu.pipeline_mode<synchronous>, transform_indices = @transform_2, window_bounds = array<i64: 1, 4>}, {pipeline_mode = #tpu.pipeline_mode<synchronous>, transform_indices = @transform_3, window_bounds = array<i64: 3, 12, 4>}, {pipeline_mode = #tpu.pipeline_mode<synchronous>, transform_indices = @transform_4, window_bounds = array<i64: 1, 4>}, {transform_indices = @transform_5, window_bounds = array<i64: 1, 8, 16, 4>}]} {
    %c8_i32 = arith.constant 8 : i32
    %0 = arith.muli %arg1, %c8_i32 : i32
    %c0 = arith.constant 0 : index
    %1 = arith.index_cast %0 : i32 to index
    %c0_0 = arith.constant 0 : index
    %c0_1 = arith.constant 0 : index
    %2 = vector.load %arg2[%c0, %1, %c0_0, %c0_1] : memref<1x16x16x4xbf16, #tpu.memory_space<vmem>>, vector<1x8x16x4xbf16>
    %3 = vector.shape_cast %2 : vector<1x8x16x4xbf16> to vector<8x16x4xbf16>
    %4 = vector.shape_cast %3 : vector<8x16x4xbf16> to vector<128x4xbf16>
    %c0_2 = arith.constant 0 : index
    %c0_3 = arith.constant 0 : index
    %5 = vector.load %arg3[%c0_2, %c0_3] : memref<4x4xbf16, #tpu.memory_space<vmem>>, vector<4x4xbf16>
    %cst = arith.constant dense<0.000000e+00> : vector<128x4xf32>
    %6 = tpu.matmul %4, %5, %cst {dimension_numbers = #tpu.dot_dimension_numbers<[1], [0], [0], [1], [0, 0, 1, 1], [], []>} : vector<128x4xbf16>, vector<4x4xbf16>, vector<128x4xf32> -> vector<128x4xf32>
    %c0_4 = arith.constant 0 : index
    %c0_5 = arith.constant 0 : index
    %7 = vector.load %arg4[%c0_4, %c0_5] : memref<1x4xf32, #tpu.memory_space<vmem>>, vector<1x4xf32>
    %8 = vector.broadcast %7 : vector<1x4xf32> to vector<128x4xf32>
    %9 = arith.addf %6, %8 : vector<128x4xf32>
    %10 = arith.negf %9 : vector<128x4xf32>
    %11 = math.exp %10 : vector<128x4xf32>
    %cst_6 = arith.constant 1.000000e+00 : f32
    %12 = vector.broadcast %cst_6 : f32 to vector<128x4xf32>
    %13 = arith.addf %12, %11 : vector<128x4xf32>
    %14 = arith.divf %12, %13 : vector<128x4xf32>
    %15 = arith.mulf %9, %14 : vector<128x4xf32>
    %16 = arith.truncf %15 : vector<128x4xf32> to vector<128x4xbf16>
    %c24 = arith.constant 24 : index
    %c0_7 = arith.constant 0 : index
    %17 = vector.load %arg8[%c24, %c0_7] : memref<176x4xbf16, #tpu.memory_space<vmem>>, vector<128x4xbf16>
    tpu.vector_store %arg8[%c24, %c0_7], %16 {strides = array<i32>} : memref<176x4xbf16, #tpu.memory_space<vmem>>, vector<128x4xbf16>,
    %c1_i32 = arith.constant 1 : i32
    %18 = arith.subi %0, %c1_i32 : i32
    %c0_i32 = arith.constant 0 : i32
    %19 = arith.maxsi %18, %c0_i32 : i32
    %c0_8 = arith.constant 0 : index
    %20 = arith.index_cast %19 : i32 to index
    %c0_9 = arith.constant 0 : index
    %c0_10 = arith.constant 0 : index
    %21 = vector.load %arg2[%c0_8, %20, %c0_9, %c0_10] : memref<1x16x16x4xbf16, #tpu.memory_space<vmem>>, vector<1x1x16x4xbf16>
    %22 = vector.shape_cast %21 : vector<1x1x16x4xbf16> to vector<1x16x4xbf16>
    %23 = vector.shape_cast %22 : vector<1x16x4xbf16> to vector<16x4xbf16>
    %c0_11 = arith.constant 0 : index
    %c0_12 = arith.constant 0 : index
    %24 = vector.load %arg3[%c0_11, %c0_12] : memref<4x4xbf16, #tpu.memory_space<vmem>>, vector<4x4xbf16>
    %cst_13 = arith.constant dense<0.000000e+00> : vector<16x4xf32>
    %25 = tpu.matmul %23, %24, %cst_13 {dimension_numbers = #tpu.dot_dimension_numbers<[1], [0], [0], [1], [0, 0, 1, 1], [], []>} : vector<16x4xbf16>, vector<4x4xbf16>, vector<16x4xf32> -> vector<16x4xf32>
    %c0_14 = arith.constant 0 : index
    %c0_15 = arith.constant 0 : index
    %26 = vector.load %arg4[%c0_14, %c0_15] : memref<1x4xf32, #tpu.memory_space<vmem>>, vector<1x4xf32>
    %27 = vector.broadcast %26 : vector<1x4xf32> to vector<16x4xf32>
    %28 = arith.addf %25, %27 : vector<16x4xf32>
    %29 = arith.negf %28 : vector<16x4xf32>
    %30 = math.exp %29 : vector<16x4xf32>
    %cst_16 = arith.constant 1.000000e+00 : f32
    %31 = vector.broadcast %cst_16 : f32 to vector<16x4xf32>
    %32 = arith.addf %31, %30 : vector<16x4xf32>
    %33 = arith.divf %31, %32 : vector<16x4xf32>
    %34 = arith.mulf %28, %33 : vector<16x4xf32>
    %35 = arith.truncf %34 : vector<16x4xf32> to vector<16x4xbf16>
    %c0_i32_17 = arith.constant 0 : i32
    %36 = arith.cmpi sgt, %arg1, %c0_i32_17 : i32
    %cst_18 = arith.constant 0.000000e+00 : bf16
    %37 = vector.broadcast %cst_18 : bf16 to vector<16x4xbf16>
    %38 = arith.select %36, %35, %37 : vector<16x4xbf16>
    %c8 = arith.constant 8 : index
    %c0_19 = arith.constant 0 : index
    %39 = vector.load %arg8[%c8, %c0_19] : memref<176x4xbf16, #tpu.memory_space<vmem>>, vector<16x4xbf16>
    tpu.vector_store %arg8[%c8, %c0_19], %38 {strides = array<i32>} : memref<176x4xbf16, #tpu.memory_space<vmem>>, vector<16x4xbf16>,
    %c8_i32_20 = arith.constant 8 : i32
    %40 = arith.addi %0, %c8_i32_20 : i32
    %c15_i32 = arith.constant 15 : i32
    %41 = arith.minsi %40, %c15_i32 : i32
    %c0_21 = arith.constant 0 : index
    %42 = arith.index_cast %41 : i32 to index
    %c0_22 = arith.constant 0 : index
    %c0_23 = arith.constant 0 : index
    %43 = vector.load %arg2[%c0_21, %42, %c0_22, %c0_23] : memref<1x16x16x4xbf16, #tpu.memory_space<vmem>>, vector<1x1x16x4xbf16>
    %44 = vector.shape_cast %43 : vector<1x1x16x4xbf16> to vector<1x16x4xbf16>
    %45 = vector.shape_cast %44 : vector<1x16x4xbf16> to vector<16x4xbf16>
    %c0_24 = arith.constant 0 : index
    %c0_25 = arith.constant 0 : index
    %46 = vector.load %arg3[%c0_24, %c0_25] : memref<4x4xbf16, #tpu.memory_space<vmem>>, vector<4x4xbf16>
    %cst_26 = arith.constant dense<0.000000e+00> : vector<16x4xf32>
    %47 = tpu.matmul %45, %46, %cst_26 {dimension_numbers = #tpu.dot_dimension_numbers<[1], [0], [0], [1], [0, 0, 1, 1], [], []>} : vector<16x4xbf16>, vector<4x4xbf16>, vector<16x4xf32> -> vector<16x4xf32>
    %c0_27 = arith.constant 0 : index
    %c0_28 = arith.constant 0 : index
    %48 = vector.load %arg4[%c0_27, %c0_28] : memref<1x4xf32, #tpu.memory_space<vmem>>, vector<1x4xf32>
    %49 = vector.broadcast %48 : vector<1x4xf32> to vector<16x4xf32>
    %50 = arith.addf %47, %49 : vector<16x4xf32>
    %51 = arith.negf %50 : vector<16x4xf32>
    %52 = math.exp %51 : vector<16x4xf32>
    %cst_29 = arith.constant 1.000000e+00 : f32
    %53 = vector.broadcast %cst_29 : f32 to vector<16x4xf32>
    %54 = arith.addf %53, %52 : vector<16x4xf32>
    %55 = arith.divf %53, %54 : vector<16x4xf32>
    %56 = arith.mulf %50, %55 : vector<16x4xf32>
    %57 = arith.truncf %56 : vector<16x4xf32> to vector<16x4xbf16>
    %c1_i32_30 = arith.constant 1 : i32
    %58 = arith.cmpi slt, %arg1, %c1_i32_30 : i32
    %cst_31 = arith.constant 0.000000e+00 : bf16
    %59 = vector.broadcast %cst_31 : bf16 to vector<16x4xbf16>
    %60 = arith.select %58, %57, %59 : vector<16x4xbf16>
    %c152 = arith.constant 152 : index
    %c0_32 = arith.constant 0 : index
    %61 = vector.load %arg8[%c152, %c0_32] : memref<176x4xbf16, #tpu.memory_space<vmem>>, vector<16x4xbf16>
    tpu.vector_store %arg8[%c152, %c0_32], %60 {strides = array<i32>} : memref<176x4xbf16, #tpu.memory_space<vmem>>, vector<16x4xbf16>,
    %62 = tpu.iota {dimensions = array<i32: 1>} : vector<8x16x4xi32>
    %63 = vector.shape_cast %62 : vector<8x16x4xi32> to vector<128x4xi32>
    %c1_i32_33 = arith.constant 1 : i32
    %64 = vector.broadcast %c1_i32_33 : i32 to vector<128x4xi32>
    %65 = arith.cmpi sge, %63, %64 : vector<128x4xi32>
    %c14_i32 = arith.constant 14 : i32
    %66 = vector.broadcast %c14_i32 : i32 to vector<128x4xi32>
    %67 = arith.cmpi sle, %63, %66 : vector<128x4xi32>
    %cst_34 = arith.constant 0.000000e+00 : bf16
    %68 = vector.broadcast %cst_34 : bf16 to vector<128x4xbf16>
    %cst_35 = arith.constant 0.000000e+00 : f32
    %69 = vector.broadcast %cst_35 : f32 to vector<128x4xf32>
    %c7 = arith.constant 7 : index
    %c0_36 = arith.constant 0 : index
    %70 = vector.load %arg8[%c7, %c0_36] : memref<176x4xbf16, #tpu.memory_space<vmem>>, vector<128x4xbf16>
    %71 = arith.select %65, %70, %68 : vector<128x4xi1>, vector<128x4xbf16>
    %c8_37 = arith.constant 8 : index
    %c0_38 = arith.constant 0 : index
    %72 = vector.load %arg8[%c8_37, %c0_38] : memref<176x4xbf16, #tpu.memory_space<vmem>>, vector<128x4xbf16>
    %c9 = arith.constant 9 : index
    %c0_39 = arith.constant 0 : index
    %73 = vector.load %arg8[%c9, %c0_39] : memref<176x4xbf16, #tpu.memory_space<vmem>>, vector<128x4xbf16>
    %74 = arith.select %67, %73, %68 : vector<128x4xi1>, vector<128x4xbf16>
    %75 = tpu.concatenate %71, %72, %74 in 1 : vector<128x4xbf16>, vector<128x4xbf16>, vector<128x4xbf16> -> vector<128x12xbf16>
    %c0_40 = arith.constant 0 : index
    %c0_41 = arith.constant 0 : index
    %c0_42 = arith.constant 0 : index
    %76 = vector.load %arg5[%c0_40, %c0_41, %c0_42] : memref<3x12x4xbf16, #tpu.memory_space<vmem>>, vector<1x12x4xbf16>
    %77 = vector.shape_cast %76 : vector<1x12x4xbf16> to vector<12x4xbf16>
    %cst_43 = arith.constant dense<0.000000e+00> : vector<128x4xf32>
    %78 = tpu.matmul %75, %77, %cst_43 {dimension_numbers = #tpu.dot_dimension_numbers<[1], [0], [0], [1], [0, 0, 1, 1], [], []>} : vector<128x12xbf16>, vector<12x4xbf16>, vector<128x4xf32> -> vector<128x4xf32>
    %79 = arith.addf %69, %78 : vector<128x4xf32>
    %c23 = arith.constant 23 : index
    %c0_44 = arith.constant 0 : index
    %80 = vector.load %arg8[%c23, %c0_44] : memref<176x4xbf16, #tpu.memory_space<vmem>>, vector<128x4xbf16>
    %81 = arith.select %65, %80, %68 : vector<128x4xi1>, vector<128x4xbf16>
    %c24_45 = arith.constant 24 : index
    %c0_46 = arith.constant 0 : index
    %82 = vector.load %arg8[%c24_45, %c0_46] : memref<176x4xbf16, #tpu.memory_space<vmem>>, vector<128x4xbf16>
    %c25 = arith.constant 25 : index
    %c0_47 = arith.constant 0 : index
    %83 = vector.load %arg8[%c25, %c0_47] : memref<176x4xbf16, #tpu.memory_space<vmem>>, vector<128x4xbf16>
    %84 = arith.select %67, %83, %68 : vector<128x4xi1>, vector<128x4xbf16>
    %85 = tpu.concatenate %81, %82, %84 in 1 : vector<128x4xbf16>, vector<128x4xbf16>, vector<128x4xbf16> -> vector<128x12xbf16>
    %c1 = arith.constant 1 : index
    %c0_48 = arith.constant 0 : index
    %c0_49 = arith.constant 0 : index
    %86 = vector.load %arg5[%c1, %c0_48, %c0_49] : memref<3x12x4xbf16, #tpu.memory_space<vmem>>, vector<1x12x4xbf16>
    %87 = vector.shape_cast %86 : vector<1x12x4xbf16> to vector<12x4xbf16>
    %cst_50 = arith.constant dense<0.000000e+00> : vector<128x4xf32>
    %88 = tpu.matmul %85, %87, %cst_50 {dimension_numbers = #tpu.dot_dimension_numbers<[1], [0], [0], [1], [0, 0, 1, 1], [], []>} : vector<128x12xbf16>, vector<12x4xbf16>, vector<128x4xf32> -> vector<128x4xf32>
    %89 = arith.addf %79, %88 : vector<128x4xf32>
    %c39 = arith.constant 39 : index
    %c0_51 = arith.constant 0 : index
    %90 = vector.load %arg8[%c39, %c0_51] : memref<176x4xbf16, #tpu.memory_space<vmem>>, vector<128x4xbf16>
    %91 = arith.select %65, %90, %68 : vector<128x4xi1>, vector<128x4xbf16>
    %c40 = arith.constant 40 : index
    %c0_52 = arith.constant 0 : index
    %92 = vector.load %arg8[%c40, %c0_52] : memref<176x4xbf16, #tpu.memory_space<vmem>>, vector<128x4xbf16>
    %c41 = arith.constant 41 : index
    %c0_53 = arith.constant 0 : index
    %93 = vector.load %arg8[%c41, %c0_53] : memref<176x4xbf16, #tpu.memory_space<vmem>>, vector<128x4xbf16>
    %94 = arith.select %67, %93, %68 : vector<128x4xi1>, vector<128x4xbf16>
    %95 = tpu.concatenate %91, %92, %94 in 1 : vector<128x4xbf16>, vector<128x4xbf16>, vector<128x4xbf16> -> vector<128x12xbf16>
    %c2 = arith.constant 2 : index
    %c0_54 = arith.constant 0 : index
    %c0_55 = arith.constant 0 : index
    %96 = vector.load %arg5[%c2, %c0_54, %c0_55] : memref<3x12x4xbf16, #tpu.memory_space<vmem>>, vector<1x12x4xbf16>
    %97 = vector.shape_cast %96 : vector<1x12x4xbf16> to vector<12x4xbf16>
    %cst_56 = arith.constant dense<0.000000e+00> : vector<128x4xf32>
    %98 = tpu.matmul %95, %97, %cst_56 {dimension_numbers = #tpu.dot_dimension_numbers<[1], [0], [0], [1], [0, 0, 1, 1], [], []>} : vector<128x12xbf16>, vector<12x4xbf16>, vector<128x4xf32> -> vector<128x4xf32>
    %99 = arith.addf %89, %98 : vector<128x4xf32>
    %c0_57 = arith.constant 0 : index
    %c0_58 = arith.constant 0 : index
    %100 = vector.load %arg6[%c0_57, %c0_58] : memref<1x4xf32, #tpu.memory_space<vmem>>, vector<1x4xf32>
    %101 = vector.broadcast %100 : vector<1x4xf32> to vector<128x4xf32>
    %102 = arith.addf %99, %101 : vector<128x4xf32>
    %103 = arith.negf %102 : vector<128x4xf32>
    %104 = math.exp %103 : vector<128x4xf32>
    %cst_59 = arith.constant 1.000000e+00 : f32
    %105 = vector.broadcast %cst_59 : f32 to vector<128x4xf32>
    %106 = arith.addf %105, %104 : vector<128x4xf32>
    %107 = arith.divf %105, %106 : vector<128x4xf32>
    %108 = arith.mulf %102, %107 : vector<128x4xf32>
    %109 = arith.extf %4 : vector<128x4xbf16> to vector<128x4xf32>
    %110 = arith.addf %108, %109 : vector<128x4xf32>
    %111 = vector.shape_cast %110 : vector<128x4xf32> to vector<8x16x4xf32>
    %112 = arith.truncf %111 : vector<8x16x4xf32> to vector<8x16x4xbf16>
    %c0_60 = arith.constant 0 : index
    %c0_61 = arith.constant 0 : index
    %c0_62 = arith.constant 0 : index
    %c0_63 = arith.constant 0 : index
    %113 = vector.load %arg7[%c0_60, %c0_61, %c0_62, %c0_63] : memref<1x8x16x4xbf16, #tpu.memory_space<vmem>>, vector<1x8x16x4xbf16>
    %114 = vector.shape_cast %113 : vector<1x8x16x4xbf16> to vector<8x16x4xbf16>
    %115 = vector.shape_cast %112 : vector<8x16x4xbf16> to vector<1x8x16x4xbf16>
    tpu.vector_store %arg7[%c0_60, %c0_61, %c0_62, %c0_63], %115 {strides = array<i32>} : memref<1x8x16x4xbf16, #tpu.memory_space<vmem>>, vector<1x8x16x4xbf16>,
    return
  }
  func.func @transform_0(%arg0: i32, %arg1: i32) -> (i32, i32, i32, i32) {
    %c0_i32 = arith.constant 0 : i32
    %c0_i32_0 = arith.constant 0 : i32
    %c0_i32_1 = arith.constant 0 : i32
    %c0_i32_2 = arith.constant 0 : i32
    return %arg0, %c0_i32, %c0_i32_0, %c0_i32_1 : i32, i32, i32, i32
  }
  func.func @transform_1(%arg0: i32, %arg1: i32) -> (i32, i32) {
    %c0_i32 = arith.constant 0 : i32
    %c0_i32_0 = arith.constant 0 : i32
    %c0_i32_1 = arith.constant 0 : i32
    return %c0_i32, %c0_i32_0 : i32, i32
  }
  func.func @transform_2(%arg0: i32, %arg1: i32) -> (i32, i32) {
    %c0_i32 = arith.constant 0 : i32
    %c0_i32_0 = arith.constant 0 : i32
    %c0_i32_1 = arith.constant 0 : i32
    return %c0_i32, %c0_i32_0 : i32, i32
  }
  func.func @transform_3(%arg0: i32, %arg1: i32) -> (i32, i32, i32) {
    %c0_i32 = arith.constant 0 : i32
    %c0_i32_0 = arith.constant 0 : i32
    %c0_i32_1 = arith.constant 0 : i32
    %c0_i32_2 = arith.constant 0 : i32
    return %c0_i32, %c0_i32_0, %c0_i32_1 : i32, i32, i32
  }
  func.func @transform_4(%arg0: i32, %arg1: i32) -> (i32, i32) {
    %c0_i32 = arith.constant 0 : i32
    %c0_i32_0 = arith.constant 0 : i32
    %c0_i32_1 = arith.constant 0 : i32
    return %c0_i32, %c0_i32_0 : i32, i32
  }
  func.func @transform_5(%arg0: i32, %arg1: i32) -> (i32, i32, i32, i32) {
    %c0_i32 = arith.constant 0 : i32
    %c0_i32_0 = arith.constant 0 : i32
    %c0_i32_1 = arith.constant 0 : i32
    return %arg0, %arg1, %c0_i32, %c0_i32_0 : i32, i32, i32, i32
  }
}

module attributes {stable_mosaic.version = 11 : i64} {
  func.func @_cv3_kernel(%arg0: i32, %arg1: i32, %arg2: memref<1x256x4xbf16, #tpu.memory_space<vmem>>, %arg3: memref<1x256x4xbf16, #tpu.memory_space<vmem>>, %arg4: memref<4x8xbf16, #tpu.memory_space<vmem>>, %arg5: memref<4x8xbf16, #tpu.memory_space<vmem>>, %arg6: memref<1x8xf32, #tpu.memory_space<vmem>>, %arg7: memref<1x8x256xf32, #tpu.memory_space<vmem>>) attributes {dimension_semantics = [#tpu.dimension_semantics<parallel>, #tpu.dimension_semantics<parallel>], iteration_bounds = array<i64: 2, 1>, scalar_prefetch = 0 : i64, scratch_operands = 0 : i64, tpu.core_type = #tpu.core_type<tc>, window_params = [{transform_indices = @transform_0, window_bounds = array<i64: 1, 256, 4>}, {transform_indices = @transform_1, window_bounds = array<i64: 1, 256, 4>}, {pipeline_mode = #tpu.pipeline_mode<synchronous>, transform_indices = @transform_2, window_bounds = array<i64: 4, 8>}, {pipeline_mode = #tpu.pipeline_mode<synchronous>, transform_indices = @transform_3, window_bounds = array<i64: 4, 8>}, {pipeline_mode = #tpu.pipeline_mode<synchronous>, transform_indices = @transform_4, window_bounds = array<i64: 1, 8>}, {transform_indices = @transform_5, window_bounds = array<i64: 1, 8, 256>}]} {
    %c0 = arith.constant 0 : index
    %c0_0 = arith.constant 0 : index
    %c0_1 = arith.constant 0 : index
    %0 = vector.load %arg2[%c0, %c0_0, %c0_1] : memref<1x256x4xbf16, #tpu.memory_space<vmem>>, vector<1x256x4xbf16>
    %1 = vector.shape_cast %0 : vector<1x256x4xbf16> to vector<256x4xbf16>
    %c0_2 = arith.constant 0 : index
    %c0_3 = arith.constant 0 : index
    %2 = vector.load %arg4[%c0_2, %c0_3] : memref<4x8xbf16, #tpu.memory_space<vmem>>, vector<4x8xbf16>
    %cst = arith.constant dense<0.000000e+00> : vector<256x8xf32>
    %3 = tpu.matmul %1, %2, %cst {dimension_numbers = #tpu.dot_dimension_numbers<[1], [0], [0], [1], [0, 0, 1, 1], [], []>} : vector<256x4xbf16>, vector<4x8xbf16>, vector<256x8xf32> -> vector<256x8xf32>
    %c0_4 = arith.constant 0 : index
    %c0_5 = arith.constant 0 : index
    %c0_6 = arith.constant 0 : index
    %4 = vector.load %arg3[%c0_4, %c0_5, %c0_6] : memref<1x256x4xbf16, #tpu.memory_space<vmem>>, vector<1x256x4xbf16>
    %5 = vector.shape_cast %4 : vector<1x256x4xbf16> to vector<256x4xbf16>
    %c0_7 = arith.constant 0 : index
    %c0_8 = arith.constant 0 : index
    %6 = vector.load %arg5[%c0_7, %c0_8] : memref<4x8xbf16, #tpu.memory_space<vmem>>, vector<4x8xbf16>
    %cst_9 = arith.constant dense<0.000000e+00> : vector<256x8xf32>
    %7 = tpu.matmul %5, %6, %cst_9 {dimension_numbers = #tpu.dot_dimension_numbers<[1], [0], [0], [1], [0, 0, 1, 1], [], []>} : vector<256x4xbf16>, vector<4x8xbf16>, vector<256x8xf32> -> vector<256x8xf32>
    %8 = arith.addf %3, %7 : vector<256x8xf32>
    %c0_10 = arith.constant 0 : index
    %c0_11 = arith.constant 0 : index
    %9 = vector.load %arg6[%c0_10, %c0_11] : memref<1x8xf32, #tpu.memory_space<vmem>>, vector<1x8xf32>
    %10 = vector.broadcast %9 : vector<1x8xf32> to vector<256x8xf32>
    %11 = arith.addf %8, %10 : vector<256x8xf32>
    %12 = arith.negf %11 : vector<256x8xf32>
    %13 = math.exp %12 : vector<256x8xf32>
    %cst_12 = arith.constant 1.000000e+00 : f32
    %14 = vector.broadcast %cst_12 : f32 to vector<256x8xf32>
    %15 = arith.addf %14, %13 : vector<256x8xf32>
    %16 = arith.divf %14, %15 : vector<256x8xf32>
    %17 = arith.mulf %11, %16 : vector<256x8xf32>
    %18 = tpu.transpose %17, [1, 0] : vector<256x8xf32> -> vector<8x256xf32>
    %c0_13 = arith.constant 0 : index
    %c0_14 = arith.constant 0 : index
    %c0_15 = arith.constant 0 : index
    %19 = vector.load %arg7[%c0_13, %c0_14, %c0_15] : memref<1x8x256xf32, #tpu.memory_space<vmem>>, vector<1x8x256xf32>
    %20 = vector.shape_cast %19 : vector<1x8x256xf32> to vector<8x256xf32>
    %21 = vector.shape_cast %18 : vector<8x256xf32> to vector<1x8x256xf32>
    tpu.vector_store %arg7[%c0_13, %c0_14, %c0_15], %21 {strides = array<i32>} : memref<1x8x256xf32, #tpu.memory_space<vmem>>, vector<1x8x256xf32>,
    return
  }
  func.func @transform_0(%arg0: i32, %arg1: i32) -> (i32, i32, i32) {
    %c0_i32 = arith.constant 0 : i32
    %c0_i32_0 = arith.constant 0 : i32
    return %arg0, %arg1, %c0_i32 : i32, i32, i32
  }
  func.func @transform_1(%arg0: i32, %arg1: i32) -> (i32, i32, i32) {
    %c0_i32 = arith.constant 0 : i32
    %c0_i32_0 = arith.constant 0 : i32
    return %arg0, %arg1, %c0_i32 : i32, i32, i32
  }
  func.func @transform_2(%arg0: i32, %arg1: i32) -> (i32, i32) {
    %c0_i32 = arith.constant 0 : i32
    %c0_i32_0 = arith.constant 0 : i32
    %c0_i32_1 = arith.constant 0 : i32
    return %c0_i32, %c0_i32_0 : i32, i32
  }
  func.func @transform_3(%arg0: i32, %arg1: i32) -> (i32, i32) {
    %c0_i32 = arith.constant 0 : i32
    %c0_i32_0 = arith.constant 0 : i32
    %c0_i32_1 = arith.constant 0 : i32
    return %c0_i32, %c0_i32_0 : i32, i32
  }
  func.func @transform_4(%arg0: i32, %arg1: i32) -> (i32, i32) {
    %c0_i32 = arith.constant 0 : i32
    %c0_i32_0 = arith.constant 0 : i32
    %c0_i32_1 = arith.constant 0 : i32
    return %c0_i32, %c0_i32_0 : i32, i32
  }
  func.func @transform_5(%arg0: i32, %arg1: i32) -> (i32, i32, i32) {
    %c0_i32 = arith.constant 0 : i32
    %c0_i32_0 = arith.constant 0 : i32
    return %arg0, %c0_i32, %arg1 : i32, i32, i32
  }
}

</mosaic_0001>

<bundles_post_ra>
// kernel: c3_pallas.3
= control target key start
LH: loop header
LB: loop body
LE: loop exit
PB: predicated region body
PF: predicated region fallthrough
CT: control target
= control target key end

     0   :  { %s2389_s21 = smov 0   ;;  %s2391_s22 = smov 0   ;;  %s2926_s0 = inlined_call_operand.vmem [shape: f32[2,4,256], index: 0, kind: input, shape index: {}]   ;;  %s2927_s1 = inlined_call_operand.vmem [shape: bf16[4,4], index: 1, kind: input, shape index: {}]   ;;  %s2928_s2 = inlined_call_operand.vmem [shape: bf16[4,4], index: 2, kind: input, shape index: {}]   ;;  %s2929_s3 = inlined_call_operand.vmem [shape: f32[1,4], index: 3, kind: input, shape index: {}]   ;;  %s2930_s4 = inlined_call_operand.vmem [shape: f32[1,4], index: 4, kind: input, shape index: {}]   ;;  %s2931_s5 = inlined_call_operand.vmem [shape: bf16[2,256,4], index: 5, kind: output, shape index: {0}]   ;;  %s2932_s6 = inlined_call_operand.vmem [shape: bf16[2,256,4], index: 6, kind: output, shape index: {1}]  }
   0x1   :  { %s2393_s23 = smov 0  }
   0x2 LB: > { %s29_s24 = sadd.s32 1, %s2348_s22  ;;  %p1704_p0 = scmp.ge.s32.totalorder %s2352_s23, 1  ;;  %s2352_s23 = sphi %s2393_s23, %s17_s23   ;;  %s2348_s22 = sphi %s2391_s22, %s2934_s22   ;;  %s2344_s21 = sphi %s2389_s21, %s2933_s21  }
   0x3   : > { %p31_p1 = scmp.ge.s32.totalorder %s29_s24, 2  ;;  %p238_p2 = scmp.lt.s32.totalorder %s2352_s23, 3 }
   0x5   : > { %s2936_s24 = smov (%p31_p1, %s29_s24), 0  ;;  %p239_p3 = pnand %p1704_p0, %p238_p2 }
   0x6   : > { %p286_p4 = scmp.lt.s32.totalorder (!%p239_p3), %s2344_s21, 1 }
   0x7   : > { %242 = sbr.rel (%p239_p3) target bundleno = 514 (0x202), region = 40 }
   0xc   : > { %s2938_s21 = smov (!%p286_p4, %s2344_s21), 1  ;;  %v400_v1 = vld [vmem:[%s2927_s1] sm:$0x3]  ;;  %vm457_vm0 = vcmask 1041408   ;;  %vm408_vm1 = vcmask 31744   ;;  %vm1146_vm2 = vcmask 27648  }
   0xd   : > { %s1875_s25 = sshll.u32 %s2938_s21, 3  ;;  %v622_v2 = vld [vmem:[%s2928_s2] sm:$0x3]  ;;  %2044 = vmatprep.subr.msk.bf16.mxu0 %vm457_vm0, %v400_v1  ;;  %v459_v3 = vsel %vm457_vm0, %v400_v1, 0  ;;  %s1876_s13 = sshll.u32 %s2938_s21, 7 }
   0xe   : > { %s293_s28 = scalar_lea.vmem %s2926_s0, %s1875_s25  ;;  %2045 = vmatprep.subr.msk.bf16.mxu1 %vm457_vm0, %v622_v2  ;;  %v631_v4 = vsel %vm457_vm0, %v622_v2, 0  ;;  %1977 = vmatpush3.bf16.msra.mxu0 %v459_v3  ;;  %v2454_v54 = vld [vmem:[%s2929_s3] ss:$0 sm:$0xff]  ;;  %s2538_s16 = scalar_lea.vmem %s2931_s5, %s1876_s13 }
   0xf   : > { %v316_v0 = vld [vmem:[%s293_s28] sm:$0xff]  ;;  %2011 = vmatpush3.bf16.msra.mxu1 %v631_v4  ;;  %s2550_s19 = scalar_lea.vmem %s2932_s6, %s1876_s13 }
  0x10   : > { %320 = vxpose.xlu0.b32.start.end [1/1] (short) %v316_v0, 128  ;;  %v318_v5 = vcombine.high %v316_v0, %v316_v0  ;;  %v2459_v55 = vld [vmem:[%s2930_s4] ss:$0 sm:$0xff] }
  0x4d   : > { %352 = vxpose.xlu0.b32.start.end [1/1] (short) %v318_v5, 128 }
  0x8c   : > { %v336_v6 = vpop.trf.xlu0 }
  0x90   : > { %v337_v7 = vpop.trf.xlu0 }
  0x91   : > { %v384_v8 = vpack.c.bf16 %v337_v7, %v336_v6 }
  0x93   : > { %1978 = vmatprep.mubr.msk.bf16.mxu0 %vm408_vm1, %v384_v8  ;;  %2012 = vmatprep.mubr.msk.bf16.mxu1 %vm408_vm1, %v384_v8 }
  0x94   : > { %v338_v9 = vpop.trf.xlu0 }
  0x98   : > { %v339_v10 = vpop.trf.xlu0 }
  0x99   : > { %v385_v11 = vpack.c.bf16 %v339_v10, %v338_v9 }
  0x9b   : > { %1979 = vmatmul.mubr.msk.bf16.vlgmr.msra.gmra.mxu0 %vm408_vm1, %v385_v11  ;;  %2013 = vmatmul.mubr.msk.bf16.vlgmr.msra.gmra.mxu1 %vm408_vm1, %v385_v11 }
  0x9c   : > { %v340_v12 = vpop.trf.xlu0 }
  0xa0   : > { %v341_v13 = vpop.trf.xlu0 }
  0xa1   : > { %v386_v14 = vpack.c.bf16 %v341_v13, %v340_v12 }
  0xa3   : > { %1982 = vmatprep.mubr.msk.bf16.mxu0 %vm408_vm1, %v386_v14  ;;  %2016 = vmatprep.mubr.msk.bf16.mxu1 %vm408_vm1, %v386_v14 }
  0xa4   : > { %v342_v15 = vpop.trf.xlu0 }
  0xa8   : > { %v343_v16 = vpop.trf.xlu0 }
  0xa9   : > { %v387_v17 = vpack.c.bf16 %v343_v16, %v342_v15 }
  0xab   : > { %1983 = vmatmul.mubr.msk.bf16.gmra.mxu0 %vm408_vm1, %v387_v17  ;;  %2017 = vmatmul.mubr.msk.bf16.gmra.mxu1 %vm408_vm1, %v387_v17 }
  0xac   : > { %v344_v18 = vpop.trf.xlu0 }
  0xb0   : > { %v345_v19 = vpop.trf.xlu0 }
  0xb1   : > { %v388_v20 = vpack.c.bf16 %v345_v19, %v344_v18 }
  0xb3   : > { %1986 = vmatprep.mubr.msk.bf16.mxu0 %vm408_vm1, %v388_v20  ;;  %2020 = vmatprep.mubr.msk.bf16.mxu1 %vm408_vm1, %v388_v20 }
  0xb4   : > { %v346_v21 = vpop.trf.xlu0 }
  0xb8   : > { %v347_v22 = vpop.trf.xlu0 }
  0xb9   : > { %v389_v23 = vpack.c.bf16 %v347_v22, %v346_v21 }
  0xbb   : > { %1987 = vmatmul.mubr.msk.bf16.gmra.mxu0 %vm408_vm1, %v389_v23  ;;  %2021 = vmatmul.mubr.msk.bf16.gmra.mxu1 %vm408_vm1, %v389_v23 }
  0xbc   : > { %v348_v24 = vpop.trf.xlu0 }
  0xc0   : > { %v349_v25 = vpop.trf.xlu0 }
  0xc1   : > { %v390_v26 = vpack.c.bf16 %v349_v25, %v348_v24 }
  0xc3   : > { %1990 = vmatprep.mubr.msk.bf16.mxu0 %vm408_vm1, %v390_v26  ;;  %2024 = vmatprep.mubr.msk.bf16.mxu1 %vm408_vm1, %v390_v26 }
  0xc4   : > { %v350_v27 = vpop.trf.xlu0 }
  0xc8   : > { %v351_v28 = vpop.trf.xlu0 }
  0xc9   : > { %v391_v29 = vpack.c.bf16 %v351_v28, %v350_v27 }
  0xcb   : > { %1991 = vmatmul.mubr.msk.bf16.gmra.mxu0 %vm408_vm1, %v391_v29  ;;  %2025 = vmatmul.mubr.msk.bf16.gmra.mxu1 %vm408_vm1, %v391_v29 }
  0xcc   : > { %v368_v30 = vpop.trf.xlu0 }
  0xd0   : > { %v369_v31 = vpop.trf.xlu0 }
  0xd1   : > { %v392_v32 = vpack.c.bf16 %v369_v31, %v368_v30 }
  0xd3   : > { %1994 = vmatprep.mubr.msk.bf16.mxu0 %vm408_vm1, %v392_v32  ;;  %2028 = vmatprep.mubr.msk.bf16.mxu1 %vm408_vm1, %v392_v32 }
  0xd4   : > { %v370_v33 = vpop.trf.xlu0 }
  0xd8   : > { %v371_v34 = vpop.trf.xlu0 }
  0xd9   : > { %v393_v35 = vpack.c.bf16 %v371_v34, %v370_v33 }
  0xdb   : > { %1995 = vmatmul.mubr.msk.bf16.gmra.mxu0 %vm408_vm1, %v393_v35  ;;  %2029 = vmatmul.mubr.msk.bf16.gmra.mxu1 %vm408_vm1, %v393_v35 }
  0xdc   : > { %v372_v36 = vpop.trf.xlu0 }
  0xe0   : > { %v373_v37 = vpop.trf.xlu0 }
  0xe1   : > { %v394_v38 = vpack.c.bf16 %v373_v37, %v372_v36 }
  0xe3   : > { %1998 = vmatprep.mubr.msk.bf16.mxu0 %vm408_vm1, %v394_v38  ;;  %2032 = vmatprep.mubr.msk.bf16.mxu1 %vm408_vm1, %v394_v38 }
  0xe4   : > { %v374_v39 = vpop.trf.xlu0 }
  0xe8   : > { %v375_v40 = vpop.trf.xlu0 }
  0xe9   : > { %v395_v41 = vpack.c.bf16 %v375_v40, %v374_v39 }
  0xeb   : > { %1999 = vmatmul.mubr.msk.bf16.gmra.mxu0 %vm408_vm1, %v395_v41  ;;  %2033 = vmatmul.mubr.msk.bf16.gmra.mxu1 %vm408_vm1, %v395_v41 }
  0xec   : > { %v376_v42 = vpop.trf.xlu0 }
  0xf0   : > { %v377_v43 = vpop.trf.xlu0 }
  0xf1   : > { %v396_v44 = vpack.c.bf16 %v377_v43, %v376_v42 }
  0xf3   : > { %2002 = vmatprep.mubr.msk.bf16.mxu0 %vm408_vm1, %v396_v44  ;;  %2036 = vmatprep.mubr.msk.bf16.mxu1 %vm408_vm1, %v396_v44 }
  0xf4   : > { %v378_v45 = vpop.trf.xlu0 }
  0xf8   : > { %v379_v46 = vpop.trf.xlu0 }
  0xf9   : > { %v397_v47 = vpack.c.bf16 %v379_v46, %v378_v45 }
  0xfb   : > { %2003 = vmatmul.mubr.msk.bf16.gmra.mxu0 %vm408_vm1, %v397_v47  ;;  %2037 = vmatmul.mubr.msk.bf16.gmra.mxu1 %vm408_vm1, %v397_v47 }
  0xfc   : > { %v380_v48 = vpop.trf.xlu0 }
 0x100   : > { %v381_v49 = vpop.trf.xlu0 }
 0x101   : > { %v398_v50 = vpack.c.bf16 %v381_v49, %v380_v48 }
 0x103   : > { %2006 = vmatprep.mubr.msk.bf16.mxu0 %vm408_vm1, %v398_v50  ;;  %2040 = vmatprep.mubr.msk.bf16.mxu1 %vm408_vm1, %v398_v50 }
 0x104   : > { %v382_v51 = vpop.trf.xlu0 }
 0x108   : > { %v383_v52 = vpop.trf.xlu0 }
 0x109   : > { %v399_v53 = vpack.c.bf16 %v383_v52, %v382_v51 }
 0x10b   : > { %2007 = vmatmul.mubr.msk.bf16.gmra.mxu0 %vm408_vm1, %v399_v53  ;;  %2041 = vmatmul.mubr.msk.bf16.gmra.mxu1 %vm408_vm1, %v399_v53 }
 0x15b   : > { %v1980_v56 = vpop.f32.mrf.mxu0  ;;  %v2014_v57 = vpop.f32.mrf.mxu1 }
 0x15c   : > { %v2462_v58 = vadd.f32 %v1980_v56, %v2454_v54  ;;  %v2465_v59 = vadd.f32 %v2014_v57, %v2459_v55 }
 0x15d   : > { %v495_v60 = vpop.f32.mrf.mxu0  ;;  %v667_v61 = vpop.f32.mrf.mxu1 }
 0x15e   : > { %v1747_v62 = vmul.f32 -1.442695, %v2462_v58  ;;  %v1811_v63 = vmul.f32 -1.442695, %v2465_v59  ;;  %v2470_v0 = vadd.f32 %v2454_v54, %v495_v60  ;;  %v2473_v1 = vadd.f32 %v2459_v55, %v667_v61 }
 0x15f   : > { %v1981_v2 = vpop.f32.mrf.mxu0  ;;  %v2015_v3 = vpop.f32.mrf.mxu1 }
 0x160   : > { %2072 = vpow2.f32 %v1747_v62  ;;  %v1745_v4 = vmul.f32 -1.442695, %v2470_v0  ;;  %v1809_v5 = vmul.f32 -1.442695, %v2473_v1  ;;  %v2478_v6 = vadd.f32 %v1981_v2, %v2454_v54 }
 0x161   : > { %2074 = vpow2.f32 %v1811_v63  ;;  %v2481_v7 = vadd.f32 %v2015_v3, %v2459_v55  ;;  %v498_v8 = vpop.f32.mrf.mxu0  ;;  %v670_v9 = vpop.f32.mrf.mxu1 }
 0x162   : > { %2076 = vpow2.f32 %v1745_v4  ;;  %v1748_v10 = vmul.f32 -1.442695, %v2478_v6  ;;  %v2485_v11 = vadd.f32 %v2454_v54, %v498_v8  ;;  %v2488_v12 = vadd.f32 %v2459_v55, %v670_v9 }
 0x163   : > { %2078 = vpow2.f32 %v1809_v5  ;;  %v1812_v13 = vmul.f32 -1.442695, %v2481_v7 }
 0x164   : > { %2080 = vpow2.f32 %v1748_v10  ;;  %v1746_v14 = vmul.f32 -1.442695, %v2485_v11  ;;  %v1810_v15 = vmul.f32 -1.442695, %v2488_v12 }
 0x165   : > { %2082 = vpow2.f32 %v1812_v13 }
 0x166   : > { %2084 = vpow2.f32 %v1746_v14 }
 0x167   : > { %2086 = vpow2.f32 %v1810_v15 }
 0x16b   : > { %v1984_v16 = vpop.f32.mrf.mxu0  ;;  %v2018_v17 = vpop.f32.mrf.mxu1 }
 0x16c   : > { %v2494_v28 = vadd.f32 %v1984_v16, %v2454_v54  ;;  %v2497_v32 = vadd.f32 %v2018_v17, %v2459_v55 }
 0x16d   : > { %v2073_v18 = vpop.eup %2072  ;;  %v511_v19 = vpop.f32.mrf.mxu0 }
 0x16e   : > { %v683_v20 = vpop.f32.mrf.mxu1  ;;  %v2075_v21 = vpop.eup %2074  ;;  %v892_v22 = vadd.f32 1.0, %v2073_v18  ;;  %v2500_v35 = vadd.f32 %v2454_v54, %v511_v19  ;;  %v1751_v42 = vmul.f32 -1.442695, %v2494_v28  ;;  %v1815_v46 = vmul.f32 -1.442695, %v2497_v32 }
 0x16f   : > { %v2077_v23 = vpop.eup %2076  ;;  %v1277_v24 = vadd.f32 1.0, %v2075_v21  ;;  %v1985_v25 = vpop.f32.mrf.mxu0  ;;  %v2503_v38 = vadd.f32 %v2459_v55, %v683_v20 }
 0x170   : > { %v2079_v26 = vpop.eup %2078  ;;  %2088 = vrcp.f32 %v892_v22  ;;  %v890_v27 = vadd.f32 1.0, %v2077_v23  ;;  %v2019_v29 = vpop.f32.mrf.mxu1  ;;  %v2507_v43 = vadd.f32 %v1985_v25, %v2454_v54  ;;  %v1749_v48 = vmul.f32 -1.442695, %v2500_v35 }
 0x171   : > { %v2081_v30 = vpop.eup %2080  ;;  %2090 = vrcp.f32 %v1277_v24  ;;  %v1275_v31 = vadd.f32 1.0, %v2079_v26  ;;  %v514_v39 = vpop.f32.mrf.mxu0  ;;  %v2511_v47 = vadd.f32 %v2019_v29, %v2459_v55  ;;  %v1813_v50 = vmul.f32 -1.442695, %v2503_v38 }
 0x172   : > { %v2083_v33 = vpop.eup %2082  ;;  %2092 = vrcp.f32 %v890_v27  ;;  %v893_v34 = vadd.f32 1.0, %v2081_v30  ;;  %v686_v44 = vpop.f32.mrf.mxu1  ;;  %v2515_v49 = vadd.f32 %v2454_v54, %v514_v39  ;;  %v1752_v52 = vmul.f32 -1.442695, %v2507_v43 }
 0x173   : > { %v2085_v36 = vpop.eup %2084  ;;  %2094 = vrcp.f32 %v1275_v31  ;;  %v1278_v37 = vadd.f32 1.0, %v2083_v33  ;;  %v2519_v51 = vadd.f32 %v2459_v55, %v686_v44  ;;  %v1816_v53 = vmul.f32 -1.442695, %v2511_v47 }
 0x174   : > { %v2087_v40 = vpop.eup %2086  ;;  %2096 = vrcp.f32 %v893_v34  ;;  %v891_v41 = vadd.f32 1.0, %v2085_v36  ;;  %v1750_v56 = vmul.f32 -1.442695, %v2515_v49 }
 0x175   : > { %2098 = vrcp.f32 %v1278_v37  ;;  %v1276_v45 = vadd.f32 1.0, %v2087_v40  ;;  %v1814_v57 = vmul.f32 -1.442695, %v2519_v51 }
 0x176   : > { %2100 = vrcp.f32 %v891_v41 }
 0x177   : > { %2102 = vrcp.f32 %v1276_v45 }
 0x178   : > { %2104 = vpow2.f32 %v1751_v42 }
 0x179   : > { %2106 = vpow2.f32 %v1815_v46 }
 0x17a   : > { %2108 = vpow2.f32 %v1749_v48 }
 0x17b   : > { %2110 = vpow2.f32 %v1813_v50  ;;  %v1988_v60 = vpop.f32.mrf.mxu0  ;;  %v2022_v61 = vpop.f32.mrf.mxu1 }
 0x17c   : > { %2112 = vpow2.f32 %v1752_v52  ;;  %v2527_v62 = vadd.f32 %v1988_v60, %v2454_v54  ;;  %v2530_v63 = vadd.f32 %v2022_v61, %v2459_v55 }
 0x17d   : > { %v2089_v2 = vpop.eup %2088  ;;  %2114 = vpow2.f32 %v1816_v53  ;;  %v527_v3 = vpop.f32.mrf.mxu0 }
 0x17e   : > { %v699_v4 = vpop.f32.mrf.mxu1  ;;  %v2091_v5 = vpop.eup %2090  ;;  %v988_v8 = vmul.f32 %v2089_v2, %v2462_v58  ;;  %2116 = vpow2.f32 %v1750_v56  ;;  %v1755_v9 = vmul.f32 -1.442695, %v2527_v62  ;;  %v1819_v10 = vmul.f32 -1.442695, %v2530_v63 }
 0x17f   : > { %v2093_v13 = vpop.eup %2092  ;;  %v1373_v14 = vmul.f32 %v2091_v5, %v2465_v59  ;;  %2118 = vpow2.f32 %v1814_v57  ;;  %v2542_v15 = vadd.f32 %v2454_v54, %v527_v3  ;;  %v2545_v58 = vadd.f32 %v2459_v55, %v699_v4  ;;  %v1989_v16 = vpop.f32.mrf.mxu0 }
 0x180   : > { %v2095_v17 = vpop.eup %2094  ;;  %v1880_v18 = vpack.c.bf16 %v988_v8, %v988_v8  ;;  %v986_v19 = vmul.f32 %v2093_v13, %v2470_v0  ;;  %2120 = vpow2.f32 %v1755_v9  ;;  %v2554_v59 = vadd.f32 %v1989_v16, %v2454_v54  ;;  %v2023_v20 = vpop.f32.mrf.mxu1 }
 0x181   : > { %v2097_v21 = vpop.eup %2096  ;;  %v1912_v22 = vpack.c.bf16 %v1373_v14, %v1373_v14  ;;  %v1371_v23 = vmul.f32 %v2095_v17, %v2473_v1  ;;  %2122 = vpow2.f32 %v1819_v10  ;;  %v1753_v24 = vmul.f32 -1.442695, %v2542_v15  ;;  %v530_v48 = vpop.f32.mrf.mxu0 }
 0x182   : > { %v2099_v25 = vpop.eup %2098  ;;  %1149 = vst.msk [vmem:[%s2538_s16 + $0x8] sm:$0xf] %vm1146_vm2, %v1880_v18  ;;  %v1878_v26 = vpack.c.bf16 %v986_v19, %v986_v19  ;;  %v989_v0 = vmul.f32 %v2097_v21, %v2478_v6  ;;  %v1817_v27 = vmul.f32 -1.442695, %v2545_v58  ;;  %v1756_v29 = vmul.f32 -1.442695, %v2554_v59  ;;  %v702_v56 = vpop.f32.mrf.mxu1 }
 0x183   : > { %v2101_v30 = vpop.eup %2100  ;;  %1533 = vst.msk [vmem:[%s2550_s19 + $0x8] sm:$0xf] %vm1146_vm2, %v1912_v22  ;;  %v1910_v31 = vpack.c.bf16 %v1371_v23, %v1371_v23  ;;  %v1374_v1 = vmul.f32 %v2099_v25, %v2481_v7  ;;  %2124 = vpow2.f32 %v1753_v24  ;;  %v2567_v33 = vadd.f32 %v2023_v20, %v2459_v55 }
 0x184   : > { %v2103_v34 = vpop.eup %2102  ;;  %1147 = vst.msk [vmem:[%s2538_s16] sm:$0xf] %vm1146_vm2, %v1878_v26  ;;  %v1881_v6 = vpack.c.bf16 %v989_v0, %v989_v0  ;;  %v987_v36 = vmul.f32 %v2101_v30, %v2485_v11  ;;  %2126 = vpow2.f32 %v1817_v27  ;;  %v2585_v61 = vadd.f32 %v2454_v54, %v530_v48 }
 0x185   : > { %v2105_v37 = vpop.eup %2104  ;;  %1531 = vst.msk [vmem:[%s2550_s19] sm:$0xf] %vm1146_vm2, %v1910_v31  ;;  %v1913_v39 = vpack.c.bf16 %v1374_v1, %v1374_v1  ;;  %v1372_v40 = vmul.f32 %v2103_v34, %v2488_v12  ;;  %2128 = vpow2.f32 %v1756_v29  ;;  %v1820_v7 = vmul.f32 -1.442695, %v2567_v33 }
 0x186   : > { %v2107_v41 = vpop.eup %2106  ;;  %1150 = vst.msk [vmem:[%s2538_s16 + $0xc] sm:$0xf] %vm1146_vm2, %v1881_v6  ;;  %v1879_v42 = vpack.c.bf16 %v987_v36, %v987_v36  ;;  %v896_v44 = vadd.f32 1.0, %v2105_v37  ;;  %v1754_v19 = vmul.f32 -1.442695, %v2585_v61  ;;  %v2589_v20 = vadd.f32 %v2459_v55, %v702_v56 }
 0x187   : > { %v2109_v45 = vpop.eup %2108  ;;  %1534 = vst.msk [vmem:[%s2550_s19 + $0xc] sm:$0xf] %vm1146_vm2, %v1913_v39  ;;  %v1911_v11 = vpack.c.bf16 %v1372_v40, %v1372_v40  ;;  %v1281_v46 = vadd.f32 1.0, %v2107_v41  ;;  %2130 = vpow2.f32 %v1820_v7 }
 0x188   : > { %v2111_v50 = vpop.eup %2110  ;;  %1148 = vst.msk [vmem:[%s2538_s16 + $0x4] sm:$0xf] %vm1146_vm2, %v1879_v42  ;;  %2132 = vrcp.f32 %v896_v44  ;;  %v894_v12 = vadd.f32 1.0, %v2109_v45  ;;  %v1818_v31 = vmul.f32 -1.442695, %v2589_v20 }
 0x189   : > { %v2113_v52 = vpop.eup %2112  ;;  %1532 = vst.msk [vmem:[%s2550_s19 + $0x4] sm:$0xf] %vm1146_vm2, %v1911_v11  ;;  %2134 = vrcp.f32 %v1281_v46  ;;  %v1279_v53 = vadd.f32 1.0, %v2111_v50 }
 0x18a   : > { %v2115_v57 = vpop.eup %2114  ;;  %2136 = vrcp.f32 %v894_v12  ;;  %v897_v60 = vadd.f32 1.0, %v2113_v52 }
 0x18b   : > { %v2117_v2 = vpop.eup %2116  ;;  %2138 = vrcp.f32 %v1279_v53  ;;  %v1282_v3 = vadd.f32 1.0, %v2115_v57  ;;  %v1992_v4 = vpop.f32.mrf.mxu0 }
 0x18c   : > { %v2026_v5 = vpop.f32.mrf.mxu1  ;;  %v2119_v8 = vpop.eup %2118  ;;  %2140 = vrcp.f32 %v897_v60  ;;  %v895_v9 = vadd.f32 1.0, %v2117_v2  ;;  %v2592_v24 = vadd.f32 %v1992_v4, %v2454_v54 }
 0x18d   : > { %v2121_v10 = vpop.eup %2120  ;;  %2142 = vrcp.f32 %v1282_v3  ;;  %v1280_v13 = vadd.f32 1.0, %v2119_v8  ;;  %v543_v14 = vpop.f32.mrf.mxu0  ;;  %v2595_v27 = vadd.f32 %v2026_v5, %v2459_v55 }
 0x18e   : > { %v715_v16 = vpop.f32.mrf.mxu1  ;;  %v2123_v17 = vpop.eup %2122  ;;  %2144 = vrcp.f32 %v895_v9  ;;  %v900_v18 = vadd.f32 1.0, %v2121_v10  ;;  %v2599_v1 = vadd.f32 %v2454_v54, %v543_v14  ;;  %v1759_v39 = vmul.f32 -1.442695, %v2592_v24 }
 0x18f   : > { %2146 = vrcp.f32 %v1280_v13  ;;  %v1285_v21 = vadd.f32 1.0, %v2123_v17  ;;  %v1993_v22 = vpop.f32.mrf.mxu0  ;;  %v2602_v6 = vadd.f32 %v2459_v55, %v715_v16  ;;  %v1823_v44 = vmul.f32 -1.442695, %v2595_v27 }
 0x190   : > { %v2125_v23 = vpop.eup %2124  ;;  %2148 = vrcp.f32 %v900_v18  ;;  %v2027_v25 = vpop.f32.mrf.mxu1  ;;  %v2606_v40 = vadd.f32 %v1993_v22, %v2454_v54  ;;  %v1757_v48 = vmul.f32 -1.442695, %v2599_v1 }
 0x191   : > { %v2127_v26 = vpop.eup %2126  ;;  %2150 = vrcp.f32 %v1285_v21  ;;  %v898_v0 = vadd.f32 1.0, %v2125_v23  ;;  %v546_v36 = vpop.f32.mrf.mxu0  ;;  %v2610_v45 = vadd.f32 %v2027_v25, %v2459_v55  ;;  %v1821_v53 = vmul.f32 -1.442695, %v2602_v6 }
 0x192   : > { %v2129_v29 = vpop.eup %2128  ;;  %v1283_v30 = vadd.f32 1.0, %v2127_v26  ;;  %2152 = vpow2.f32 %v1754_v19  ;;  %v718_v7 = vpop.f32.mrf.mxu1  ;;  %v2615_v50 = vadd.f32 %v2454_v54, %v546_v36  ;;  %v1760_v2 = vmul.f32 -1.442695, %v2606_v40 }
 0x193   : > { %2154 = vrcp.f32 %v898_v0  ;;  %v901_v34 = vadd.f32 1.0, %v2129_v29  ;;  %v2620_v56 = vadd.f32 %v2459_v55, %v718_v7 }
 0x194   : > { %v2131_v37 = vpop.eup %2130  ;;  %2156 = vrcp.f32 %v1283_v30 }
 0x195   : > { %v2133_v41 = vpop.eup %2132  ;;  %2158 = vrcp.f32 %v901_v34  ;;  %v1286_v42 = vadd.f32 1.0, %v2131_v37  ;;  %v1822_v16 = vmul.f32 -1.442695, %v2620_v56 }
 0x196   : > { %v2135_v11 = vpop.eup %2134  ;;  %v992_v46 = vmul.f32 %v2133_v41, %v2494_v28  ;;  %2160 = vpow2.f32 %v1818_v31 }
 0x197   : > { %v2137_v12 = vpop.eup %2136  ;;  %v1377_v52 = vmul.f32 %v2135_v11, %v2497_v32  ;;  %2162 = vrcp.f32 %v1286_v42  ;;  %v1824_v32 = vmul.f32 -1.442695, %v2610_v45 }
 0x198   : > { %v2139_v57 = vpop.eup %2138  ;;  %v1884_v60 = vpack.c.bf16 %v992_v46, %v992_v46  ;;  %v990_v28 = vmul.f32 %v2137_v12, %v2500_v35  ;;  %2164 = vpow2.f32 %v1759_v39  ;;  %v1758_v35 = vmul.f32 -1.442695, %v2615_v50 }
 0x199   : > { %v2141_v3 = vpop.eup %2140  ;;  %v1916_v4 = vpack.c.bf16 %v1377_v52, %v1377_v52  ;;  %v1375_v5 = vmul.f32 %v2139_v57, %v2503_v38  ;;  %2166 = vpow2.f32 %v1823_v44 }
 0x19a   : > { %v2143_v8 = vpop.eup %2142  ;;  %1153 = vst.msk [vmem:[%s2538_s16 + $0x18] sm:$0xf] %vm1146_vm2, %v1884_v60  ;;  %v1882_v9 = vpack.c.bf16 %v990_v28, %v990_v28  ;;  %v993_v10 = vmul.f32 %v2141_v3, %v2507_v43  ;;  %2168 = vpow2.f32 %v1757_v48 }
 0x19b   : > { %v2145_v13 = vpop.eup %2144  ;;  %1537 = vst.msk [vmem:[%s2550_s19 + $0x18] sm:$0xf] %vm1146_vm2, %v1916_v4  ;;  %v1914_v14 = vpack.c.bf16 %v1375_v5, %v1375_v5  ;;  %v1378_v38 = vmul.f32 %v2143_v8, %v2511_v47  ;;  %2170 = vpow2.f32 %v1821_v53  ;;  %v1996_v17 = vpop.f32.mrf.mxu0 }
 0x19c   : > { %v2030_v18 = vpop.f32.mrf.mxu1  ;;  %v2147_v19 = vpop.eup %2146  ;;  %1151 = vst.msk [vmem:[%s2538_s16 + $0x10] sm:$0xf] %vm1146_vm2, %v1882_v9  ;;  %v1885_v43 = vpack.c.bf16 %v993_v10, %v993_v10  ;;  %v991_v21 = vmul.f32 %v2145_v13, %v2515_v49  ;;  %2172 = vpow2.f32 %v1760_v2  ;;  %v2638_v22 = vadd.f32 %v1996_v17, %v2454_v54 }
 0x19d   : > { %v2149_v23 = vpop.eup %2148  ;;  %1535 = vst.msk [vmem:[%s2550_s19 + $0x10] sm:$0xf] %vm1146_vm2, %v1914_v14  ;;  %v1917_v47 = vpack.c.bf16 %v1378_v38, %v1378_v38  ;;  %v1376_v25 = vmul.f32 %v2147_v19, %v2519_v51  ;;  %2174 = vpow2.f32 %v1824_v32  ;;  %v2644_v26 = vadd.f32 %v2030_v18, %v2459_v55  ;;  %v559_v0 = vpop.f32.mrf.mxu0 }
 0x19e   : > { %v2151_v29 = vpop.eup %2150  ;;  %1154 = vst.msk [vmem:[%s2538_s16 + $0x1c] sm:$0xf] %vm1146_vm2, %v1885_v43  ;;  %v1883_v49 = vpack.c.bf16 %v991_v21, %v991_v21  ;;  %v996_v30 = vmul.f32 %v2149_v23, %v2527_v62  ;;  %2176 = vpow2.f32 %v1758_v35  ;;  %v1763_v31 = vmul.f32 -1.442695, %v2638_v22  ;;  %v731_v34 = vpop.f32.mrf.mxu1 }
 0x19f   : > { %v2153_v36 = vpop.eup %2152  ;;  %1538 = vst.msk [vmem:[%s2550_s19 + $0x1c] sm:$0xf] %vm1146_vm2, %v1917_v47  ;;  %v1915_v51 = vpack.c.bf16 %v1376_v25, %v1376_v25  ;;  %v1381_v37 = vmul.f32 %v2151_v29, %v2530_v63  ;;  %2178 = vpow2.f32 %v1822_v16  ;;  %v1827_v39 = vmul.f32 -1.442695, %v2644_v26  ;;  %v1997_v7 = vpop.f32.mrf.mxu0 }
 0x1a0   : > { %v2155_v41 = vpop.eup %2154  ;;  %1152 = vst.msk [vmem:[%s2538_s16 + $0x14] sm:$0xf] %vm1146_vm2, %v1883_v49  ;;  %v1888_v62 = vpack.c.bf16 %v996_v30, %v996_v30  ;;  %v899_v42 = vadd.f32 1.0, %v2153_v36  ;;  %2180 = vpow2.f32 %v1763_v31  ;;  %v2657_v44 = vadd.f32 %v2454_v54, %v559_v0  ;;  %v2031_v10 = vpop.f32.mrf.mxu1 }
 0x1a1   : > { %v2157_v11 = vpop.eup %2156  ;;  %1536 = vst.msk [vmem:[%s2550_s19 + $0x14] sm:$0xf] %vm1146_vm2, %v1915_v51  ;;  %v1920_v46 = vpack.c.bf16 %v1381_v37, %v1381_v37  ;;  %v994_v63 = vmul.f32 %v2155_v41, %v2542_v15  ;;  %2182 = vpow2.f32 %v1827_v39  ;;  %v2663_v48 = vadd.f32 %v2459_v55, %v731_v34  ;;  %v562_v18 = vpop.f32.mrf.mxu0 }
 0x1a2   : > { %v2159_v12 = vpop.eup %2158  ;;  %1157 = vst.msk [vmem:[%s2538_s16 + $0x28] sm:$0xf] %vm1146_vm2, %v1888_v62  ;;  %v1379_v52 = vmul.f32 %v2157_v11, %v2545_v58  ;;  %2184 = vrcp.f32 %v899_v42  ;;  %v1761_v53 = vmul.f32 -1.442695, %v2657_v44  ;;  %v2670_v57 = vadd.f32 %v1997_v7, %v2454_v54  ;;  %v734_v43 = vpop.f32.mrf.mxu1 }
 0x1a3   : > { %v2161_v60 = vpop.eup %2160  ;;  %1541 = vst.msk [vmem:[%s2550_s19 + $0x28] sm:$0xf] %vm1146_vm2, %v1920_v46  ;;  %v1886_v15 = vpack.c.bf16 %v994_v63, %v994_v63  ;;  %v997_v28 = vmul.f32 %v2159_v12, %v2554_v59  ;;  %v1825_v2 = vmul.f32 -1.442695, %v2663_v48  ;;  %v2687_v47 = vadd.f32 %v2031_v10, %v2459_v55 }
 0x1a4   : > { %v2163_v3 = vpop.eup %2162  ;;  %v1918_v4 = vpack.c.bf16 %v1379_v52, %v1379_v52  ;;  %v1284_v5 = vadd.f32 1.0, %v2161_v60  ;;  %2186 = vpow2.f32 %v1761_v53  ;;  %v1764_v58 = vmul.f32 -1.442695, %v2670_v57 }
 0x1a5   : > { %v2165_v32 = vpop.eup %2164  ;;  %1155 = vst.msk [vmem:[%s2538_s16 + $0x20] sm:$0xf] %vm1146_vm2, %v1886_v15  ;;  %v1889_v8 = vpack.c.bf16 %v997_v28, %v997_v28  ;;  %v1382_v9 = vmul.f32 %v2163_v3, %v2567_v33  ;;  %2188 = vpow2.f32 %v1825_v2  ;;  %v2690_v29 = vadd.f32 %v2454_v54, %v562_v18 }
 0x1a6   : > { %v2167_v35 = vpop.eup %2166  ;;  %1539 = vst.msk [vmem:[%s2550_s19 + $0x20] sm:$0xf] %vm1146_vm2, %v1918_v4  ;;  %2190 = vrcp.f32 %v1284_v5  ;;  %v904_v59 = vadd.f32 1.0, %v2165_v32  ;;  %v1828_v62 = vmul.f32 -1.442695, %v2687_v47  ;;  %v2694_v42 = vadd.f32 %v2459_v55, %v734_v43 }
 0x1a7   : > { %v2169_v13 = vpop.eup %2168  ;;  %1158 = vst.msk [vmem:[%s2538_s16 + $0x2c] sm:$0xf] %vm1146_vm2, %v1889_v8  ;;  %v1921_v14 = vpack.c.bf16 %v1382_v9, %v1382_v9  ;;  %v1289_v38 = vadd.f32 1.0, %v2167_v35  ;;  %2192 = vpow2.f32 %v1764_v58  ;;  %v1762_v63 = vmul.f32 -1.442695, %v2690_v29 }
 0x1a8   : > { %v2171_v16 = vpop.eup %2170  ;;  %2194 = vrcp.f32 %v904_v59  ;;  %v902_v17 = vadd.f32 1.0, %v2169_v13  ;;  %v1826_v58 = vmul.f32 -1.442695, %v2694_v42 }
 0x1a9   : > { %v2173_v19 = vpop.eup %2172  ;;  %1542 = vst.msk [vmem:[%s2550_s19 + $0x2c] sm:$0xf] %vm1146_vm2, %v1921_v14  ;;  %2196 = vrcp.f32 %v1289_v38  ;;  %v1287_v33 = vadd.f32 1.0, %v2171_v16 }
 0x1aa   : > { %v2175_v21 = vpop.eup %2174  ;;  %2198 = vrcp.f32 %v902_v17  ;;  %v905_v23 = vadd.f32 1.0, %v2173_v19 }
 0x1ab   : > { %v2177_v25 = vpop.eup %2176  ;;  %2200 = vrcp.f32 %v1287_v33  ;;  %v1290_v0 = vadd.f32 1.0, %v2175_v21  ;;  %v2000_v49 = vpop.f32.mrf.mxu0 }
 0x1ac   : > { %v2034_v30 = vpop.f32.mrf.mxu1  ;;  %v2179_v31 = vpop.eup %2178  ;;  %2202 = vrcp.f32 %v905_v23  ;;  %v903_v34 = vadd.f32 1.0, %v2177_v25  ;;  %v2698_v12 = vadd.f32 %v2000_v49, %v2454_v54 }
 0x1ad   : > { %v2181_v36 = vpop.eup %2180  ;;  %2204 = vrcp.f32 %v1290_v0  ;;  %v1288_v51 = vadd.f32 1.0, %v2179_v31  ;;  %v575_v37 = vpop.f32.mrf.mxu0  ;;  %v2702_v60 = vadd.f32 %v2034_v30, %v2459_v55 }
 0x1ae   : > { %v747_v39 = vpop.f32.mrf.mxu1  ;;  %v2183_v7 = vpop.eup %2182  ;;  %2206 = vrcp.f32 %v903_v34  ;;  %v908_v41 = vadd.f32 1.0, %v2181_v36  ;;  %v2705_v2 = vadd.f32 %v2454_v54, %v575_v37 }
 0x1af   : > { %v2185_v11 = vpop.eup %2184  ;;  %2208 = vrcp.f32 %v1288_v51  ;;  %v1293_v46 = vadd.f32 1.0, %v2183_v7  ;;  %v2001_v52 = vpop.f32.mrf.mxu0  ;;  %v2710_v9 = vadd.f32 %v2459_v55, %v747_v39  ;;  %v1831_v13 = vmul.f32 -1.442695, %v2702_v60 }
 0x1b0   : > { %v995_v53 = vmul.f32 %v2185_v11, %v2585_v61  ;;  %2210 = vrcp.f32 %v908_v41  ;;  %v2035_v15 = vpop.f32.mrf.mxu1  ;;  %v1767_v61 = vmul.f32 -1.442695, %v2698_v12  ;;  %v2717_v14 = vadd.f32 %v2001_v52, %v2454_v54 }
 0x1b1   : > { %v2187_v28 = vpop.eup %2186  ;;  %2212 = vrcp.f32 %v1293_v46  ;;  %v578_v10 = vpop.f32.mrf.mxu0  ;;  %v1765_v18 = vmul.f32 -1.442695, %v2705_v2  ;;  %v2721_v19 = vadd.f32 %v2035_v15, %v2459_v55  ;;  %v1829_v0 = vmul.f32 -1.442695, %v2710_v9 }
 0x1b2   : > { %v2189_v3 = vpop.eup %2188  ;;  %v1887_v4 = vpack.c.bf16 %v995_v53, %v995_v53  ;;  %v906_v5 = vadd.f32 1.0, %v2187_v28  ;;  %2214 = vpow2.f32 %v1828_v62  ;;  %v750_v38 = vpop.f32.mrf.mxu1  ;;  %v2725_v21 = vadd.f32 %v2454_v54, %v578_v10 }
 0x1b3   : > { %v2191_v32 = vpop.eup %2190  ;;  %v1291_v8 = vadd.f32 1.0, %v2189_v3  ;;  %2216 = vpow2.f32 %v1762_v63  ;;  %v2730_v49 = vadd.f32 %v2459_v55, %v750_v38  ;;  %v1768_v34 = vmul.f32 -1.442695, %v2717_v14 }
 0x1b4   : > { %v2193_v35 = vpop.eup %2192  ;;  %1156 = vst.msk [vmem:[%s2538_s16 + $0x24] sm:$0xf] %vm1146_vm2, %v1887_v4  ;;  %v1380_v59 = vmul.f32 %v2191_v32, %v2589_v20  ;;  %2218 = vrcp.f32 %v906_v5  ;;  %v1832_v37 = vmul.f32 -1.442695, %v2721_v19 }
 0x1b5   : > { %v2195_v16 = vpop.eup %2194  ;;  %2220 = vrcp.f32 %v1291_v8  ;;  %v909_v17 = vadd.f32 1.0, %v2193_v35  ;;  %v1830_v46 = vmul.f32 -1.442695, %v2730_v49 }
 0x1b6   : > { %v2197_v33 = vpop.eup %2196  ;;  %v1919_v43 = vpack.c.bf16 %v1380_v59, %v1380_v59  ;;  %v1000_v20 = vmul.f32 %v2195_v16, %v2592_v24  ;;  %2222 = vpow2.f32 %v1826_v58 }
 0x1b7   : > { %v2199_v23 = vpop.eup %2198  ;;  %v1385_v25 = vmul.f32 %v2197_v33, %v2595_v27  ;;  %2224 = vrcp.f32 %v909_v17 }
 0x1b8   : > { %v2201_v30 = vpop.eup %2200  ;;  %1540 = vst.msk [vmem:[%s2550_s19 + $0x24] sm:$0xf] %vm1146_vm2, %v1919_v43  ;;  %v1892_v31 = vpack.c.bf16 %v1000_v20, %v1000_v20  ;;  %v998_v24 = vmul.f32 %v2199_v23, %v2599_v1  ;;  %2226 = vpow2.f32 %v1767_v61  ;;  %v1766_v1 = vmul.f32 -1.442695, %v2725_v21 }
 0x1b9   : > { %v2203_v36 = vpop.eup %2202  ;;  %v1924_v51 = vpack.c.bf16 %v1385_v25, %v1385_v25  ;;  %v1383_v27 = vmul.f32 %v2201_v30, %v2602_v6  ;;  %2228 = vpow2.f32 %v1831_v13 }
 0x1ba   : > { %v2205_v39 = vpop.eup %2204  ;;  %1161 = vst.msk [vmem:[%s2538_s16 + $0x38] sm:$0xf] %vm1146_vm2, %v1892_v31  ;;  %v1890_v7 = vpack.c.bf16 %v998_v24, %v998_v24  ;;  %v1001_v41 = vmul.f32 %v2203_v36, %v2606_v40  ;;  %2230 = vpow2.f32 %v1765_v18 }
 0x1bb   : > { %v2207_v62 = vpop.eup %2206  ;;  %1545 = vst.msk [vmem:[%s2550_s19 + $0x38] sm:$0xf] %vm1146_vm2, %v1924_v51  ;;  %v1922_v11 = vpack.c.bf16 %v1383_v27, %v1383_v27  ;;  %v1386_v6 = vmul.f32 %v2205_v39, %v2610_v45  ;;  %2232 = vpow2.f32 %v1829_v0  ;;  %v2004_v63 = vpop.f32.mrf.mxu0 }
 0x1bc   : > { %v2038_v52 = vpop.f32.mrf.mxu1  ;;  %v2209_v53 = vpop.eup %2208  ;;  %1159 = vst.msk [vmem:[%s2538_s16 + $0x30] sm:$0xf] %vm1146_vm2, %v1890_v7  ;;  %v1893_v40 = vpack.c.bf16 %v1001_v41, %v1001_v41  ;;  %v999_v15 = vmul.f32 %v2207_v62, %v2615_v50  ;;  %2234 = vpow2.f32 %v1768_v34  ;;  %v2750_v28 = vadd.f32 %v2004_v63, %v2454_v54 }
 0x1bd   : > { %v2211_v3 = vpop.eup %2210  ;;  %1543 = vst.msk [vmem:[%s2550_s19 + $0x30] sm:$0xf] %vm1146_vm2, %v1922_v11  ;;  %v1925_v45 = vpack.c.bf16 %v1386_v6, %v1386_v6  ;;  %v1384_v4 = vmul.f32 %v2209_v53, %v2620_v56  ;;  %2236 = vpow2.f32 %v1832_v37  ;;  %v2756_v5 = vadd.f32 %v2038_v52, %v2459_v55  ;;  %v591_v58 = vpop.f32.mrf.mxu0 }
 0x1be   : > { %v2213_v32 = vpop.eup %2212  ;;  %1162 = vst.msk [vmem:[%s2538_s16 + $0x3c] sm:$0xf] %vm1146_vm2, %v1893_v40  ;;  %v1891_v50 = vpack.c.bf16 %v999_v15, %v999_v15  ;;  %v1004_v8 = vmul.f32 %v2211_v3, %v2638_v22  ;;  %2238 = vpow2.f32 %v1766_v1  ;;  %v1771_v61 = vmul.f32 -1.442695, %v2750_v28  ;;  %v763_v10 = vpop.f32.mrf.mxu1 }
 0x1bf   : > { %v2215_v35 = vpop.eup %2214  ;;  %1546 = vst.msk [vmem:[%s2550_s19 + $0x3c] sm:$0xf] %vm1146_vm2, %v1925_v45  ;;  %v1923_v56 = vpack.c.bf16 %v1384_v4, %v1384_v4  ;;  %v1389_v59 = vmul.f32 %v2213_v32, %v2644_v26  ;;  %2240 = vpow2.f32 %v1830_v46  ;;  %v1835_v13 = vmul.f32 -1.442695, %v2756_v5  ;;  %v2005_v38 = vpop.f32.mrf.mxu0 }
 0x1c0   : > { %v2217_v16 = vpop.eup %2216  ;;  %1160 = vst.msk [vmem:[%s2538_s16 + $0x34] sm:$0xf] %vm1146_vm2, %v1891_v50  ;;  %v1896_v22 = vpack.c.bf16 %v1004_v8, %v1004_v8  ;;  %v1294_v17 = vadd.f32 1.0, %v2215_v35  ;;  %2242 = vpow2.f32 %v1771_v61  ;;  %v2769_v18 = vadd.f32 %v2454_v54, %v591_v58  ;;  %v2039_v41 = vpop.f32.mrf.mxu1 }
 0x1c1   : > { %v2219_v33 = vpop.eup %2218  ;;  %1544 = vst.msk [vmem:[%s2550_s19 + $0x34] sm:$0xf] %vm1146_vm2, %v1923_v56  ;;  %v1928_v43 = vpack.c.bf16 %v1389_v59, %v1389_v59  ;;  %v907_v26 = vadd.f32 1.0, %v2217_v16  ;;  %2244 = vpow2.f32 %v1835_v13  ;;  %v2774_v20 = vadd.f32 %v2459_v55, %v763_v10  ;;  %v594_v52 = vpop.f32.mrf.mxu0  ;;  %v2328_v59 = vld [vmem:[%s2930_s4] ss:$0 sm:$0xff] }
 0x1c2   : > { %v2221_v23 = vpop.eup %2220  ;;  %1165 = vst.msk [vmem:[%s2538_s16 + $0x48] sm:$0xf] %vm1146_vm2, %v1896_v22  ;;  %v1002_v25 = vmul.f32 %v2219_v33, %v2657_v44  ;;  %2246 = vrcp.f32 %v1294_v17  ;;  %v1769_v0 = vmul.f32 -1.442695, %v2769_v18  ;;  %v2781_v30 = vadd.f32 %v2005_v38, %v2454_v54  ;;  %v766_v40 = vpop.f32.mrf.mxu1  ;;  %v2329_v17 = vld [vmem:[%s2929_s3] ss:$0 sm:$0xff] }
 0x1c3   : > { %v2223_v31 = vpop.eup %2222  ;;  %1549 = vst.msk [vmem:[%s2550_s19 + $0x48] sm:$0xf] %vm1146_vm2, %v1928_v43  ;;  %v1387_v24 = vmul.f32 %v2221_v23, %v2663_v48  ;;  %2248 = vrcp.f32 %v907_v26  ;;  %v1833_v34 = vmul.f32 -1.442695, %v2774_v20  ;;  %v2796_v45 = vadd.f32 %v2039_v41, %v2459_v55 }
 0x1c4   : > { %v2225_v36 = vpop.eup %2224  ;;  %v1894_v51 = vpack.c.bf16 %v1002_v25, %v1002_v25  ;;  %v1292_v27 = vadd.f32 1.0, %v2223_v31  ;;  %2250 = vpow2.f32 %v1769_v0  ;;  %v1772_v44 = vmul.f32 -1.442695, %v2781_v30 }
 0x1c5   : > { %v2227_v37 = vpop.eup %2226  ;;  %v1926_v39 = vpack.c.bf16 %v1387_v24, %v1387_v24  ;;  %v1005_v7 = vmul.f32 %v2225_v36, %v2670_v57  ;;  %2252 = vpow2.f32 %v1833_v34  ;;  %v2799_v32 = vadd.f32 %v2454_v54, %v594_v52 }
 0x1c6   : > { %v2229_v1 = vpop.eup %2228  ;;  %1163 = vst.msk [vmem:[%s2538_s16 + $0x40] sm:$0xf] %vm1146_vm2, %v1894_v51  ;;  %2254 = vrcp.f32 %v1292_v27  ;;  %v912_v48 = vadd.f32 1.0, %v2227_v37  ;;  %v2804_v55 = vadd.f32 %v2328_v59, %v766_v40  ;;  %v1836_v22 = vmul.f32 -1.442695, %v2796_v45 }
 0x1c7   : > { %v2231_v62 = vpop.eup %2230  ;;  %1547 = vst.msk [vmem:[%s2550_s19 + $0x40] sm:$0xf] %vm1146_vm2, %v1926_v39  ;;  %v1897_v11 = vpack.c.bf16 %v1005_v7, %v1005_v7  ;;  %v1297_v6 = vadd.f32 1.0, %v2229_v1  ;;  %2256 = vpow2.f32 %v1772_v44  ;;  %v1770_v23 = vmul.f32 -1.442695, %v2799_v32 }
 0x1c8   : > { %v2233_v46 = vpop.eup %2232  ;;  %2258 = vrcp.f32 %v912_v48  ;;  %v910_v63 = vadd.f32 1.0, %v2231_v62  ;;  %v1834_v27 = vmul.f32 -1.442695, %v2804_v55 }
 0x1c9   : > { %v2235_v53 = vpop.eup %2234  ;;  %1166 = vst.msk [vmem:[%s2538_s16 + $0x4c] sm:$0xf] %vm1146_vm2, %v1897_v11  ;;  %2260 = vrcp.f32 %v1297_v6  ;;  %v1295_v57 = vadd.f32 1.0, %v2233_v46 }
 0x1ca   : > { %v2237_v15 = vpop.eup %2236  ;;  %2262 = vrcp.f32 %v910_v63  ;;  %v913_v3 = vadd.f32 1.0, %v2235_v53 }
 0x1cb   : > { %v2239_v4 = vpop.eup %2238  ;;  %2264 = vrcp.f32 %v1295_v57  ;;  %v1298_v58 = vadd.f32 1.0, %v2237_v15  ;;  %v2008_v50 = vpop.f32.mrf.mxu0 }
 0x1cc   : > { %v2042_v8 = vpop.f32.mrf.mxu1  ;;  %v2241_v61 = vpop.eup %2240  ;;  %2266 = vrcp.f32 %v913_v3  ;;  %v911_v10 = vadd.f32 1.0, %v2239_v4  ;;  %v2810_v33 = vadd.f32 %v2329_v17, %v2008_v50 }
 0x1cd   : > { %v2243_v35 = vpop.eup %2242  ;;  %2268 = vrcp.f32 %v1298_v58  ;;  %v1296_v56 = vadd.f32 1.0, %v2241_v61  ;;  %v607_v13 = vpop.f32.mrf.mxu0  ;;  %v2814_v24 = vadd.f32 %v2328_v59, %v2042_v8 }
 0x1ce   : > { %v779_v38 = vpop.f32.mrf.mxu1  ;;  %v2245_v16 = vpop.eup %2244  ;;  %2270 = vrcp.f32 %v911_v10  ;;  %v916_v54 = vadd.f32 1.0, %v2243_v35  ;;  %v2818_v44 = vadd.f32 %v2329_v17, %v607_v13 }
 0x1cf   : > { %v2247_v43 = vpop.eup %2246  ;;  %2272 = vrcp.f32 %v1296_v56  ;;  %v1301_v26 = vadd.f32 1.0, %v2245_v16  ;;  %v2009_v25 = vpop.f32.mrf.mxu0  ;;  %v2821_v62 = vadd.f32 %v2328_v59, %v779_v38  ;;  %v1839_v46 = vmul.f32 -1.442695, %v2814_v24 }
 0x1d0   : > { %v2249_v0 = vpop.eup %2248  ;;  %v1390_v31 = vmul.f32 %v2247_v43, %v2687_v47  ;;  %2274 = vrcp.f32 %v916_v54  ;;  %v2043_v34 = vpop.f32.mrf.mxu1  ;;  %v1775_v47 = vmul.f32 -1.442695, %v2810_v33  ;;  %v2827_v63 = vadd.f32 %v2329_v17, %v2009_v25 }
 0x1d1   : > { %v2251_v36 = vpop.eup %2250  ;;  %v1003_v51 = vmul.f32 %v2249_v0, %v2690_v29  ;;  %2276 = vrcp.f32 %v1301_v26  ;;  %v610_v29 = vpop.f32.mrf.mxu0  ;;  %v1773_v40 = vmul.f32 -1.442695, %v2818_v44  ;;  %v2832_v15 = vadd.f32 %v2328_v59, %v2043_v34 }
 0x1d2   : > { %v2253_v37 = vpop.eup %2252  ;;  %v1929_v39 = vpack.c.bf16 %v1390_v31, %v1390_v31  ;;  %v914_v7 = vadd.f32 1.0, %v2251_v36  ;;  %2278 = vpow2.f32 %v1836_v22  ;;  %v782_v52 = vpop.f32.mrf.mxu1  ;;  %v2835_v58 = vadd.f32 %v2329_v17, %v610_v29 }
 0x1d3   : > { %v2255_v41 = vpop.eup %2254  ;;  %v1895_v1 = vpack.c.bf16 %v1003_v51, %v1003_v51  ;;  %v1299_v48 = vadd.f32 1.0, %v2253_v37  ;;  %2280 = vpow2.f32 %v1770_v23  ;;  %v1837_v61 = vmul.f32 -1.442695, %v2821_v62 }
 0x1d4   : > { %v2257_v11 = vpop.eup %2256  ;;  %1550 = vst.msk [vmem:[%s2550_s19 + $0x4c] sm:$0xf] %vm1146_vm2, %v1929_v39  ;;  %v1388_v6 = vmul.f32 %v2255_v41, %v2694_v42  ;;  %2282 = vrcp.f32 %v914_v7  ;;  %v2839_v10 = vadd.f32 %v2328_v59, %v782_v52  ;;  %v1840_v54 = vmul.f32 -1.442695, %v2832_v15 }
 0x1d5   : > { %v2259_v53 = vpop.eup %2258  ;;  %1164 = vst.msk [vmem:[%s2538_s16 + $0x44] sm:$0xf] %vm1146_vm2, %v1895_v1  ;;  %2284 = vrcp.f32 %v1299_v48  ;;  %v917_v57 = vadd.f32 1.0, %v2257_v11 }
 0x1d6   : > { %v2261_v3 = vpop.eup %2260  ;;  %v1927_v4 = vpack.c.bf16 %v1388_v6, %v1388_v6  ;;  %v1008_v42 = vmul.f32 %v2259_v53, %v2698_v12  ;;  %2286 = vpow2.f32 %v1834_v27  ;;  %v1776_v12 = vmul.f32 -1.442695, %v2827_v63 }
 0x1d7   : > { %v2263_v50 = vpop.eup %2262  ;;  %v1393_v8 = vmul.f32 %v2261_v3, %v2702_v60  ;;  %2288 = vrcp.f32 %v917_v57  ;;  %v1838_v23 = vmul.f32 -1.442695, %v2839_v10 }
 0x1d8   : > { %v2265_v35 = vpop.eup %2264  ;;  %1548 = vst.msk [vmem:[%s2550_s19 + $0x44] sm:$0xf] %vm1146_vm2, %v1927_v4  ;;  %v1900_v56 = vpack.c.bf16 %v1008_v42, %v1008_v42  ;;  %v1006_v13 = vmul.f32 %v2263_v50, %v2705_v2  ;;  %2290 = vpow2.f32 %v1775_v47  ;;  %v1774_v2 = vmul.f32 -1.442695, %v2835_v58 }
 0x1d9   : > { %v2267_v38 = vpop.eup %2266  ;;  %v1932_v16 = vpack.c.bf16 %v1393_v8, %v1393_v8  ;;  %v1391_v60 = vmul.f32 %v2265_v35, %v2710_v9  ;;  %2292 = vpow2.f32 %v1839_v46 }
 0x1da   : > { %v2269_v59 = vpop.eup %2268  ;;  %1169 = vst.msk [vmem:[%s2538_s16 + $0x58] sm:$0xf] %vm1146_vm2, %v1900_v56  ;;  %v1898_v22 = vpack.c.bf16 %v1006_v13, %v1006_v13  ;;  %v1009_v17 = vmul.f32 %v2267_v38, %v2717_v14  ;;  %2294 = vpow2.f32 %v1773_v40 }
 0x1db   : > { %v2271_v43 = vpop.eup %2270  ;;  %1553 = vst.msk [vmem:[%s2550_s19 + $0x58] sm:$0xf] %vm1146_vm2, %v1932_v16  ;;  %v1930_v26 = vpack.c.bf16 %v1391_v60, %v1391_v60  ;;  %v1394_v9 = vmul.f32 %v2269_v59, %v2721_v19  ;;  %2296 = vpow2.f32 %v1837_v61 }
 0x1dc   : > { %v2273_v25 = vpop.eup %2272  ;;  %1167 = vst.msk [vmem:[%s2538_s16 + $0x50] sm:$0xf] %vm1146_vm2, %v1898_v22  ;;  %v1901_v0 = vpack.c.bf16 %v1009_v17, %v1009_v17  ;;  %v1007_v14 = vmul.f32 %v2271_v43, %v2725_v21  ;;  %2298 = vpow2.f32 %v1776_v12 }
 0x1dd   : > { %v2275_v31 = vpop.eup %2274  ;;  %1551 = vst.msk [vmem:[%s2550_s19 + $0x50] sm:$0xf] %vm1146_vm2, %v1930_v26  ;;  %v1933_v34 = vpack.c.bf16 %v1394_v9, %v1394_v9  ;;  %v1392_v36 = vmul.f32 %v2273_v25, %v2730_v49  ;;  %2300 = vpow2.f32 %v1840_v54 }
 0x1de   : > { %v2277_v19 = vpop.eup %2276  ;;  %1170 = vst.msk [vmem:[%s2538_s16 + $0x5c] sm:$0xf] %vm1146_vm2, %v1901_v0  ;;  %v1899_v51 = vpack.c.bf16 %v1007_v14, %v1007_v14  ;;  %v1012_v27 = vmul.f32 %v2275_v31, %v2750_v28  ;;  %2302 = vpow2.f32 %v1774_v2 }
 0x1df   : > { %v2279_v37 = vpop.eup %2278  ;;  %1554 = vst.msk [vmem:[%s2550_s19 + $0x5c] sm:$0xf] %vm1146_vm2, %v1933_v34  ;;  %v1931_v21 = vpack.c.bf16 %v1392_v36, %v1392_v36  ;;  %v1397_v39 = vmul.f32 %v2277_v19, %v2756_v5  ;;  %2304 = vpow2.f32 %v1838_v23 }
 0x1e0   : > { %v2281_v7 = vpop.eup %2280  ;;  %1168 = vst.msk [vmem:[%s2538_s16 + $0x54] sm:$0xf] %vm1146_vm2, %v1899_v51  ;;  %v1904_v49 = vpack.c.bf16 %v1012_v27, %v1012_v27  ;;  %v1302_v47 = vadd.f32 1.0, %v2279_v37 }
 0x1e1   : > { %v2283_v41 = vpop.eup %2282  ;;  %1552 = vst.msk [vmem:[%s2550_s19 + $0x54] sm:$0xf] %vm1146_vm2, %v1931_v21  ;;  %v1936_v1 = vpack.c.bf16 %v1397_v39, %v1397_v39  ;;  %v915_v28 = vadd.f32 1.0, %v2281_v7 }
 0x1e2   : > { %v2285_v48 = vpop.eup %2284  ;;  %1173 = vst.msk [vmem:[%s2538_s16 + $0x68] sm:$0xf] %vm1146_vm2, %v1904_v49  ;;  %v1010_v29 = vmul.f32 %v2283_v41, %v2769_v18  ;;  %2306 = vrcp.f32 %v1302_v47 }
 0x1e3   : > { %v2287_v5 = vpop.eup %2286  ;;  %1557 = vst.msk [vmem:[%s2550_s19 + $0x68] sm:$0xf] %vm1146_vm2, %v1936_v1  ;;  %v1395_v11 = vmul.f32 %v2285_v48, %v2774_v20  ;;  %2308 = vrcp.f32 %v915_v28 }
 0x1e4   : > { %v2289_v6 = vpop.eup %2288  ;;  %v1902_v46 = vpack.c.bf16 %v1010_v29, %v1010_v29  ;;  %v1300_v52 = vadd.f32 1.0, %v2287_v5 }
 0x1e5   : > { %v2291_v53 = vpop.eup %2290  ;;  %v1934_v57 = vpack.c.bf16 %v1395_v11, %v1395_v11  ;;  %v1013_v40 = vmul.f32 %v2289_v6, %v2781_v30 }
 0x1e6   : > { %v2293_v3 = vpop.eup %2292  ;;  %1171 = vst.msk [vmem:[%s2538_s16 + $0x60] sm:$0xf] %vm1146_vm2, %v1902_v46  ;;  %2310 = vrcp.f32 %v1300_v52  ;;  %v920_v18 = vadd.f32 1.0, %v2291_v53 }
 0x1e7   : > { %v2295_v4 = vpop.eup %2294  ;;  %1555 = vst.msk [vmem:[%s2550_s19 + $0x60] sm:$0xf] %vm1146_vm2, %v1934_v57  ;;  %v1905_v42 = vpack.c.bf16 %v1013_v40, %v1013_v40  ;;  %v1305_v50 = vadd.f32 1.0, %v2293_v3 }
 0x1e8   : > { %v2297_v20 = vpop.eup %2296  ;;  %2312 = vrcp.f32 %v920_v18  ;;  %v918_v8 = vadd.f32 1.0, %v2295_v4 }
 0x1e9   : > { %v2299_v61 = vpop.eup %2298  ;;  %1174 = vst.msk [vmem:[%s2538_s16 + $0x6c] sm:$0xf] %vm1146_vm2, %v1905_v42  ;;  %2314 = vrcp.f32 %v1305_v50  ;;  %v1303_v35 = vadd.f32 1.0, %v2297_v20 }
 0x1ea   : > { %v2301_v56 = vpop.eup %2300  ;;  %2316 = vrcp.f32 %v918_v8  ;;  %v921_v30 = vadd.f32 1.0, %v2299_v61 }
 0x1eb   : > { %v2303_v13 = vpop.eup %2302  ;;  %2318 = vrcp.f32 %v1303_v35  ;;  %v1306_v12 = vadd.f32 1.0, %v2301_v56 }
 0x1ec   : > { %v2305_v38 = vpop.eup %2304  ;;  %2320 = vrcp.f32 %v921_v30  ;;  %v919_v16 = vadd.f32 1.0, %v2303_v13 }
 0x1ed   : > { %2322 = vrcp.f32 %v1306_v12  ;;  %v1304_v60 = vadd.f32 1.0, %v2305_v38 }
 0x1ee   : > { %2324 = vrcp.f32 %v919_v16 }
 0x1ef   : > { %v2307_v54 = vpop.eup %2306  ;;  %2326 = vrcp.f32 %v1304_v60 }
 0x1f0   : > { %v2309_v59 = vpop.eup %2308  ;;  %v1398_v22 = vmul.f32 %v2307_v54, %v2796_v45 }
 0x1f1   : > { %v1011_v17 = vmul.f32 %v2309_v59, %v2799_v32 }
 0x1f2   : > { %v1937_v2 = vpack.c.bf16 %v1398_v22, %v1398_v22 }
 0x1f3   : > { %v2311_v43 = vpop.eup %2310  ;;  %v1903_v26 = vpack.c.bf16 %v1011_v17, %v1011_v17 }
 0x1f4   : > { %1558 = vst.msk [vmem:[%s2550_s19 + $0x6c] sm:$0xf] %vm1146_vm2, %v1937_v2  ;;  %v1396_v9 = vmul.f32 %v2311_v43, %v2804_v55 }
 0x1f5   : > { %v2313_v23 = vpop.eup %2312  ;;  %1172 = vst.msk [vmem:[%s2538_s16 + $0x64] sm:$0xf] %vm1146_vm2, %v1903_v26 }
 0x1f6   : > { %v2315_v25 = vpop.eup %2314  ;;  %v1935_v0 = vpack.c.bf16 %v1396_v9, %v1396_v9  ;;  %v1016_v14 = vmul.f32 %v2313_v23, %v2810_v33 }
 0x1f7   : > { %v2317_v31 = vpop.eup %2316  ;;  %v1401_v45 = vmul.f32 %v2315_v25, %v2814_v24 }
 0x1f8   : > { %v2319_v32 = vpop.eup %2318  ;;  %1556 = vst.msk [vmem:[%s2550_s19 + $0x64] sm:$0xf] %vm1146_vm2, %v1935_v0  ;;  %v1908_v34 = vpack.c.bf16 %v1016_v14, %v1016_v14  ;;  %v1014_v36 = vmul.f32 %v2317_v31, %v2818_v44 }
 0x1f9   : > { %v2321_v55 = vpop.eup %2320  ;;  %v1940_v19 = vpack.c.bf16 %v1401_v45, %v1401_v45  ;;  %v1399_v51 = vmul.f32 %v2319_v32, %v2821_v62 }
 0x1fa   : > { %v2323_v27 = vpop.eup %2322  ;;  %1177 = vst.msk [vmem:[%s2538_s16 + $0x78] sm:$0xf] %vm1146_vm2, %v1908_v34  ;;  %v1906_v33 = vpack.c.bf16 %v1014_v36, %v1014_v36  ;;  %v1017_v24 = vmul.f32 %v2321_v55, %v2827_v63 }
 0x1fb   : > { %v2325_v37 = vpop.eup %2324  ;;  %1561 = vst.msk [vmem:[%s2550_s19 + $0x78] sm:$0xf] %vm1146_vm2, %v1940_v19  ;;  %v1938_v21 = vpack.c.bf16 %v1399_v51, %v1399_v51  ;;  %v1402_v44 = vmul.f32 %v2323_v27, %v2832_v15 }
 0x1fc   : > { %v2327_v39 = vpop.eup %2326  ;;  %1175 = vst.msk [vmem:[%s2538_s16 + $0x70] sm:$0xf] %vm1146_vm2, %v1906_v33  ;;  %v1909_v62 = vpack.c.bf16 %v1017_v24, %v1017_v24  ;;  %v1015_v7 = vmul.f32 %v2325_v37, %v2835_v58 }
 0x1fd   : > { %1559 = vst.msk [vmem:[%s2550_s19 + $0x70] sm:$0xf] %vm1146_vm2, %v1938_v21  ;;  %v1941_v49 = vpack.c.bf16 %v1402_v44, %v1402_v44  ;;  %v1400_v47 = vmul.f32 %v2327_v39, %v2839_v10 }
 0x1fe   : > { %1178 = vst.msk [vmem:[%s2538_s16 + $0x7c] sm:$0xf] %vm1146_vm2, %v1909_v62  ;;  %v1907_v63 = vpack.c.bf16 %v1015_v7, %v1015_v7 }
 0x1ff   : > { %1562 = vst.msk [vmem:[%s2550_s19 + $0x7c] sm:$0xf] %vm1146_vm2, %v1941_v49  ;;  %v1939_v41 = vpack.c.bf16 %v1400_v47, %v1400_v47 }
 0x200   : > { %1176 = vst.msk [vmem:[%s2538_s16 + $0x74] sm:$0xf] %vm1146_vm2, %v1907_v63 }
 0x201   : > { %1560 = vst.msk [vmem:[%s2550_s19 + $0x74] sm:$0xf] %vm1146_vm2, %v1939_v41 }
 0x202 PF: > { %s17_s23 = sadd.s32 1, %s2352_s23   ;;  %s2933_s21 = smov %s2348_s22 }
 0x203   : > { %p14_p5 = scmp.ge.s32.totalorder %s17_s23, 4   ;;  %s2934_s22 = smov %s2936_s24 }
 0x205   :  { %16 = sbr.rel (!%p14_p5) target bundleno = 2 (0x2), region = 82 }

// kernel: c3_pallas.5
= control target key start
LH: loop header
LB: loop body
LE: loop exit
PB: predicated region body
PF: predicated region fallthrough
CT: control target
= control target key end

     0   :  { %s1842_s18 = smov 0   ;;  %s1844_s19 = smov 0   ;;  %s2147_s0 = inlined_call_operand.vmem [shape: bf16[2,256,4], index: 0, kind: input, shape index: {}]   ;;  %s2148_s1 = inlined_call_operand.vmem [shape: bf16[2,256,4], index: 1, kind: input, shape index: {}]   ;;  %s2149_s2 = inlined_call_operand.vmem [shape: bf16[4,8], index: 2, kind: input, shape index: {}]   ;;  %s2150_s3 = inlined_call_operand.vmem [shape: bf16[4,8], index: 3, kind: input, shape index: {}]   ;;  %s2151_s4 = inlined_call_operand.vmem [shape: f32[1,8], index: 4, kind: input, shape index: {}]   ;;  %s2152_s5 = inlined_call_operand.vmem [shape: f32[2,8,256], index: 5, kind: output, shape index: {}]  }
   0x1   :  { %s1846_s20 = smov 0  }
   0x2 LB: > { %s27_s21 = sadd.s32 1, %s1806_s19  ;;  %p1391_p0 = scmp.ge.s32.totalorder %s1810_s20, 1  ;;  %s1810_s20 = sphi %s1846_s20, %s15_s20   ;;  %s1806_s19 = sphi %s1844_s19, %s2154_s19   ;;  %s1802_s18 = sphi %s1842_s18, %s2153_s18  }
   0x3   : > { %p29_p1 = scmp.ge.s32.totalorder %s27_s21, 2  ;;  %p225_p2 = scmp.lt.s32.totalorder %s1810_s20, 3 }
   0x5   : > { %s2156_s21 = smov (%p29_p1, %s27_s21), 0  ;;  %p226_p3 = pnand %p1391_p0, %p225_p2 }
   0x6   : > { %p271_p4 = scmp.lt.s32.totalorder (!%p226_p3), %s1802_s18, 1 }
   0x7   : > { %229 = sbr.rel (%p226_p3) target bundleno = 417 (0x1a1), region = 40 }
   0xc   : > { %v366_v0 = vld [vmem:[%s2150_s3] sm:$0x3]  ;;  %vm496_vm0 = vcmask 1041408   ;;  %s2158_s18 = smov (!%p271_p4, %s1802_s18), 1  ;;  %vm447_vm1 = vcmask 31744  }
   0xd   : > { %v333_v1 = vld [vmem:[%s2149_s2] sm:$0x3]  ;;  %1602 = vmatprep.subr.msk.bf16.mxu0 %vm496_vm0, %v366_v0  ;;  %v498_v2 = vsel %vm496_vm0, %v366_v0, 0  ;;  %s1497_s26 = sshll.u32 %s2158_s18, 7  ;;  %s1499_s10 = sshll.u32 %s2158_s18, 4 }
   0xe   : > { %1603 = vmatprep.subr.msk.bf16.mxu1 %vm496_vm0, %v333_v1  ;;  %v790_v3 = vsel %vm496_vm0, %v333_v1, 0  ;;  %1535 = vmatpush3.bf16.msra.mxu0 %v498_v2  ;;  %s1872_s29 = scalar_lea.vmem %s2148_s1, %s1497_s26  ;;  %s1877_s7 = scalar_lea.vmem %s2147_s0, %s1497_s26  ;;  %v1946_v39 = vld [vmem:[%s2151_s4] ss:$0 sm:$0xff] }
   0xf   : > { %1569 = vmatpush3.bf16.msra.mxu1 %v790_v3  ;;  %v1628_v4 = vld [vmem:[%s1872_s29] sm:$0xff]   ;;  %v1630_v6 = vld [vmem:[%s1872_s29 + $0x8] sm:$0xff]   ;;  %v1632_v8 = vld [vmem:[%s1872_s29 + $0x10] sm:$0xff]   ;;  %s298_s13 = scalar_lea.vmem %s2152_s5, %s1499_s10 }
  0x10   : > { %v1629_v5 = vld [vmem:[%s1877_s7] sm:$0xff]   ;;  %1536 = vmatprep.mubr.msk.bf16.mxu0 %vm447_vm1, %v1628_v4  ;;  %v1631_v7 = vld [vmem:[%s1877_s7 + $0x8] sm:$0xff]   ;;  %v1633_v9 = vld [vmem:[%s1877_s7 + $0x10] sm:$0xff]  }
  0x11   : > { %1570 = vmatprep.mubr.msk.bf16.mxu1 %vm447_vm1, %v1629_v5  ;;  %1537 = vmatmul.mubr.msk.bf16.vlgmr.msra.gmra.mxu0 %vm447_vm1, %v1630_v6  ;;  %v1634_v10 = vld [vmem:[%s1872_s29 + $0x18] sm:$0xff]   ;;  %v1636_v12 = vld [vmem:[%s1872_s29 + $0x20] sm:$0xff]   ;;  %v1638_v14 = vld [vmem:[%s1872_s29 + $0x28] sm:$0xff]  }
  0x12   : > { %1571 = vmatmul.mubr.msk.bf16.vlgmr.msra.gmra.mxu1 %vm447_vm1, %v1631_v7  ;;  %1540 = vmatprep.mubr.msk.bf16.mxu0 %vm447_vm1, %v1632_v8  ;;  %v1635_v11 = vld [vmem:[%s1877_s7 + $0x18] sm:$0xff]   ;;  %v1637_v13 = vld [vmem:[%s1877_s7 + $0x20] sm:$0xff]   ;;  %v1639_v15 = vld [vmem:[%s1877_s7 + $0x28] sm:$0xff]  }
  0x13   : > { %1574 = vmatprep.mubr.msk.bf16.mxu1 %vm447_vm1, %v1633_v9  ;;  %v1640_v16 = vld [vmem:[%s1872_s29 + $0x30] sm:$0xff]   ;;  %v1642_v18 = vld [vmem:[%s1872_s29 + $0x38] sm:$0xff]   ;;  %v1644_v20 = vld [vmem:[%s1872_s29 + $0x40] sm:$0xff]  }
  0x14   : > { %v1641_v17 = vld [vmem:[%s1877_s7 + $0x30] sm:$0xff]   ;;  %v1643_v19 = vld [vmem:[%s1877_s7 + $0x38] sm:$0xff]   ;;  %v1645_v21 = vld [vmem:[%s1877_s7 + $0x40] sm:$0xff]  }
  0x15   : > { %v1646_v22 = vld [vmem:[%s1872_s29 + $0x48] sm:$0xff]   ;;  %v1648_v24 = vld [vmem:[%s1872_s29 + $0x50] sm:$0xff]   ;;  %v1650_v26 = vld [vmem:[%s1872_s29 + $0x58] sm:$0xff]  }
  0x16   : > { %v1647_v23 = vld [vmem:[%s1877_s7 + $0x48] sm:$0xff]   ;;  %v1649_v25 = vld [vmem:[%s1877_s7 + $0x50] sm:$0xff]   ;;  %v1651_v27 = vld [vmem:[%s1877_s7 + $0x58] sm:$0xff]  }
  0x17   : > { %v1652_v28 = vld [vmem:[%s1872_s29 + $0x60] sm:$0xff]   ;;  %v1654_v30 = vld [vmem:[%s1872_s29 + $0x68] sm:$0xff]   ;;  %v1656_v32 = vld [vmem:[%s1872_s29 + $0x70] sm:$0xff]  }
  0x18   : > { %v1653_v29 = vld [vmem:[%s1877_s7 + $0x60] sm:$0xff]   ;;  %v1655_v31 = vld [vmem:[%s1877_s7 + $0x68] sm:$0xff]   ;;  %v1657_v33 = vld [vmem:[%s1877_s7 + $0x70] sm:$0xff]  }
  0x19   : > { %1541 = vmatmul.mubr.msk.bf16.gmra.mxu0 %vm447_vm1, %v1634_v10  ;;  %v1658_v34 = vld [vmem:[%s1872_s29 + $0x78] sm:$0xff]  }
  0x1a   : > { %1575 = vmatmul.mubr.msk.bf16.gmra.mxu1 %vm447_vm1, %v1635_v11  ;;  %1544 = vmatprep.mubr.msk.bf16.mxu0 %vm447_vm1, %v1636_v12  ;;  %v1659_v35 = vld [vmem:[%s1877_s7 + $0x78] sm:$0xff]  }
  0x1b   : > { %1578 = vmatprep.mubr.msk.bf16.mxu1 %vm447_vm1, %v1637_v13 }
  0x21   : > { %1545 = vmatmul.mubr.msk.bf16.gmra.mxu0 %vm447_vm1, %v1638_v14 }
  0x22   : > { %1579 = vmatmul.mubr.msk.bf16.gmra.mxu1 %vm447_vm1, %v1639_v15  ;;  %1548 = vmatprep.mubr.msk.bf16.mxu0 %vm447_vm1, %v1640_v16 }
  0x23   : > { %1582 = vmatprep.mubr.msk.bf16.mxu1 %vm447_vm1, %v1641_v17 }
  0x29   : > { %1549 = vmatmul.mubr.msk.bf16.gmra.mxu0 %vm447_vm1, %v1642_v18 }
  0x2a   : > { %1583 = vmatmul.mubr.msk.bf16.gmra.mxu1 %vm447_vm1, %v1643_v19  ;;  %1552 = vmatprep.mubr.msk.bf16.mxu0 %vm447_vm1, %v1644_v20 }
  0x2b   : > { %1586 = vmatprep.mubr.msk.bf16.mxu1 %vm447_vm1, %v1645_v21 }
  0x31   : > { %1553 = vmatmul.mubr.msk.bf16.gmra.mxu0 %vm447_vm1, %v1646_v22 }
  0x32   : > { %1587 = vmatmul.mubr.msk.bf16.gmra.mxu1 %vm447_vm1, %v1647_v23  ;;  %1556 = vmatprep.mubr.msk.bf16.mxu0 %vm447_vm1, %v1648_v24 }
  0x33   : > { %1590 = vmatprep.mubr.msk.bf16.mxu1 %vm447_vm1, %v1649_v25 }
  0x39   : > { %1557 = vmatmul.mubr.msk.bf16.gmra.mxu0 %vm447_vm1, %v1650_v26 }
  0x3a   : > { %1591 = vmatmul.mubr.msk.bf16.gmra.mxu1 %vm447_vm1, %v1651_v27  ;;  %1560 = vmatprep.mubr.msk.bf16.mxu0 %vm447_vm1, %v1652_v28 }
  0x3b   : > { %1594 = vmatprep.mubr.msk.bf16.mxu1 %vm447_vm1, %v1653_v29 }
  0x41   : > { %1561 = vmatmul.mubr.msk.bf16.gmra.mxu0 %vm447_vm1, %v1654_v30 }
  0x42   : > { %1595 = vmatmul.mubr.msk.bf16.gmra.mxu1 %vm447_vm1, %v1655_v31  ;;  %1564 = vmatprep.mubr.msk.bf16.mxu0 %vm447_vm1, %v1656_v32 }
  0x43   : > { %1598 = vmatprep.mubr.msk.bf16.mxu1 %vm447_vm1, %v1657_v33 }
  0x49   : > { %1565 = vmatmul.mubr.msk.bf16.gmra.mxu0 %vm447_vm1, %v1658_v34 }
  0x4a   : > { %1599 = vmatmul.mubr.msk.bf16.gmra.mxu1 %vm447_vm1, %v1659_v35 }
  0xd1   : > { %v1538_v36 = vpop.f32.mrf.mxu0 }
  0xd2   : > { %v1572_v37 = vpop.f32.mrf.mxu1 }
  0xd3   : > { %v835_v38 = vadd.f32 %v1572_v37, %v1538_v36  ;;  %v534_v40 = vpop.f32.mrf.mxu0 }
  0xd4   : > { %v826_v41 = vpop.f32.mrf.mxu1 }
  0xd5   : > { %v827_v42 = vadd.f32 %v826_v41, %v534_v40  ;;  %v1539_v43 = vpop.f32.mrf.mxu0  ;;  %v1949_v44 = vadd.f32 %v1946_v39, %v835_v38 }
  0xd6   : > { %v1573_v45 = vpop.f32.mrf.mxu1 }
  0xd7   : > { %v838_v46 = vadd.f32 %v1573_v45, %v1539_v43  ;;  %v537_v47 = vpop.f32.mrf.mxu0  ;;  %v1952_v48 = vadd.f32 %v1946_v39, %v827_v42  ;;  %v1465_v53 = vmul.f32 -1.442695, %v1949_v44 }
  0xd8   : > { %v829_v49 = vpop.f32.mrf.mxu1 }
  0xd9   : > { %v830_v50 = vadd.f32 %v829_v49, %v537_v47  ;;  %v1542_v51 = vpop.f32.mrf.mxu0  ;;  %v1463_v52 = vmul.f32 -1.442695, %v1952_v48  ;;  %v1957_v54 = vadd.f32 %v1946_v39, %v838_v46 }
  0xda   : > { %v1576_v55 = vpop.f32.mrf.mxu1 }
  0xdb   : > { %v1960_v56 = vadd.f32 %v1946_v39, %v830_v50  ;;  %v550_v57 = vpop.f32.mrf.mxu0  ;;  %1660 = vpow2.f32 %v1463_v52  ;;  %v1466_v62 = vmul.f32 -1.442695, %v1957_v54  ;;  %v851_v5 = vadd.f32 %v1576_v55, %v1542_v51 }
  0xdc   : > { %v842_v58 = vpop.f32.mrf.mxu1  ;;  %1662 = vpow2.f32 %v1465_v53 }
  0xdd   : > { %v1464_v59 = vmul.f32 -1.442695, %v1960_v56  ;;  %v843_v60 = vadd.f32 %v842_v58, %v550_v57  ;;  %v1543_v61 = vpop.f32.mrf.mxu0  ;;  %v1972_v13 = vadd.f32 %v1946_v39, %v851_v5 }
  0xde   : > { %v1577_v63 = vpop.f32.mrf.mxu1 }
  0xdf   : > { %1664 = vpow2.f32 %v1464_v59  ;;  %v1965_v0 = vadd.f32 %v1946_v39, %v843_v60  ;;  %v553_v1 = vpop.f32.mrf.mxu0  ;;  %v854_v11 = vadd.f32 %v1577_v63, %v1543_v61  ;;  %v1469_v23 = vmul.f32 -1.442695, %v1972_v13 }
  0xe0   : > { %v845_v2 = vpop.f32.mrf.mxu1  ;;  %1666 = vpow2.f32 %v1466_v62 }
  0xe1   : > { %v846_v3 = vadd.f32 %v845_v2, %v553_v1  ;;  %v1546_v4 = vpop.f32.mrf.mxu0  ;;  %v1467_v6 = vmul.f32 -1.442695, %v1965_v0  ;;  %v1976_v19 = vadd.f32 %v1946_v39, %v854_v11 }
  0xe2   : > { %v1580_v7 = vpop.f32.mrf.mxu1 }
  0xe3   : > { %v1969_v8 = vadd.f32 %v1946_v39, %v846_v3  ;;  %v566_v9 = vpop.f32.mrf.mxu0  ;;  %1668 = vpow2.f32 %v1467_v6  ;;  %v1470_v30 = vmul.f32 -1.442695, %v1976_v19  ;;  %v867_v40 = vadd.f32 %v1580_v7, %v1546_v4 }
  0xe4   : > { %v858_v10 = vpop.f32.mrf.mxu1 }
  0xe5   : > { %v1547_v12 = vpop.f32.mrf.mxu0  ;;  %v1468_v14 = vmul.f32 -1.442695, %v1969_v8  ;;  %v859_v20 = vadd.f32 %v858_v10, %v566_v9  ;;  %v1996_v51 = vadd.f32 %v1946_v39, %v867_v40 }
  0xe6   : > { %v1581_v15 = vpop.f32.mrf.mxu1 }
  0xe7   : > { %v569_v16 = vpop.f32.mrf.mxu0  ;;  %1670 = vpow2.f32 %v1468_v14  ;;  %v1985_v31 = vadd.f32 %v1946_v39, %v859_v20  ;;  %v870_v52 = vadd.f32 %v1581_v15, %v1547_v12  ;;  %v1473_v1 = vmul.f32 -1.442695, %v1996_v51 }
  0xe8   : > { %v1661_v17 = vpop.eup %1660  ;;  %v861_v18 = vpop.f32.mrf.mxu1 }
  0xe9   : > { %v1978_v21 = vpop.f32.mrf.mxu0  ;;  %v1088_v22 = vadd.f32 1.0, %v1661_v17  ;;  %v1663_v25 = vpop.eup %1662  ;;  %v862_v32 = vadd.f32 %v861_v18, %v569_v16  ;;  %v1471_v41 = vmul.f32 -1.442695, %v1985_v31  ;;  %v2001_v2 = vadd.f32 %v1946_v39, %v870_v52 }
  0xea   : > { %v1981_v24 = vpop.f32.mrf.mxu1  ;;  %v1090_v34 = vadd.f32 1.0, %v1663_v25 }
  0xeb   : > { %v582_v26 = vpop.f32.mrf.mxu0  ;;  %1672 = vrcp.f32 %v1088_v22  ;;  %v1993_v42 = vadd.f32 %v1946_v39, %v862_v32  ;;  %v1474_v14 = vmul.f32 -1.442695, %v2001_v2 }
  0xec   : > { %v1665_v27 = vpop.eup %1664  ;;  %v874_v28 = vpop.f32.mrf.mxu1  ;;  %1674 = vpow2.f32 %v1469_v23 }
  0xed   : > { %v1089_v29 = vadd.f32 1.0, %v1665_v27  ;;  %v1987_v33 = vpop.f32.mrf.mxu0  ;;  %v1667_v36 = vpop.eup %1666  ;;  %v1472_v53 = vmul.f32 -1.442695, %v1993_v42  ;;  %v875_v60 = vadd.f32 %v874_v28, %v582_v26  ;;  %v883_v28 = vadd.f32 %v1981_v24, %v1978_v21 }
  0xee   : > { %v1989_v35 = vpop.f32.mrf.mxu1  ;;  %v1091_v45 = vadd.f32 1.0, %v1667_v36 }
  0xef   : > { %1676 = vrcp.f32 %v1089_v29  ;;  %v585_v37 = vpop.f32.mrf.mxu0  ;;  %v2005_v7 = vadd.f32 %v1946_v39, %v875_v60 }
  0xf0   : > { %v877_v38 = vpop.f32.mrf.mxu1  ;;  %1678 = vpow2.f32 %v1470_v30  ;;  %v1669_v47 = vpop.eup %1668 }
  0xf1   : > { %v1554_v43 = vpop.f32.mrf.mxu0  ;;  %1680 = vrcp.f32 %v1090_v34  ;;  %v1092_v57 = vadd.f32 1.0, %v1669_v47  ;;  %v878_v10 = vadd.f32 %v877_v38, %v585_v37  ;;  %v1475_v22 = vmul.f32 -1.442695, %v2005_v7 }
  0xf2   : > { %v1588_v46 = vpop.f32.mrf.mxu1  ;;  %1682 = vpow2.f32 %v1471_v41 }
  0xf3   : > { %v598_v49 = vpop.f32.mrf.mxu0  ;;  %1684 = vrcp.f32 %v1091_v45  ;;  %v2018_v23 = vadd.f32 %v1946_v39, %v878_v10  ;;  %v899_v25 = vadd.f32 %v1588_v46, %v1554_v43  ;;  %v2032_v43 = vadd.f32 %v1946_v39, %v883_v28 }
  0xf4   : > { %v890_v50 = vpop.f32.mrf.mxu1  ;;  %v1671_v59 = vpop.eup %1670  ;;  %1686 = vpow2.f32 %v1472_v53 }
  0xf5   : > { %v1555_v55 = vpop.f32.mrf.mxu0  ;;  %1688 = vrcp.f32 %v1092_v57  ;;  %v1093_v4 = vadd.f32 1.0, %v1671_v59  ;;  %v1476_v37 = vmul.f32 -1.442695, %v2018_v23  ;;  %v2029_v38 = vadd.f32 %v1946_v39, %v899_v25 }
  0xf6   : > { %v1589_v58 = vpop.f32.mrf.mxu1  ;;  %1690 = vpow2.f32 %v1473_v1 }
  0xf7   : > { %v601_v61 = vpop.f32.mrf.mxu0  ;;  %1692 = vrcp.f32 %v1093_v4  ;;  %v902_v40 = vadd.f32 %v1589_v58, %v1555_v55 }
  0xf8   : > { %v893_v62 = vpop.f32.mrf.mxu1  ;;  %v1673_v63 = vpop.eup %1672  ;;  %1694 = vpow2.f32 %v1474_v14 }
  0xf9   : > { %v894_v3 = vadd.f32 %v893_v62, %v601_v61  ;;  %v1184_v5 = vmul.f32 %v1673_v63, %v1952_v48  ;;  %v1675_v6 = vpop.eup %1674  ;;  %v2007_v11 = vpop.f32.mrf.mxu0  ;;  %v891_v48 = vadd.f32 %v890_v50, %v598_v49  ;;  %v1481_v50 = vmul.f32 -1.442695, %v2029_v38 }
  0xfa   : > { %v2009_v12 = vpop.f32.mrf.mxu1  ;;  %v1094_v17 = vadd.f32 1.0, %v1675_v6  ;;  %v2040_v52 = vadd.f32 %v1946_v39, %v902_v40 }
  0xfb   : > { %1216 = vxpose.xlu0.b32.start [1/16] (narrow) %v1184_v5, 8  ;;  %v2013_v15 = vadd.f32 %v1946_v39, %v894_v3  ;;  %v614_v26 = vpop.f32.mrf.mxu0  ;;  %v2025_v34 = vadd.f32 %v1946_v39, %v891_v48  ;;  %v915_v14 = vadd.f32 %v2009_v12, %v2007_v11 }
  0xfc   : > { %v1677_v9 = vpop.eup %1676  ;;  %v906_v27 = vpop.f32.mrf.mxu1  ;;  %1696 = vrcp.f32 %v1094_v17  ;;  %v1482_v61 = vmul.f32 -1.442695, %v2040_v52 }
  0xfd   : > { %v1679_v16 = vpop.eup %1678  ;;  %v1185_v18 = vmul.f32 %v1677_v9, %v1960_v56  ;;  %v1480_v29 = vmul.f32 -1.442695, %v2013_v15  ;;  %1698 = vpow2.f32 %v1475_v22  ;;  %v1559_v41 = vpop.f32.mrf.mxu0  ;;  %v1479_v47 = vmul.f32 -1.442695, %v2025_v34 }
  0xfe   : > { %v1681_v20 = vpop.eup %1680  ;;  %v1095_v32 = vadd.f32 1.0, %v1679_v16  ;;  %v1593_v21 = vpop.f32.mrf.mxu1  ;;  %v907_v53 = vadd.f32 %v906_v27, %v614_v26  ;;  %v2065_v28 = vadd.f32 %v1946_v39, %v915_v14 }
  0xff   : > { %1217 = vxpose.xlu0.b32.cont [2/16] (narrow) %v1185_v18, 8  ;;  %v1683_v30 = vpop.eup %1682  ;;  %v1186_v56 = vmul.f32 %v1681_v20, %v1949_v44  ;;  %v886_v44 = vadd.f32 %v1989_v35, %v1987_v33  ;;  %1700 = vpow2.f32 %v1480_v29  ;;  %v617_v55 = vpop.f32.mrf.mxu0  ;;  %v1477_v33 = vmul.f32 -1.442695, %v2032_v43 }
 0x100   : > { %v1685_v36 = vpop.eup %1684  ;;  %v1096_v24 = vadd.f32 1.0, %v1683_v30  ;;  %1702 = vrcp.f32 %v1095_v32  ;;  %v909_v57 = vpop.f32.mrf.mxu1  ;;  %v2049_v62 = vadd.f32 %v1946_v39, %v907_v53  ;;  %v918_v27 = vadd.f32 %v1593_v21, %v1559_v41 }
 0x101   : > { %v1687_v45 = vpop.eup %1686  ;;  %v1187_v46 = vmul.f32 %v1685_v36, %v1957_v54  ;;  %1704 = vpow2.f32 %v1476_v37  ;;  %v2044_v35 = vadd.f32 %v1946_v39, %v886_v44  ;;  %v910_v63 = vadd.f32 %v909_v57, %v617_v55  ;;  %v2051_v1 = vpop.f32.mrf.mxu0 }
 0x102   : > { %v1689_v49 = vpop.eup %1688  ;;  %1706 = vrcp.f32 %v1096_v24  ;;  %v1097_v58 = vadd.f32 1.0, %v1687_v45  ;;  %v2053_v3 = vpop.f32.mrf.mxu1  ;;  %v1483_v16 = vmul.f32 -1.442695, %v2049_v62  ;;  %v1485_v41 = vmul.f32 -1.442695, %v2065_v28 }
 0x103   : > { %1218 = vxpose.xlu0.b32.cont [3/16] (narrow) %v1186_v56, 8  ;;  %v1691_v54 = vpop.eup %1690  ;;  %v1188_v59 = vmul.f32 %v1689_v49, %v1965_v0  ;;  %1708 = vpow2.f32 %v1479_v47  ;;  %v1478_v4 = vmul.f32 -1.442695, %v2044_v35  ;;  %v2061_v17 = vadd.f32 %v1946_v39, %v910_v63  ;;  %v630_v48 = vpop.f32.mrf.mxu0 }
 0x104   : > { %v1693_v60 = vpop.eup %1692  ;;  %1710 = vpow2.f32 %v1481_v50  ;;  %v1098_v6 = vadd.f32 1.0, %v1691_v54  ;;  %v922_v18 = vpop.f32.mrf.mxu1  ;;  %v931_v63 = vadd.f32 %v2053_v3, %v2051_v1 }
 0x105   : > { %1712 = vpow2.f32 %v1477_v33  ;;  %v1695_v5 = vpop.eup %1694  ;;  %v1189_v0 = vmul.f32 %v1693_v60, %v1969_v8  ;;  %v1484_v11 = vmul.f32 -1.442695, %v2061_v17  ;;  %v1563_v12 = vpop.f32.mrf.mxu0  ;;  %v923_v40 = vadd.f32 %v922_v18, %v630_v48 }
 0x106   : > { %1714 = vrcp.f32 %v1097_v58  ;;  %v1099_v22 = vadd.f32 1.0, %v1695_v5  ;;  %v1597_v29 = vpop.f32.mrf.mxu1  ;;  %v2091_v48 = vadd.f32 %v1946_v39, %v931_v63 }
 0x107   : > { %1219 = vxpose.xlu0.b32.cont [4/16] (narrow) %v1187_v46, 8  ;;  %1716 = vpow2.f32 %v1482_v61  ;;  %v633_v21 = vpop.f32.mrf.mxu0  ;;  %v2076_v53 = vadd.f32 %v1946_v39, %v923_v40  ;;  %v934_v1 = vadd.f32 %v1597_v29, %v1563_v12 }
 0x108   : > { %1718 = vpow2.f32 %v1478_v4  ;;  %v925_v24 = vpop.f32.mrf.mxu1 }
 0x109   : > { %v1697_v9 = vpop.eup %1696  ;;  %1720 = vrcp.f32 %v1098_v6  ;;  %v926_v55 = vadd.f32 %v925_v24, %v633_v21  ;;  %v2078_v33 = vpop.f32.mrf.mxu0  ;;  %v1487_v4 = vmul.f32 -1.442695, %v2076_v53 }
 0x10a   : > { %v1699_v10 = vpop.eup %1698  ;;  %v1190_v8 = vmul.f32 %v1697_v9, %v1972_v13  ;;  %1722 = vpow2.f32 %v1483_v16  ;;  %v2070_v13 = vadd.f32 %v1946_v39, %v918_v27  ;;  %v2080_v54 = vpop.f32.mrf.mxu1 }
 0x10b   : > { %1220 = vxpose.xlu0.b32.cont [5/16] (narrow) %v1188_v59, 8  ;;  %v1100_v26 = vadd.f32 1.0, %v1699_v10  ;;  %1724 = vrcp.f32 %v1099_v22  ;;  %v2087_v5 = vadd.f32 %v1946_v39, %v926_v55 }
 0x10c   : > { %v1701_v20 = vpop.eup %1700  ;;  %v1486_v50 = vmul.f32 -1.442695, %v2070_v13  ;;  %v938_v9 = vpop.f32.mrf.mxu1 }
 0x10d   : > { %v1703_v25 = vpop.eup %1702  ;;  %v1105_v32 = vadd.f32 1.0, %v1701_v20  ;;  %1726 = vrcp.f32 %v1100_v26  ;;  %v1488_v3 = vmul.f32 -1.442695, %v2087_v5 }
 0x10e   : > { %v1705_v30 = vpop.eup %1704  ;;  %v1191_v36 = vmul.f32 %v1703_v25, %v1976_v19  ;;  %1728 = vpow2.f32 %v1484_v11  ;;  %v1489_v11 = vmul.f32 -1.442695, %v2091_v48 }
 0x10f   : > { %1221 = vxpose.xlu0.b32.cont [6/16] (narrow) %v1189_v0, 8  ;;  %v1707_v56 = vpop.eup %1706  ;;  %1730 = vrcp.f32 %v1105_v32  ;;  %v1101_v47 = vadd.f32 1.0, %v1705_v30  ;;  %v646_v0 = vpop.f32.mrf.mxu0  ;;  %v2097_v30 = vadd.f32 %v1946_v39, %v934_v1 }
 0x110   : > { %v1709_v37 = vpop.eup %1708  ;;  %v1192_v19 = vmul.f32 %v1707_v56, %v1985_v31  ;;  %v939_v12 = vadd.f32 %v938_v9, %v646_v0 }
 0x111   : > { %v1104_v44 = vadd.f32 1.0, %v1709_v37  ;;  %v1711_v45 = vpop.eup %1710  ;;  %v1567_v22 = vpop.f32.mrf.mxu0  ;;  %v1490_v21 = vmul.f32 -1.442695, %v2097_v30 }
 0x112   : > { %v1713_v46 = vpop.eup %1712  ;;  %v1106_v57 = vadd.f32 1.0, %v1711_v45  ;;  %v2104_v24 = vadd.f32 %v1946_v39, %v939_v12 }
 0x113   : > { %1222 = vxpose.xlu0.b32.cont [7/16] (narrow) %v1190_v8, 8  ;;  %1732 = vrcp.f32 %v1104_v44  ;;  %v1715_v49 = vpop.eup %1714  ;;  %v1102_v60 = vadd.f32 1.0, %v1713_v46  ;;  %v1601_v8 = vpop.f32.mrf.mxu1 }
 0x114   : > { %1734 = vpow2.f32 %v1485_v41  ;;  %v1717_v58 = vpop.eup %1716  ;;  %v1193_v31 = vmul.f32 %v1715_v49, %v1993_v42  ;;  %v649_v32 = vpop.f32.mrf.mxu0 }
 0x115   : > { %v1719_v59 = vpop.eup %1718  ;;  %1736 = vrcp.f32 %v1101_v47  ;;  %v1107_v6 = vadd.f32 1.0, %v1717_v58  ;;  %v941_v56 = vpop.f32.mrf.mxu1 }
 0x116   : > { %v1721_v61 = vpop.eup %1720  ;;  %1738 = vpow2.f32 %v1486_v50  ;;  %v1103_v14 = vadd.f32 1.0, %v1719_v59  ;;  %v942_v44 = vadd.f32 %v941_v56, %v649_v32 }
 0x117   : > { %1223 = vxpose.xlu0.b32.cont [8/16] (narrow) %v1191_v36, 8  ;;  %1740 = vrcp.f32 %v1106_v57  ;;  %v1723_v10 = vpop.eup %1722  ;;  %v1194_v42 = vmul.f32 %v1721_v61, %v1996_v51 }
 0x118   : > { %1742 = vrcp.f32 %v1102_v60  ;;  %v1725_v16 = vpop.eup %1724  ;;  %v1108_v20 = vadd.f32 1.0, %v1723_v10  ;;  %v2111_v49 = vadd.f32 %v1946_v39, %v942_v44 }
 0x119   : > { %1744 = vpow2.f32 %v1487_v4  ;;  %v1195_v27 = vmul.f32 %v1725_v16, %v2001_v2 }
 0x11a   : > { %v1727_v18 = vpop.eup %1726  ;;  %1746 = vrcp.f32 %v1107_v6 }
 0x11b   : > { %1224 = vxpose.xlu0.b32.cont [9/16] (narrow) %v1192_v19, 8  ;;  %v1729_v25 = vpop.eup %1728  ;;  %1748 = vrcp.f32 %v1103_v14  ;;  %v1196_v2 = vmul.f32 %v1727_v18, %v2005_v7  ;;  %v947_v7 = vadd.f32 %v2080_v54, %v2078_v33  ;;  %v950_v33 = vadd.f32 %v1601_v8, %v1567_v22 }
 0x11c   : > { %v1731_v26 = vpop.eup %1730  ;;  %1750 = vpow2.f32 %v1488_v3  ;;  %v1109_v29 = vadd.f32 1.0, %v1729_v25  ;;  %v1492_v54 = vmul.f32 -1.442695, %v2111_v49 }
 0x11d   : > { %1752 = vrcp.f32 %v1108_v20  ;;  %v1201_v40 = vmul.f32 %v1731_v26, %v2013_v15  ;;  %v1491_v15 = vmul.f32 -1.442695, %v2104_v24  ;;  %v2116_v60 = vadd.f32 %v1946_v39, %v947_v7 }
 0x11e   : > { %1754 = vpow2.f32 %v1489_v11  ;;  %v991_v6 = vadd.f32 %v1946_v39, %v950_v33 }
 0x11f   : > { %1225 = vxpose.xlu0.b32.cont [10/16] (narrow) %v1193_v31, 8  ;;  %1756 = vrcp.f32 %v1109_v29 }
 0x120   : > { %v1733_v51 = vpop.eup %1732  ;;  %1758 = vpow2.f32 %v1490_v21 }
 0x121   : > { %v1200_v36 = vmul.f32 %v1733_v51, %v2025_v34  ;;  %v1735_v37 = vpop.eup %1734 }
 0x122   : > { %v1737_v41 = vpop.eup %1736  ;;  %v1110_v46 = vadd.f32 1.0, %v1735_v37 }
 0x123   : > { %1226 = vxpose.xlu0.b32.cont [11/16] (narrow) %v1194_v42, 8  ;;  %1248 = vxpose.xlu1.b32.start [1/16] (narrow) %v1200_v36, 8  ;;  %v1739_v45 = vpop.eup %1738  ;;  %v1197_v47 = vmul.f32 %v1737_v41, %v2018_v23 }
 0x124   : > { %v1741_v34 = vpop.eup %1740  ;;  %1760 = vrcp.f32 %v1110_v46  ;;  %v1111_v55 = vadd.f32 1.0, %v1739_v45 }
 0x125   : > { %v1743_v19 = vpop.eup %1742  ;;  %v1202_v57 = vmul.f32 %v1741_v34, %v2029_v38  ;;  %1762 = vpow2.f32 %v1491_v15 }
 0x126   : > { %v1745_v50 = vpop.eup %1744  ;;  %v1198_v23 = vmul.f32 %v1743_v19, %v2032_v43  ;;  %1764 = vrcp.f32 %v1111_v55  ;;  %v1493_v43 = vmul.f32 -1.442695, %v2116_v60 }
 0x127   : > { %1227 = vxpose.xlu0.b32.cont [12/16] (narrow) %v1195_v27, 8  ;;  %1249 = vxpose.xlu1.b32.cont [2/16] (narrow) %v1201_v40, 8  ;;  %v1747_v58 = vpop.eup %1746  ;;  %v1112_v61 = vadd.f32 1.0, %v1745_v50  ;;  %1766 = vpow2.f32 %v1492_v54 }
 0x128   : > { %v1749_v59 = vpop.eup %1748  ;;  %v1203_v63 = vmul.f32 %v1747_v58, %v2040_v52  ;;  %v1494_v52 = vmul.f32 -1.442695, %v991_v6 }
 0x129   : > { %v1751_v31 = vpop.eup %1750  ;;  %v1199_v4 = vmul.f32 %v1749_v59, %v2044_v35  ;;  %1768 = vrcp.f32 %v1112_v61 }
 0x12a   : > { %v1753_v38 = vpop.eup %1752  ;;  %v1113_v9 = vadd.f32 1.0, %v1751_v31  ;;  %1770 = vpow2.f32 %v1493_v43 }
 0x12b   : > { %1228 = vxpose.xlu0.b32.cont [13/16] (narrow) %v1196_v2, 8  ;;  %1250 = vxpose.xlu1.b32.cont [3/16] (narrow) %v1202_v57, 8  ;;  %v1755_v0 = vpop.eup %1754  ;;  %v1204_v10 = vmul.f32 %v1753_v38, %v2049_v62 }
 0x12c   : > { %v1757_v14 = vpop.eup %1756  ;;  %v1114_v16 = vadd.f32 1.0, %v1755_v0  ;;  %1772 = vrcp.f32 %v1113_v9 }
 0x12d   : > { %v1759_v42 = vpop.eup %1758  ;;  %v1205_v35 = vmul.f32 %v1757_v14, %v2061_v17  ;;  %1774 = vpow2.f32 %v1494_v52 }
 0x12e   : > { %1776 = vrcp.f32 %v1114_v16  ;;  %v1115_v3 = vadd.f32 1.0, %v1759_v42 }
 0x12f   : > { %1229 = vxpose.xlu0.b32.cont [14/16] (narrow) %v1197_v47, 8  ;;  %1251 = vxpose.xlu1.b32.cont [4/16] (narrow) %v1203_v63, 8 }
 0x130   : > { %1778 = vrcp.f32 %v1115_v3 }
 0x131   : > { %v1761_v1 = vpop.eup %1760 }
 0x132   : > { %v1763_v39 = vpop.eup %1762  ;;  %v1206_v18 = vmul.f32 %v1761_v1, %v2065_v28 }
 0x133   : > { %1230 = vxpose.xlu0.b32.cont [15/16] (narrow) %v1198_v23, 8  ;;  %1252 = vxpose.xlu1.b32.cont [5/16] (narrow) %v1204_v10, 8  ;;  %v1765_v20 = vpop.eup %1764  ;;  %v1116_v22 = vadd.f32 1.0, %v1763_v39 }
 0x134   : > { %v1767_v62 = vpop.eup %1766  ;;  %v1207_v8 = vmul.f32 %v1765_v20, %v2070_v13 }
 0x135   : > { %1780 = vrcp.f32 %v1116_v22  ;;  %v1117_v17 = vadd.f32 1.0, %v1767_v62 }
 0x136   : > { %v1769_v25 = vpop.eup %1768 }
 0x137   : > { %1231 = vxpose.xlu0.b32.end [16/16] (narrow) %v1199_v4, 8  ;;  %1253 = vxpose.xlu1.b32.cont [6/16] (narrow) %v1205_v35, 8  ;;  %v1771_v26 = vpop.eup %1770  ;;  %v1208_v27 = vmul.f32 %v1769_v25, %v2076_v53  ;;  %1782 = vrcp.f32 %v1117_v17 }
 0x138   : > { %v1118_v12 = vadd.f32 1.0, %v1771_v26 }
 0x139   : > { %v1773_v51 = vpop.eup %1772 }
 0x13a   : > { %v1775_v11 = vpop.eup %1774  ;;  %v1209_v28 = vmul.f32 %v1773_v51, %v2087_v5  ;;  %1784 = vrcp.f32 %v1118_v12 }
 0x13b   : > { %1254 = vxpose.xlu1.b32.cont [7/16] (narrow) %v1206_v18, 8  ;;  %v1777_v29 = vpop.eup %1776  ;;  %v1119_v32 = vadd.f32 1.0, %v1775_v11 }
 0x13c   : > { %v1210_v13 = vmul.f32 %v1777_v29, %v2091_v48 }
 0x13d   : > { %v1779_v56 = vpop.eup %1778  ;;  %1786 = vrcp.f32 %v1119_v32 }
 0x13e   : > { %v1211_v36 = vmul.f32 %v1779_v56, %v2097_v30 }
 0x13f   : > { %1255 = vxpose.xlu1.b32.cont [8/16] (narrow) %v1207_v8, 8 }
 0x142   : > { %v1781_v53 = vpop.eup %1780 }
 0x143   : > { %1256 = vxpose.xlu1.b32.cont [9/16] (narrow) %v1208_v27, 8  ;;  %v1212_v37 = vmul.f32 %v1781_v53, %v2104_v24 }
 0x144   : > { %v1783_v40 = vpop.eup %1782 }
 0x145   : > { %v1213_v5 = vmul.f32 %v1783_v40, %v2111_v49 }
 0x147   : > { %1257 = vxpose.xlu1.b32.cont [10/16] (narrow) %v1209_v28, 8  ;;  %v1785_v2 = vpop.eup %1784 }
 0x148   : > { %v1214_v41 = vmul.f32 %v1785_v2, %v2116_v60 }
 0x14a   : > { %v1787_v21 = vpop.eup %1786 }
 0x14b   : > { %1258 = vxpose.xlu1.b32.cont [11/16] (narrow) %v1210_v13, 8  ;;  %v1215_v48 = vmul.f32 %v1787_v21, %v991_v6 }
 0x14f   : > { %1259 = vxpose.xlu1.b32.cont [12/16] (narrow) %v1211_v36, 8 }
 0x153   : > { %1260 = vxpose.xlu1.b32.cont [13/16] (narrow) %v1212_v37, 8 }
 0x157   : > { %1261 = vxpose.xlu1.b32.cont [14/16] (narrow) %v1213_v5, 8 }
 0x15b   : > { %1262 = vxpose.xlu1.b32.cont [15/16] (narrow) %v1214_v41, 8 }
 0x15f   : > { %1263 = vxpose.xlu1.b32.end [16/16] (narrow) %v1215_v48, 8 }
 0x177   : > { %v1232_v30 = vpop.trf.xlu0 }
 0x178   : > { %1280 = vst [vmem:[%s298_s13] sm:$0xff] %v1232_v30 }
 0x19f   : > { %v1264_v24 = vpop.trf.xlu1 }
 0x1a0   : > { %1281 = vst [vmem:[%s298_s13 + $0x8] sm:$0xff] %v1264_v24 }
 0x1a1 PF: > { %s15_s20 = sadd.s32 1, %s1810_s20   ;;  %s2153_s18 = smov %s1806_s19 }
 0x1a2   : > { %p12_p5 = scmp.ge.s32.totalorder %s15_s20, 4   ;;  %s2154_s19 = smov %s2156_s21 }
 0x1a4   :  { %14 = sbr.rel (!%p12_p5) target bundleno = 2 (0x2), region = 73 }

// kernel: c3_pallas.4
= control target key start
LH: loop header
LB: loop body
LE: loop exit
PB: predicated region body
PF: predicated region fallthrough
CT: control target
= control target key end

     0   :  { %s3285_s18 = smov 0   ;;  %s3287_s19 = smov 0   ;;  %s4481_s0 = inlined_call_operand.vmem [shape: bf16[2,16,16,4], index: 0, kind: input, shape index: {}]   ;;  %s4482_s1 = inlined_call_operand.vmem [shape: bf16[4,4], index: 1, kind: input, shape index: {}]   ;;  %s4483_s2 = inlined_call_operand.vmem [shape: f32[1,4], index: 2, kind: input, shape index: {}]   ;;  %s4484_s3 = inlined_call_operand.vmem [shape: bf16[3,12,4], index: 3, kind: input, shape index: {}]   ;;  %s4485_s4 = inlined_call_operand.vmem [shape: f32[1,4], index: 4, kind: input, shape index: {}]   ;;  %s4486_s5 = inlined_call_operand.vmem [shape: bf16[2,16,16,4], index: 5, kind: output, shape index: {}]  }
   0x1   :  { %s3289_s20 = smov 0   ;;  %s3291_s21 = smov 0  }
   0x2   :  { %s3293_s22 = smov 0  }
   0x3 LB: > { %s24_s23 = sadd.s32 1, %s3239_s20  ;;  %s27_s24 = sadd.s32 1, %s3243_s21  ;;  %s3247_s22 = sphi %s3293_s22, %s15_s22   ;;  %s3243_s21 = sphi %s3291_s21, %s4535_s21   ;;  %s3239_s20 = sphi %s3289_s20, %s4534_s20   ;;  %s3235_s19 = sphi %s3287_s19, %s4533_s19   ;;  %s3231_s18 = sphi %s3285_s18, %s4532_s18  }
   0x4   : > { %p25_p0 = scmp.ge.s32.totalorder %s24_s23, 2  ;;  %p2605_p1 = scmp.ge.s32.totalorder %s3247_s22, 1 }
   0x5   : > { %p201_p2 = scmp.lt.s32.totalorder %s3247_s22, 5 }
   0x6   : > { %s4537_s23 = smov (%p25_p0, %s24_s23), 0  ;;  %s4539_s24 = smov (!%p25_p0, %s27_s24), %s3243_s21 }
   0x7   : > { %p202_p3 = pnand %p2605_p1, %p201_p2  ;;  %p29_p4 = scmp.ge.s32.totalorder %s4539_s24, 2 }
   0x9   : > { %s4541_s24 = smov (%p29_p4, %s4539_s24), 0  ;;  %205 = sbr.rel (%p202_p3) target bundleno = 723 (0x2d3), region = 40 }
   0xe   : > { %v273_v0 = vld [vmem:[%s4482_s1] sm:$0x3]  ;;  %vm346_vm0 = vcmask 1041408   ;;  %v3249_v2 = vmov 0.0   ;;  %p234_p5 = scmp.lt.s32.totalorder %s3235_s19, 1  ;;  %s3327_s29 = sshll.u32 %s3231_s18, 3  ;;  %v834_v17 = vlaneseq }
   0xf   : > { %v745_v1 = vld [vmem:[%s4482_s1] sm:$0x3]  ;;  %2969 = vmatprep.subr.msk.bf16.mxu0 %vm346_vm0, %v273_v0  ;;  %2909 = vmatprep.subr.bf16.mxu1 %v3249_v2  ;;  %v348_v3 = vsel %vm346_vm0, %v273_v0, 0  ;;  %vm3250_vm1 = vmmov 0   ;;  %s2810_s30 = sshll.u32 %s3231_s18, 6  ;;  %p242_p6 = scmp.lt.s32.totalorder %s3327_s29, 15 }
  0x10   : > { %v762_v4 = vsel %vm346_vm0, %v745_v1, 0  ;;  %2886 = vmatpush3.bf16.msra.mxu0 %v348_v3  ;;  %s4543_s19 = smov (!%p234_p5, %s3235_s19), 1  ;;  %2911 = vmatprep.mubr.msk.bf16.mxu1 %vm3250_vm1, %v3249_v2  ;;  %s2664_s7 = sadd.s32 4294967295, %s3327_s29  ;;  %v648_v5 = vld [vmem:[%s4482_s1] sm:$0x3]  ;;  %vm321_vm2 = vcmask 31744  }
  0x11   : > { %2910 = vmatpush3.bf16.msra.mxu1 %v762_v4  ;;  %2903 = vmatprep.subr.bf16.mxu0 %v3249_v2  ;;  %s2808_s6 = sshll.u32 %s4543_s19, 7  ;;  %s2610_s11 = sshll.u32 %s4543_s19, 5  ;;  %v665_v9 = vsel %vm346_vm0, %v648_v5, 0  ;;  %v3365_v18 = vshrl.u32 %v834_v17, 7  ;;  %v3251_v19 = vmov 0   ;;  %vm3252_vm5 = vmmov 1  }
  0x12   : > { %s238_s10 = scalar_lea.vmem %s4481_s0, %s2808_s6  ;;  %s737_s13 = sadd.s32 8, %s3327_s29  ;;  %vm859_vm6 = vmpackc.low %vm3252_vm5, %vm3252_vm5  ;;  %vm862_vm7 = vsmask.f32 3328  ;;  %vm863_vm8 = vsmask.f32 7440  ;;  %vm623_vm12 = vcmask 27648  }
  0x13   : > { %s3336_s12 = scalar_lea.vmem %s238_s10, %s2810_s30  ;;  %s4545_s29 = smov (!%p242_p6, %s3327_s29), 15  ;;  %vm837_vm3 = vcmp.ge.s32.totalorder %v3365_v18, 1  ;;  %v3370_v21 = vsel %vm859_vm6, 65537, %v3251_v19  ;;  %vm3387_vm9 = vmor %vm862_vm7, %vm863_vm8  ;;  %v3404_v37 = vld [vmem:[%s4483_s2] ss:$0 sm:$0xff]  ;;  %vm1168_vm5 = vcmask 1042432  }
  0x14   : > { %v257_v6 = vld [vmem:[%s3336_s12] sm:$0xff]   ;;  %v259_v7 = vld [vmem:[%s3336_s12 + $0x8] sm:$0xff]   ;;  %v261_v8 = vld [vmem:[%s3336_s12 + $0x10] sm:$0xff]   ;;  %s2609_s16 = sshll.u32 %s4545_s29, 1  ;;  %p738_p7 = scmp.lt.s32.totalorder %s737_s13, 15  ;;  %v875_v22 = vshll.u32 %v3370_v21, 16 }
  0x15   : > { %2887 = vmatprep.mubr.msk.bf16.mxu0 %vm321_vm2, %v257_v6  ;;  %s3348_s17 = sadd.s32 %s2610_s11, %s2609_s16  ;;  %p641_p8 = scmp.gt.s32.totalorder %s2664_s7, 0  ;;  %v263_v10 = vld [vmem:[%s3336_s12 + $0x18] sm:$0xff]   ;;  %v265_v11 = vld [vmem:[%s3336_s12 + $0x20] sm:$0xff]   ;;  %v267_v13 = vld [vmem:[%s3336_s12 + $0x28] sm:$0xff]   ;;  %v879_v23 = vshrl.u32 %v3370_v21, 16  ;;  %v836_v6 = vadd.s32 8, %v3365_v18 }
  0x16   : > { %2888 = vmatmul.mubr.msk.bf16.vlgmr.msra.gmra.mxu0 %vm321_vm2, %v259_v7  ;;  %s4547_s13 = smov (!%p738_p7, %s737_s13), 15  ;;  %v269_v14 = vld [vmem:[%s3336_s12 + $0x30] sm:$0xff]   ;;  %v271_v15 = vld [vmem:[%s3336_s12 + $0x38] sm:$0xff]   ;;  %vm858_vm4 = vmpackc.low %vm837_vm3, %vm837_vm3  ;;  %v3376_v24 = vrot.slane %v875_v22, 5  ;;  %vm911_vm13 = vsmask.f32 256 }
  0x17   : > { %2891 = vmatprep.mubr.msk.bf16.mxu0 %vm321_vm2, %v261_v8  ;;  %2904 = vmatpush3.bf16.msra.mxu0 %v665_v9  ;;  %s4549_s7 = smov (!%p641_p8, %s2664_s7), 0  ;;  %s2828_s19 = sshll.u32 %s4547_s13, 3  ;;  %v860_v20 = vsel %vm858_vm4, 65537, %v3251_v19  ;;  %v881_v25 = vrot.slane %v879_v23, 4  ;;  %vm840_vm10 = vcmp.le.s32.totalorder %v836_v6, 14 }
  0x18   : > { %s742_s25 = scalar_lea.vmem %s238_s10, %s2828_s19  ;;  %s2827_s26 = sshll.u32 %s4549_s7, 3  ;;  %v869_v27 = vshrl.u32 %v860_v20, 16  ;;  %v866_v29 = vshll.u32 %v860_v20, 16  ;;  %vm908_vm11 = vmpackc.low %vm840_vm10, %vm840_vm10  ;;  %vm912_vm14 = vsmask.f32 4368 }
  0x19   : > { %v3021_v12 = vld [vmem:[%s742_s25] sm:$0xff]   ;;  %s645_s27 = scalar_lea.vmem %s238_s10, %s2827_s26  ;;  %v882_v26 = vor.u32 %v881_v25, %v3376_v24  ;;  %p820_p9 = scmp.lt.s32.totalorder %s3231_s18, 1  ;;  %vm3513_vm15 = vmor %vm911_vm13, %vm912_vm14  ;;  %vm1442_vm14 = vcmask 1045504  }
  0x1a   : > { %2912 = vmatmul.mubr.msk.bf16.vlgmr.msra.gmra.mxu1 %vm321_vm2, %v3021_v12  ;;  %v3028_v16 = vld [vmem:[%s645_s27] sm:$0xff]   ;;  %v871_v28 = vrot.slane %v869_v27, 4  ;;  %v3381_v30 = vrot.slane %v866_v29, 5  ;;  %p723_p10 = scmp.gt.s32.totalorder %s3231_s18, 0  ;;  %s3253_s18 = smov 8  }
  0x1b   : > { %v3391_v34 = vrot.slane %v882_v26, 4  ;;  %s3507_s30 = scalar_select %p820_p9, 1, 0 }
  0x1c   : > { %v872_v31 = vor.u32 %v871_v28, %v3381_v30  ;;  %s3532_s6 = scalar_select %p723_p10, 1, 0  ;;  %vm885_vm10 = vcmp.ne.s16.totalorder %v3381_v30, 0 }
  0x1d   : > { %s3254_s7 = smov 4   ;;  %s2611_s19 = sshll.u32 %s3348_s17, 2 }
  0x1e   : > { %2892 = vmatmul.mubr.msk.bf16.gmra.mxu0 %vm321_vm2, %v263_v10  ;;  %v3384_v32 = vrot.slane %v872_v31, 4  ;;  %s4412_s27 = scalar_lea.vmem %s4486_s5, %s2611_s19 }
  0x1f   : > { %2895 = vmatprep.mubr.msk.bf16.mxu0 %vm321_vm2, %v265_v11 }
  0x20   : > { %v878_v35 = vsel %vm3387_vm9, %v3384_v32, %v3376_v24 }
  0x26   : > { %2896 = vmatmul.mubr.msk.bf16.gmra.mxu0 %vm321_vm2, %v267_v13 }
  0x27   : > { %2899 = vmatprep.mubr.msk.bf16.mxu0 %vm321_vm2, %v269_v14 }
  0x2e   : > { %2900 = vmatmul.mubr.msk.bf16.gmra.mxu0 %vm321_vm2, %v271_v15 }
  0x2f   : > { %2905 = vmatprep.mubr.msk.bf16.mxu0 %vm3250_vm1, %v3249_v2 }
  0x36   : > { %2906 = vmatmul.mubr.msk.bf16.vlgmr.msra.gmra.mxu0 %vm321_vm2, %v3028_v16 }
  0xd6   : > { %v2889_v38 = vpop.f32.mrf.mxu0 }
  0xd7   : > { %v3407_v39 = vadd.f32 %v2889_v38, %v3404_v37 }
  0xd8   : > { %v384_v40 = vpop.f32.mrf.mxu0 }
  0xd9   : > { %v2634_v41 = vmul.f32 -1.442695, %v3407_v39  ;;  %v3411_v42 = vadd.f32 %v3404_v37, %v384_v40 }
  0xda   : > { %v2890_v43 = vpop.f32.mrf.mxu0  ;;  %v798_v49 = vpop.f32.mrf.mxu1 }
  0xdb   : > { %3057 = vpow2.f32 %v2634_v41  ;;  %v2632_v44 = vmul.f32 -1.442695, %v3411_v42  ;;  %v3415_v45 = vadd.f32 %v2890_v43, %v3404_v37  ;;  %v3422_v51 = vadd.f32 %v3404_v37, %v798_v49 }
  0xdc   : > { %v387_v46 = vpop.f32.mrf.mxu0  ;;  %v2913_v54 = vpop.f32.mrf.mxu1  ;;  %v3467_v49 = vsel %vm908_vm11, 65537, %v3251_v19  ;;  %vm3785_vm11 = vcmp.ne.s16.totalorder %v878_v35, 0 }
  0xdd   : > { %3059 = vpow2.f32 %v2632_v44  ;;  %v2635_v47 = vmul.f32 -1.442695, %v3415_v45  ;;  %v3419_v48 = vadd.f32 %v3404_v37, %v387_v46  ;;  %v2679_v56 = vmul.f32 -1.442695, %v3422_v51 }
  0xde   : > { %v2893_v50 = vpop.f32.mrf.mxu0  ;;  %v801_v59 = vpop.f32.mrf.mxu1  ;;  %v923_v19 = vshrl.u32 %v3467_v49, 16 }
  0xdf   : > { %3061 = vpow2.f32 %v2635_v47  ;;  %v2633_v52 = vmul.f32 -1.442695, %v3419_v48  ;;  %v3426_v53 = vadd.f32 %v2893_v50, %v3404_v37  ;;  %v3434_v61 = vadd.f32 %v3404_v37, %v801_v59 }
  0xe0   : > { %v400_v55 = vpop.f32.mrf.mxu0  ;;  %v2914_v1 = vpop.f32.mrf.mxu1 }
  0xe1   : > { %3063 = vpow2.f32 %v2633_v52  ;;  %v2638_v57 = vmul.f32 -1.442695, %v3426_v53  ;;  %v3431_v58 = vadd.f32 %v3404_v37, %v400_v55  ;;  %v2680_v2 = vmul.f32 -1.442695, %v3434_v61 }
  0xe2   : > { %v2894_v60 = vpop.f32.mrf.mxu0  ;;  %3065 = vpow2.f32 %v2679_v56 }
  0xe3   : > { %v2636_v62 = vmul.f32 -1.442695, %v3431_v58  ;;  %v3438_v63 = vadd.f32 %v2894_v60, %v3404_v37  ;;  %3067 = vpow2.f32 %v2638_v57 }
  0xe4   : > { %v403_v0 = vpop.f32.mrf.mxu0 }
  0xe5   : > { %3069 = vpow2.f32 %v2636_v62  ;;  %v2639_v3 = vmul.f32 -1.442695, %v3438_v63  ;;  %v3443_v4 = vadd.f32 %v3404_v37, %v403_v0 }
  0xe6   : > { %v2897_v5 = vpop.f32.mrf.mxu0  ;;  %3071 = vpow2.f32 %v2680_v2 }
  0xe7   : > { %v2637_v7 = vmul.f32 -1.442695, %v3443_v4  ;;  %v3448_v8 = vadd.f32 %v2897_v5, %v3404_v37  ;;  %3073 = vpow2.f32 %v2639_v3 }
  0xe8   : > { %v3058_v9 = vpop.eup %3057  ;;  %v416_v10 = vpop.f32.mrf.mxu0 }
  0xe9   : > { %v497_v11 = vadd.f32 1.0, %v3058_v9  ;;  %3075 = vpow2.f32 %v2637_v7  ;;  %v2642_v12 = vmul.f32 -1.442695, %v3448_v8  ;;  %v3452_v13 = vadd.f32 %v3404_v37, %v416_v10 }
  0xea   : > { %v3060_v14 = vpop.eup %3059  ;;  %v2898_v15 = vpop.f32.mrf.mxu0 }
  0xeb   : > { %3077 = vrcp.f32 %v497_v11  ;;  %v495_v16 = vadd.f32 1.0, %v3060_v14  ;;  %v2640_v17 = vmul.f32 -1.442695, %v3452_v13  ;;  %v3456_v18 = vadd.f32 %v2898_v15, %v3404_v37 }
  0xec   : > { %v3062_v20 = vpop.eup %3061  ;;  %3079 = vpow2.f32 %v2642_v12  ;;  %v419_v25 = vpop.f32.mrf.mxu0  ;;  %v917_v15 = vrot.slane %v879_v23, 7 }
  0xed   : > { %3081 = vrcp.f32 %v495_v16  ;;  %v498_v26 = vadd.f32 1.0, %v3062_v20  ;;  %v2643_v27 = vmul.f32 -1.442695, %v3456_v18  ;;  %v3460_v28 = vadd.f32 %v3404_v37, %v419_v25 }
  0xee   : > { %v3064_v29 = vpop.eup %3063  ;;  %3083 = vpow2.f32 %v2640_v17  ;;  %v2901_v31 = vpop.f32.mrf.mxu0  ;;  %v3487_v16 = vrot.slane %v923_v19, 7 }
  0xef   : > { %3085 = vrcp.f32 %v498_v26  ;;  %v496_v38 = vadd.f32 1.0, %v3064_v29  ;;  %v2641_v40 = vmul.f32 -1.442695, %v3460_v28  ;;  %v3464_v41 = vadd.f32 %v2901_v31, %v3404_v37  ;;  %v3066_v43 = vpop.eup %3065 }
  0xf0   : > { %3087 = vpow2.f32 %v2643_v27  ;;  %v432_v44 = vpop.f32.mrf.mxu0  ;;  %v3068_v46 = vpop.eup %3067  ;;  %v811_v47 = vadd.f32 1.0, %v3066_v43 }
  0xf1   : > { %3089 = vrcp.f32 %v496_v38  ;;  %v501_v52 = vadd.f32 1.0, %v3068_v46  ;;  %v2646_v54 = vmul.f32 -1.442695, %v3464_v41  ;;  %v3471_v55 = vadd.f32 %v3404_v37, %v432_v44 }
  0xf2   : > { %v3070_v50 = vpop.eup %3069  ;;  %3091 = vpow2.f32 %v2641_v40  ;;  %v2902_v56 = vpop.f32.mrf.mxu0  ;;  %v926_v38 = vshll.u32 %v3467_v49, 16  ;;  %v930_v49 = vrot.slane %v3487_v16, 4 }
  0xf3   : > { %3093 = vrcp.f32 %v811_v47  ;;  %v499_v57 = vadd.f32 1.0, %v3070_v50  ;;  %v3474_v59 = vadd.f32 %v2902_v56, %v3404_v37  ;;  %v3072_v60 = vpop.eup %3071  ;;  %v2644_v6 = vmul.f32 -1.442695, %v3471_v55 }
  0xf4   : > { %3095 = vrcp.f32 %v501_v52  ;;  %v435_v62 = vpop.f32.mrf.mxu0  ;;  %v3074_v0 = vpop.eup %3073  ;;  %v812_v1 = vadd.f32 1.0, %v3072_v60  ;;  %v3500_v50 = vor.u32 %v917_v15, %v875_v22  ;;  %v921_v22 = vrot.slane %v917_v15, 4 }
  0xf5   : > { %3097 = vrcp.f32 %v499_v57  ;;  %v3478_v2 = vadd.f32 %v3404_v37, %v435_v62  ;;  %v502_v5 = vadd.f32 1.0, %v3074_v0  ;;  %v2647_v10 = vmul.f32 -1.442695, %v3474_v59 }
  0xf6   : > { %v3076_v3 = vpop.eup %3075  ;;  %3099 = vpow2.f32 %v2646_v54  ;;  %v701_v7 = vpop.f32.mrf.mxu0  ;;  %v928_v19 = vor.u32 %v926_v38, %v3487_v16  ;;  %vm932_vm0 = vcmp.ne.s16.totalorder %v3500_v50, 0  ;;  %vm3667_vm6 = vcmp.ne.s16.totalorder %v930_v49, 0 }
  0xf7   : > { %3101 = vrcp.f32 %v812_v1  ;;  %v500_v9 = vadd.f32 1.0, %v3076_v3  ;;  %v3483_v11 = vadd.f32 %v3404_v37, %v701_v7  ;;  %v2645_v25 = vmul.f32 -1.442695, %v3478_v2 }
  0xf8   : > { %v3078_v12 = vpop.eup %3077  ;;  %3103 = vrcp.f32 %v502_v5  ;;  %v2907_v14 = vpop.f32.mrf.mxu0 }
  0xf9   : > { %v3080_v17 = vpop.eup %3079  ;;  %v545_v20 = vmul.f32 %v3078_v12, %v3407_v39  ;;  %3105 = vrcp.f32 %v500_v9  ;;  %v2670_v29 = vmul.f32 -1.442695, %v3483_v11  ;;  %v3538_v14 = vsel %vm3513_vm15, %v921_v22, %v928_v19 }
  0xfa   : > { %v3082_v26 = vpop.eup %3081  ;;  %v505_v27 = vadd.f32 1.0, %v3080_v17  ;;  %3107 = vpow2.f32 %v2644_v6  ;;  %v704_v31 = vpop.f32.mrf.mxu0  ;;  %v3526_v6 = vsel %vm3513_vm15, %v930_v49, %v3500_v50  ;;  %vm933_vm4 = vcmp.ne.s16.totalorder %v3538_v14, 0 }
  0xfb   : > { %v3084_v23 = vpop.eup %3083  ;;  %v2813_v40 = vpack.c.bf16 %v545_v20, %v545_v20  ;;  %v543_v43 = vmul.f32 %v3082_v26, %v3411_v42  ;;  %3109 = vpow2.f32 %v2647_v10  ;;  %v3496_v39 = vadd.f32 %v3404_v37, %v704_v31 }
  0xfc   : > { %v3086_v44 = vpop.eup %3085  ;;  %3111 = vrcp.f32 %v505_v27  ;;  %v503_v46 = vadd.f32 1.0, %v3084_v23  ;;  %v2908_v47 = vpop.f32.mrf.mxu0  ;;  %vm934_vm1 = vcmp.ne.s16.totalorder %v3526_v6, 0  ;;  %vm1340_vm15 = vsmask.f32 4352 }
  0xfd   : > { %v3088_v52 = vpop.eup %3087  ;;  %626 = vst.msk [vmem:[#allocation2 + $0x14] sm:$0xf] %vm623_vm12, %v2813_v40  ;;  %v2811_v54 = vpack.c.bf16 %v543_v43, %v543_v43  ;;  %v546_v42 = vmul.f32 %v3086_v44, %v3415_v45  ;;  %3113 = vpow2.f32 %v2645_v25  ;;  %v2671_v37 = vmul.f32 -1.442695, %v3496_v39 }
  0xfe   : > { %v3090_v56 = vpop.eup %3089  ;;  %3115 = vrcp.f32 %v503_v46  ;;  %v506_v57 = vadd.f32 1.0, %v3088_v52  ;;  %v725_v40 = vstv %s3532_s6 }
  0xff   : > { %v3092_v60 = vpop.eup %3091  ;;  %624 = vst.msk [vmem:[#allocation2 + $0xc] sm:$0xf] %vm623_vm12, %v2811_v54  ;;  %v2814_v45 = vpack.c.bf16 %v546_v42, %v546_v42  ;;  %v544_v62 = vmul.f32 %v3090_v56, %v3419_v48  ;;  %3117 = vpow2.f32 %v2670_v29  ;;  %v822_v48 = vstv %s3507_s30 }
 0x100   : > { %v3094_v0 = vpop.eup %3093  ;;  %3119 = vrcp.f32 %v506_v57  ;;  %v504_v1 = vadd.f32 1.0, %v3092_v60  ;;  %vm3548_vm3 = vcmp.eq.s32.totalorder %v822_v48, 1  ;;  %vm726_vm8 = vcmp.eq.s32.totalorder %v725_v40, 1 }
 0x101   : > { %v3096_v3 = vpop.eup %3095  ;;  %627 = vst.msk [vmem:[#allocation2 + $0x18] sm:$0xf] %vm623_vm12, %v2814_v45  ;;  %v2812_v5 = vpack.c.bf16 %v544_v62, %v544_v62  ;;  %3121 = vpow2.f32 %v2671_v37  ;;  %v817_v27 = vmul.f32 %v3094_v0, %v3422_v51 }
 0x102   : > { %v3098_v7 = vpop.eup %3097  ;;  %v549_v9 = vmul.f32 %v3096_v3, %v3426_v53  ;;  %3123 = vrcp.f32 %v504_v1 }
 0x103   : > { %v3100_v10 = vpop.eup %3099  ;;  %625 = vst.msk [vmem:[#allocation2 + $0x10] sm:$0xf] %vm623_vm12, %v2812_v5  ;;  %v547_v12 = vmul.f32 %v3098_v7, %v3431_v58 }
 0x104   : > { %v3102_v15 = vpop.eup %3101  ;;  %v2817_v17 = vpack.c.bf16 %v549_v9, %v549_v9  ;;  %v509_v20 = vadd.f32 1.0, %v3100_v10  ;;  %v3542_v53 = vld [vmem:[#allocation2 + $0x14] sm:$0xf] }
 0x105   : > { %v3544_v25 = vld [vmem:[#allocation2 + $0x14] sm:$0xf]  ;;  %v3104_v26 = vpop.eup %3103  ;;  %v818_v58 = vmul.f32 %v3102_v15, %v3434_v61  ;;  %v2815_v31 = vpack.c.bf16 %v547_v12, %v547_v12  ;;  %v1727_v46 = vsel %vm932_vm0, %v3542_v53, 0 }
 0x106   : > { %4502 = vst [vmem:[#allocation3_spill] sm:$0xff] %v3544_v25  ;;  %v3106_v38 = vpop.eup %3105  ;;  %630 = vst.msk [vmem:[#allocation2 + $0x24] sm:$0xf] %vm623_vm12, %v2817_v17  ;;  %v550_v23 = vmul.f32 %v3104_v26, %v3438_v63  ;;  %3125 = vrcp.f32 %v509_v20  ;;  %v3556_v43 = vld [vmem:[#allocation2 + $0xc] sm:$0xf]  ;;  %v940_v63 = vsel %vm934_vm1, %v3544_v25, 0 }
 0x107   : > { %v3108_v44 = vpop.eup %3107  ;;  %v819_v51 = vpack.c.bf16 %v818_v58, %v817_v27  ;;  %628 = vst.msk [vmem:[#allocation2 + $0x1c] sm:$0xf] %vm623_vm12, %v2815_v31  ;;  %v548_v61 = vmul.f32 %v3106_v38, %v3443_v4  ;;  %v1260_v37 = vsel %vm932_vm0, %v3556_v43, 0  ;;  %v938_v4 = vsel %vm934_vm1, %v3556_v43, 0 }
 0x108   : > { %v3110_v47 = vpop.eup %3109  ;;  %v2818_v52 = vpack.c.bf16 %v550_v23, %v550_v23  ;;  %v507_v54 = vadd.f32 1.0, %v3108_v44  ;;  %v3566_v42 = vld [vmem:[#allocation2 + $0x18] sm:$0xf]  ;;  %v3885_v33 = vsel %vm3785_vm11, %v3556_v43, 0 }
 0x109   : > { %v3112_v56 = vpop.eup %3111  ;;  %v824_v57 = vsel %vm3548_vm3, %v819_v51, 0  ;;  %v2816_v21 = vpack.c.bf16 %v548_v61, %v548_v61  ;;  %v510_v22 = vadd.f32 1.0, %v3110_v47  ;;  %v1728_v60 = vsel %vm933_vm4, %v3566_v42, 0  ;;  %v3586_v9 = vld [vmem:[#allocation2 + $0x18] sm:$0xf] }
 0x10a   : > { %v3114_v45 = vpop.eup %3113  ;;  %v2681_v62 = vcombine.low %v824_v57, %v824_v57  ;;  %v2682_v19 = vcombine.high %v824_v57, %v824_v57  ;;  %631 = vst.msk [vmem:[#allocation2 + $0x28] sm:$0xf] %vm623_vm12, %v2818_v52  ;;  %v553_v0 = vmul.f32 %v3112_v56, %v3448_v8  ;;  %3127 = vrcp.f32 %v507_v54  ;;  %v3581_v1 = vld [vmem:[#allocation2 + $0x10] sm:$0xf] }
 0x10b   : > { %v3116_v3 = vpop.eup %3115  ;;  %629 = vst.msk [vmem:[#allocation2 + $0x20] sm:$0xf] %vm623_vm12, %v2816_v21  ;;  %3129 = vrcp.f32 %v510_v22  ;;  %v508_v5 = vadd.f32 1.0, %v3114_v45  ;;  %v2745_v7 = vcombine.low %v3542_v53, %v3566_v42  ;;  %v2753_v48 = vcombine.low %v1727_v46, %v1728_v60 }
 0x10c   : > { %v3118_v10 = vpop.eup %3117  ;;  %832 = vst.msk [vmem:[#allocation2 + $0x4c] sm:$0xf] %vm623_vm12, %v2681_v62  ;;  %833 = vst.msk [vmem:[#allocation2 + $0x50] sm:$0xf] %vm623_vm12, %v2682_v19  ;;  %v2821_v8 = vpack.c.bf16 %v553_v0, %v553_v0  ;;  %v551_v12 = vmul.f32 %v3116_v3, %v3452_v13  ;;  %v939_v15 = vsel %vm933_vm4, %v3581_v1, 0  ;;  %v2693_v17 = vcombine.low %v3556_v43, %v3581_v1 }
 0x10d   : > { %v3120_v20 = vpop.eup %3119  ;;  %3131 = vrcp.f32 %v508_v5  ;;  %v714_v26 = vadd.f32 1.0, %v3118_v10  ;;  %v3596_v27 = vrot.slane %v2753_v48, 5  ;;  %v2713_v58 = vcombine.low %v1260_v37, %v939_v15 }
 0x10e   : > { %v3122_v29 = vpop.eup %3121  ;;  %634 = vst.msk [vmem:[#allocation2 + $0x34] sm:$0xf] %vm623_vm12, %v2821_v8  ;;  %v2819_v31 = vpack.c.bf16 %v551_v12, %v551_v12  ;;  %v554_v38 = vmul.f32 %v3120_v20, %v3456_v18  ;;  %v2701_v13 = vcombine.low %v938_v4, %v939_v15  ;;  %v941_v23 = vsel %vm933_vm4, %v3586_v9, 0  ;;  %v3603_v44 = vld [vmem:[#allocation2 + $0x1c] sm:$0xf] }
 0x10f   : > { %v3124_v51 = vpop.eup %3123  ;;  %3133 = vrcp.f32 %v714_v26  ;;  %v715_v61 = vadd.f32 1.0, %v3122_v29  ;;  %1976 = vrot.lane.b32.xlu0 %v3596_v27, %s3253_s18  ;;  %v1306_v46 = vrot.slane %v2713_v58, 5  ;;  %v2702_v47 = vcombine.low %v940_v63, %v941_v23  ;;  %v3631_v15 = vld [vmem:[#allocation2 + $0x1c] sm:$0xf]  ;;  %v3639_v58 = vld [vmem:[#allocation2 + $0x24] sm:$0xf] }
 0x110   : > { %632 = vst.msk [vmem:[#allocation2 + $0x2c] sm:$0xf] %vm623_vm12, %v2819_v31  ;;  %v2822_v52 = vpack.c.bf16 %v554_v38, %v554_v38  ;;  %v552_v18 = vmul.f32 %v3124_v51, %v3460_v28  ;;  %v3609_v54 = vrot.slane %v2701_v13, 5  ;;  %v1828_v37 = vshrl.u32 %v2745_v7, 16 }
 0x111   : > { %3135 = vrcp.f32 %v715_v61  ;;  %1312 = vrot.lane.b32.xlu1 %v1306_v46, %s3253_s18  ;;  %v1172_v4 = vrot.slane %v2702_v47, 5  ;;  %v1831_v56 = vshll.u32 %v2745_v7, 16  ;;  %v942_v57 = vsel %vm934_vm1, %v3603_v44, 0  ;;  %v3626_v7 = vld [vmem:[#allocation2 + $0x28] sm:$0xf] }
 0x112   : > { %635 = vst.msk [vmem:[#allocation2 + $0x38] sm:$0xf] %vm623_vm12, %v2822_v52  ;;  %v2820_v63 = vpack.c.bf16 %v552_v18, %v552_v18  ;;  %v1830_v21 = vrot.slane %v1828_v37, 4  ;;  %v3616_v22 = vld [vmem:[#allocation2 + $0x20] sm:$0xf]  ;;  %v1045_v60 = vshrl.u32 %v2693_v17, 16  ;;  %v2694_v20 = vcombine.low %v3544_v25, %v3586_v9 }
 0x113   : > { %v1048_v28 = vshll.u32 %v2693_v17, 16  ;;  %v3126_v45 = vpop.eup %3125  ;;  %v1307_v62 = vsel %vm1168_vm5, %v1306_v46, %v1172_v4  ;;  %v1833_v19 = vrot.slane %v1831_v56, 5  ;;  %v1173_v0 = vsel %vm1168_vm5, %v3609_v54, %v1172_v4  ;;  %v3624_v5 = vld [vmem:[#allocation2 + $0x20] sm:$0xf]  ;;  %4505 = vst [vmem:[#allocation4_spill] sm:$0xff] %v3626_v7 }
 0x114   : > { %v943_v3 = vsel %vm933_vm4, %v3616_v22, 0  ;;  %633 = vst.msk [vmem:[#allocation2 + $0x30] sm:$0xf] %vm623_vm12, %v2820_v63  ;;  %v557_v48 = vmul.f32 %v3126_v45, %v3464_v41  ;;  %1314 = vrot.lane.b32.xlu0 %v1307_v62, %s3253_s18  ;;  %v1047_v8 = vrot.slane %v1045_v60, 4  ;;  %v2695_v26 = vcombine.low %v3603_v44, %v3616_v22  ;;  %v3657_v45 = vld [vmem:[#allocation2 + $0x24] sm:$0xf] }
 0x115   : > { %v2703_v10 = vcombine.low %v942_v57, %v943_v3  ;;  %v1050_v12 = vrot.slane %v1048_v28, 5  ;;  %v3633_v17 = vor.u32 %v1833_v19, %v1830_v21  ;;  %v2746_v41 = vcombine.low %v3631_v15, %v3624_v5  ;;  %v3815_v50 = vld [vmem:[#allocation2 + $0x34] sm:$0xf] }
 0x116   : > { %v2825_v29 = vpack.c.bf16 %v557_v48, %v557_v48  ;;  %v2747_v13 = vcombine.low %v3639_v58, %v3626_v7  ;;  %v1054_v51 = vshrl.u32 %v2694_v20, 16  ;;  %v1057_v61 = vshll.u32 %v2694_v20, 16 }
 0x117   : > { %v3643_v31 = vrot.slane %v2703_v10, 5  ;;  %v3645_v38 = vor.u32 %v1050_v12, %v1047_v8  ;;  %v3128_v23 = vpop.eup %3127  ;;  %1898 = vrot.lane.b32.xlu1 %v3633_v17, %s3254_s7  ;;  %v1063_v46 = vshrl.u32 %v2695_v26, 16  ;;  %v1066_v47 = vshll.u32 %v2695_v26, 16  ;;  %v3661_v12 = vld [vmem:[#allocation2 + $0x28] sm:$0xf] }
 0x118   : > { %v3130_v52 = vpop.eup %3129  ;;  %638 = vst.msk [vmem:[#allocation2 + $0x44] sm:$0xf] %vm623_vm12, %v2825_v29  ;;  %v555_v18 = vmul.f32 %v3128_v23, %v3471_v55  ;;  %1190 = vrot.lane.b32.xlu0 %v1173_v0, %s3253_s18  ;;  %v1836_v56 = vshrl.u32 %v2746_v41, 16  ;;  %v1839_v57 = vshll.u32 %v2746_v41, 16  ;;  %v1056_v21 = vrot.slane %v1054_v51, 4 }
 0x119   : > { %v1175_v37 = vsel %vm1168_vm5, %v1172_v4, %v3643_v31  ;;  %v558_v63 = vmul.f32 %v3130_v52, %v3474_v59  ;;  %v1059_v60 = vrot.slane %v1057_v61, 5  ;;  %v1065_v28 = vrot.slane %v1063_v46, 4  ;;  %v3663_v59 = vld [vmem:[#allocation2 + $0x2c] sm:$0xf] }
 0x11a   : > { %v3132_v62 = vpop.eup %3131  ;;  %v2823_v19 = vpack.c.bf16 %v555_v18, %v555_v18  ;;  %v1068_v3 = vrot.slane %v1066_v47, 5  ;;  %v1838_v48 = vrot.slane %v1836_v56, 4  ;;  %v1841_v10 = vrot.slane %v1839_v57, 5 }
 0x11b   : > { %v2826_v55 = vpack.c.bf16 %v558_v63, %v558_v63  ;;  %v556_v0 = vmul.f32 %v3132_v62, %v3478_v2  ;;  %1192 = vrot.lane.b32.xlu1 %v1175_v37, %s3253_s18  ;;  %v1060_v4 = vor.u32 %v1059_v60, %v1056_v21  ;;  %v1845_v8 = vshrl.u32 %v2747_v13, 16  ;;  %v3679_v51 = vld [vmem:[#allocation2 + $0x30] sm:$0xf] }
 0x11c   : > { %v3134_v26 = vpop.eup %3133  ;;  %636 = vst.msk [vmem:[#allocation2 + $0x3c] sm:$0xf] %vm623_vm12, %v2823_v19  ;;  %1289 = vrot.lane.b32.xlu0 %v3645_v38, %s3254_s7  ;;  %v1069_v2 = vor.u32 %v1068_v3, %v1065_v28  ;;  %v3674_v41 = vor.u32 %v1841_v10, %v1838_v48  ;;  %v1848_v29 = vshll.u32 %v2747_v13, 16  ;;  %v944_v23 = vsel %vm934_vm1, %v3657_v45, 0  ;;  %v1259_v48 = vld [vmem:[#allocation2 + $0x4c] sm:$0x1] }
 0x11d   : > { %639 = vst.msk [vmem:[#allocation2 + $0x48] sm:$0xf] %vm623_vm12, %v2826_v55  ;;  %v2824_v16 = vpack.c.bf16 %v556_v0, %v556_v0  ;;  %v720_v49 = vmul.f32 %v3134_v26, %v3483_v11  ;;  %v1061_v61 = vsel %vm862_vm7, %v3645_v38, %v1060_v4  ;;  %v1847_v46 = vrot.slane %v1845_v8, 4 }
 0x11e   : > { %v3136_v47 = vpop.eup %3135  ;;  %v1070_v52 = vsel %vm862_vm7, %v1060_v4, %v1069_v2  ;;  %v1850_v13 = vrot.slane %v1848_v29, 5  ;;  %v945_v18 = vsel %vm933_vm4, %v3661_v12, 0  ;;  %v946_v37 = vsel %vm934_vm1, %v3663_v59, 0 }
 0x11f   : > { %637 = vst.msk [vmem:[#allocation2 + $0x40] sm:$0xf] %vm623_vm12, %v2824_v16  ;;  %v721_v11 = vmul.f32 %v3136_v47, %v3496_v39  ;;  %1113 = vrot.lane.b32.xlu1 %v1070_v52, %s3254_s7  ;;  %v2704_v56 = vcombine.low %v944_v23, %v945_v18  ;;  %v947_v57 = vsel %vm933_vm4, %v3679_v51, 0  ;;  %v2696_v63 = vcombine.low %v3657_v45, %v3661_v12  ;;  %v3712_v4 = vld [vmem:[#allocation2 + $0x44] sm:$0xf] }
 0x120   : > { %1111 = vrot.lane.b32.xlu0 %v1061_v61, %s3254_s7  ;;  %v3703_v21 = vor.u32 %v1850_v13, %v1847_v46  ;;  %v2705_v60 = vcombine.low %v946_v37, %v947_v57  ;;  %v2697_v39 = vcombine.low %v3663_v59, %v3679_v51  ;;  %4508 = vst [vmem:[#allocation5_spill] sm:$0xff] %v3712_v4  ;;  %v3717_v16 = vld [vmem:[#allocation2 + $0x38] sm:$0xf]  ;;  %v3722_v52 = vld [vmem:[#allocation2 + $0x34] sm:$0xf]  ;;  %v1261_v37 = vsel %vm934_vm1, %v3712_v4, 0 }
 0x121   : > { %v722_v28 = vpack.c.bf16 %v721_v11, %v720_v49  ;;  %v1176_v62 = vrot.slane %v2704_v56, 5  ;;  %v1072_v19 = vshrl.u32 %v2696_v63, 16  ;;  %v1075_v3 = vshll.u32 %v2696_v63, 16  ;;  %4509 = vst [vmem:[#allocation6_spill] sm:$0xff] %v3717_v16 }
 0x122   : > { %v1852_v10 = vsel %vm862_vm7, %v3674_v41, %v3703_v21  ;;  %v3710_v55 = vrot.slane %v2705_v60, 5  ;;  %v1081_v40 = vshrl.u32 %v2697_v39, 16  ;;  %v1084_v0 = vshll.u32 %v2697_v39, 16 }
 0x123   : > { %v727_v8 = vsel %vm726_vm8, %v722_v28, 0  ;;  %1902 = vrot.lane.b32.xlu1 %v1852_v10, %s3254_s7  ;;  %v1177_v26 = vsel %vm1168_vm5, %v3643_v31, %v1176_v62  ;;  %v1074_v29 = vrot.slane %v1072_v19, 4  ;;  %v1077_v23 = vrot.slane %v1075_v3, 5  ;;  %v3730_v11 = vld [vmem:[#allocation2 + $0x3c] sm:$0xf] }
 0x124   : > { %v2672_v49 = vcombine.low %v727_v8, %v727_v8  ;;  %v2673_v61 = vcombine.high %v727_v8, %v727_v8  ;;  %1194 = vrot.lane.b32.xlu0 %v1177_v26, %s3253_s18  ;;  %v1083_v46 = vrot.slane %v1081_v40, 4  ;;  %v3720_v47 = vld [vmem:[#allocation2 + $0x48] sm:$0xf]  ;;  %v1086_v18 = vrot.slane %v1084_v0, 5  ;;  %4510 = vst [vmem:[#allocation7_spill] sm:$0xff] %v3730_v11 }
 0x125   : > { %v1078_v13 = vor.u32 %v1077_v23, %v1074_v29  ;;  %v1262_v31 = vsel %vm933_vm4, %v3720_v47, 0  ;;  %v1179_v56 = vsel %vm1168_vm5, %v1176_v62, %v3710_v55  ;;  %v1263_v57 = vsel %vm3667_vm6, %v1259_v48, 0  ;;  %v1726_v29 = vld [vmem:[#allocation2 + $0x54] sm:$0x1] }
 0x126   : > { %735 = vst.msk [vmem:[#allocation2 + $0x4] sm:$0xf] %vm623_vm12, %v2672_v49  ;;  %736 = vst.msk [vmem:[#allocation2 + $0x8] sm:$0xf] %vm623_vm12, %v2673_v61  ;;  %v2714_v63 = vcombine.low %v1261_v37, %v1262_v31  ;;  %v949_v60 = vsel %vm933_vm4, %v3717_v16, 0  ;;  %v1087_v19 = vor.u32 %v1086_v18, %v1083_v46  ;;  %v948_v3 = vsel %vm934_vm1, %v3722_v52, 0 }
 0x127   : > { %v3741_v39 = vld [vmem:[#allocation2 + $0x40] sm:$0xf]  ;;  %1196 = vrot.lane.b32.xlu1 %v1179_v56, %s3253_s18  ;;  %v1079_v28 = vsel %vm862_vm7, %v1069_v2, %v1078_v13  ;;  %v2715_v62 = vcombine.low %v1263_v57, %v1263_v57  ;;  %v950_v48 = vsel %vm934_vm1, %v3730_v11, 0  ;;  %v2698_v40 = vcombine.low %v3722_v52, %v3717_v16 }
 0x128   : > { %4511 = vst [vmem:[#allocation8_spill] sm:$0xff] %v3741_v39  ;;  %1115 = vrot.lane.b32.xlu0 %v1079_v28, %s3254_s7  ;;  %v951_v10 = vsel %vm933_vm4, %v3741_v39, 0  ;;  %v1088_v2 = vsel %vm862_vm7, %v1078_v13, %v1087_v19  ;;  %v3758_v0 = vrot.slane %v2714_v63, 5  ;;  %v2706_v8 = vcombine.low %v948_v3, %v949_v60 }
 0x129   : > { %v2707_v26 = vcombine.low %v950_v48, %v951_v10  ;;  %v1090_v23 = vshrl.u32 %v2698_v40, 16  ;;  %v1093_v49 = vshll.u32 %v2698_v40, 16  ;;  %v2712_v61 = vcombine.low %v3712_v4, %v3720_v47 }
 0x12a   : > { %v2699_v46 = vcombine.low %v3730_v11, %v3741_v39  ;;  %v1843_v18 = vsel %vm862_vm7, %v3633_v17, %v3674_v41  ;;  %v1310_v37 = vrot.slane %v2715_v62, 5  ;;  %v1743_v57 = vsel %vm3667_vm6, %v1726_v29, 0  ;;  %v3799_v29 = vld [vmem:[#allocation2 + $0x38] sm:$0xf] }
 0x12b   : > { %1117 = vrot.lane.b32.xlu1 %v1088_v2, %s3254_s7  ;;  %v3768_v13 = vrot.slane %v2707_v26, 5  ;;  %v1281_v31 = vshrl.u32 %v2712_v61, 16  ;;  %v1284_v56 = vshll.u32 %v2712_v61, 16  ;;  %v1180_v60 = vrot.slane %v2706_v8, 5  ;;  %v3797_v26 = vld [vmem:[#allocation2 + $0x30] sm:$0xf] }
 0x12c   : > { %1900 = vrot.lane.b32.xlu0 %v1843_v18, %s3254_s7  ;;  %v1092_v28 = vrot.slane %v1090_v23, 4  ;;  %v1095_v3 = vrot.slane %v1093_v49, 5  ;;  %v1099_v48 = vshrl.u32 %v2699_v46, 16  ;;  %v1311_v10 = vsel %vm1168_vm5, %v3758_v0, %v1310_v37  ;;  %v3813_v37 = vld [vmem:[#allocation2 + $0x2c] sm:$0xf] }
 0x12d   : > { %4512 = vst [vmem:[#allocation9_spill] sm:$0xff] %v3768_v13  ;;  %v3773_v63 = vld [vmem:[#allocation2 + $0x4] sm:$0xf]  ;;  %v1102_v17 = vshll.u32 %v2699_v46, 16  ;;  %v3777_v41 = vld [vmem:[#allocation2 + $0x8] sm:$0xf]  ;;  %v1181_v40 = vsel %vm1168_vm5, %v3710_v55, %v1180_v60  ;;  %v1183_v2 = vsel %vm1168_vm5, %v1180_v60, %v3768_v13  ;;  %v2761_v24 = vcombine.low %v1743_v57, %v1743_v57 }
 0x12e   : > { %4513 = vst [vmem:[#allocation10_spill] sm:$0xff] %v3773_v63  ;;  %4514 = vst [vmem:[#allocation11_spill] sm:$0xff] %v3777_v41  ;;  %v1729_v8 = vsel %vm934_vm1, %v3631_v15, 0  ;;  %v936_v32 = vsel %vm932_vm0, %v3773_v63, 0  ;;  %v1283_v35 = vrot.slane %v1281_v31, 4  ;;  %v1286_v55 = vrot.slane %v1284_v56, 5 }
 0x12f   : > { %1318 = vrot.lane.b32.xlu1 %v1311_v10, %s3253_s18  ;;  %v1730_v23 = vsel %vm933_vm4, %v3624_v5, 0  ;;  %v1096_v49 = vor.u32 %v1095_v3, %v1092_v28  ;;  %v1101_v61 = vrot.slane %v1099_v48, 4  ;;  %v1732_v46 = vsel %vm933_vm4, %v3626_v7, 0  ;;  %v841_v7 = vld [vmem:[#allocation2] sm:$0x8] }
 0x130   : > { %1198 = vrot.lane.b32.xlu0 %v1181_v40, %s3253_s18  ;;  %v2692_v18 = vcombine.low %v3773_v63, %v3777_v41  ;;  %v1104_v57 = vrot.slane %v1102_v17, 5  ;;  %v937_v31 = vsel %vm933_vm4, %v3777_v41, 0  ;;  %v2748_v56 = vcombine.low %v3813_v37, %v3797_v26 }
 0x131   : > { %v2749_v60 = vcombine.low %v3815_v50, %v3799_v29  ;;  %v1097_v28 = vsel %vm862_vm7, %v1087_v19, %v1096_v49  ;;  %v1731_v3 = vsel %vm934_vm1, %v3639_v58, 0  ;;  %v2754_v48 = vcombine.low %v1729_v8, %v1730_v23 }
 0x132   : > { %v1037_v10 = vshrl.u32 %v2692_v18, 16  ;;  %v1287_v17 = vor.u32 %v1286_v55, %v1283_v35  ;;  %v2755_v40 = vcombine.low %v1731_v3, %v1732_v46  ;;  %v1040_v36 = vshll.u32 %v2692_v18, 16  ;;  %v3838_v55 = vld [vmem:[#allocation2 + $0x40] sm:$0xf]  ;;  %v3851_v46 = vld [vmem:[#allocation2 + $0x3c] sm:$0xf] }
 0x133   : > { %1200 = vrot.lane.b32.xlu1 %v1183_v2, %s3253_s18  ;;  %v1854_v25 = vshrl.u32 %v2748_v56, 16  ;;  %v2700_v63 = vcombine.low %v936_v32, %v937_v31  ;;  %v1857_v4 = vshll.u32 %v2748_v56, 16  ;;  %v1863_v39 = vshrl.u32 %v2749_v60, 16  ;;  %v3880_v3 = vld [vmem:[#allocation2 + $0x44] sm:$0xf] }
 0x134   : > { %1119 = vrot.lane.b32.xlu0 %v1097_v28, %s3254_s7  ;;  %v1039_v41 = vrot.slane %v1037_v10, 4  ;;  %v3830_v2 = vor.u32 %v1104_v57, %v1101_v61  ;;  %v1042_v19 = vrot.slane %v1040_v36, 5  ;;  %v1866_v11 = vshll.u32 %v2749_v60, 16  ;;  %v3855_v60 = vld [vmem:[#allocation2 + $0x48] sm:$0xf] }
 0x135   : > { %v3832_v16 = vrot.slane %v2761_v24, 5  ;;  %v1309_v8 = vsel %vm1168_vm5, %v3768_v13, %v3758_v0  ;;  %v1960_v35 = vrot.slane %v2754_v48, 5  ;;  %v3845_v23 = vsel %vm885_vm10, %v841_v7, 0 }
 0x136   : > { %4517 = vst [vmem:[#allocation12_spill] sm:$0xff] %v3830_v2  ;;  %v1962_v36 = vrot.slane %v2755_v40, 5  ;;  %v1856_v24 = vrot.slane %v1854_v25, 4  ;;  %v1859_v61 = vrot.slane %v1857_v4, 5  ;;  %v1734_v0 = vsel %vm933_vm4, %v3797_v26, 0 }
 0x137   : > { %1293 = vrot.lane.b32.xlu1 %v1287_v17, %s3254_s7  ;;  %v1169_v18 = vrot.slane %v2700_v63, 5  ;;  %v3853_v57 = vor.u32 %v1042_v19, %v1039_v41  ;;  %v1865_v31 = vrot.slane %v1863_v39, 4  ;;  %v1868_v56 = vrot.slane %v1866_v11, 5 }
 0x138   : > { %1316 = vrot.lane.b32.xlu0 %v1309_v8, %s3253_s18  ;;  %v1106_v7 = vsel %vm862_vm7, %v1096_v49, %v3830_v2  ;;  %v1733_v25 = vsel %vm934_vm1, %v3813_v37, 0  ;;  %v1736_v4 = vsel %vm933_vm4, %v3799_v29, 0  ;;  %v2750_v63 = vcombine.low %v3851_v46, %v3838_v55 }
 0x139   : > { %v4518_v11 = vsel %vm3387_vm9, %v3391_v34, %v3381_v30  ;;  %v1963_v41 = vsel %vm1168_vm5, %v1960_v35, %v1962_v36  ;;  %v1288_v49 = vsel %vm862_vm7, %v3830_v2, %v1287_v17  ;;  %v2756_v28 = vcombine.low %v1733_v25, %v1734_v0  ;;  %v1252_v2 = vld [vmem:[#allocation2 + $0x8] sm:$0x8] }
 0x13a   : > { %vm3872_vm13 = vcmp.ne.s16.totalorder %v4518_v11, 0  ;;  %v1961_v48 = vsel %vm1168_vm5, %v3596_v27, %v1960_v35  ;;  %v1860_v10 = vor.u32 %v1859_v61, %v1856_v24  ;;  %v1735_v40 = vsel %vm934_vm1, %v3815_v50, 0 }
 0x13b   : > { %1121 = vrot.lane.b32.xlu1 %v1106_v7, %s3254_s7  ;;  %v2751_v17 = vcombine.low %v3880_v3, %v3855_v60  ;;  %v1171_v19 = vsel %vm1168_vm5, %v1169_v18, %v3609_v54  ;;  %v1052_v43 = vsel %vm862_vm7, %v3853_v57, %v3645_v38  ;;  %v3900_v8 = vor.u32 %v1868_v56, %v1865_v31  ;;  %v3902_v7 = vld [vmem:[#allocation2 + $0x4c] sm:$0xf]  ;;  %v3910_v54 = vld [vmem:[#allocation2 + $0x50] sm:$0xf] }
 0x13c   : > { %1980 = vrot.lane.b32.xlu0 %v1963_v41, %s3253_s18  ;;  %v2757_v0 = vcombine.low %v1735_v40, %v1736_v4  ;;  %v1872_v27 = vshrl.u32 %v2750_v63, 16  ;;  %v1875_v35 = vshll.u32 %v2750_v63, 16  ;;  %v1737_v24 = vsel %vm934_vm1, %v3851_v46, 0  ;;  %v1692_v40 = vld [vmem:[#allocation2 + $0x10] sm:$0x8] }
 0x13d   : > { %v1738_v61 = vsel %vm933_vm4, %v3838_v55, 0  ;;  %v1964_v38 = vrot.slane %v2756_v28, 5  ;;  %v1739_v56 = vsel %vm934_vm1, %v3880_v3, 0  ;;  %v1740_v25 = vsel %vm933_vm4, %v3855_v60, 0 }
 0x13e   : > { %v2758_v31 = vcombine.low %v1737_v24, %v1738_v61  ;;  %v1861_v4 = vsel %vm862_vm7, %v3703_v21, %v1860_v10  ;;  %v1881_v63 = vshrl.u32 %v2751_v17, 16  ;;  %v1884_v11 = vshll.u32 %v2751_v17, 16 }
 0x13f   : > { %1978 = vrot.lane.b32.xlu1 %v1961_v48, %s3253_s18  ;;  %v2759_v41 = vcombine.low %v1739_v56, %v1740_v25  ;;  %v1966_v48 = vrot.slane %v2757_v0, 5  ;;  %v1741_v24 = vsel %vm934_vm1, %v3902_v7, 0  ;;  %v1742_v61 = vsel %vm933_vm4, %v3910_v54, 0 }
 0x140   : > { %1291 = vrot.lane.b32.xlu0 %v1288_v49, %s3254_s7  ;;  %v1968_v28 = vrot.slane %v2758_v31, 5  ;;  %v1870_v49 = vsel %vm862_vm7, %v1860_v10, %v3900_v8  ;;  %v1874_v32 = vrot.slane %v1872_v27, 4  ;;  %v1877_v13 = vrot.slane %v1875_v35, 5  ;;  %v906_v27 = vld [vmem:[#allocation2 + $0x44] sm:$0x1] }
 0x141   : > { %v1970_v21 = vrot.slane %v2759_v41, 5  ;;  %v1965_v17 = vsel %vm1168_vm5, %v1962_v36, %v1964_v38  ;;  %v2760_v6 = vcombine.low %v1741_v24, %v1742_v61  ;;  %v1709_v31 = vsel %vm885_vm10, %v1692_v40, 0  ;;  %v3046_v35 = vld [vmem:[%s4484_s3 + $0x8] sm:$0x3f]  }
 0x142   : > { %v3933_v0 = vsel %vm1168_vm5, %v1966_v48, %v1968_v28  ;;  %v1883_v14 = vrot.slane %v1881_v63, 4  ;;  %v1886_v56 = vrot.slane %v1884_v11, 5  ;;  %vm888_vm9 = vcmp.ne.s16.totalorder %v3391_v34, 0  ;;  %2970 = vmatprep.subr.msk.bf16.mxu1 %vm1442_vm14, %v3046_v35  ;;  %v4530_v34 = vld [vmem:[#allocation9_spill] sm:$0xff] }
 0x143   : > { %1188 = vrot.lane.b32.xlu1 %v1171_v19, %s3253_s18  ;;  %v3939_v10 = vsel %vm1168_vm5, %v1968_v28, %v1970_v21  ;;  %v4521_v19 = vsel %vm3785_vm11, %v3542_v53, 0  ;;  %v1972_v25 = vrot.slane %v2760_v6, 5  ;;  %v3954_v63 = vsel %vm885_vm10, %v1252_v2, 0  ;;  %v3048_v53 = vld [vmem:[%s4484_s3] sm:$0x3f]  }
 0x144   : > { %1186 = vrot.lane.b32.xlu0 %v1169_v18, %s3253_s18  ;;  %v3945_v36 = vcombine.low %v1709_v31, %v4521_v19  ;;  %v1967_v18 = vsel %vm1168_vm5, %v1964_v38, %v1966_v48  ;;  %v895_v11 = vsel %vm3872_vm13, %v3586_v9, 0  ;;  %v1878_v41 = vor.u32 %v1877_v13, %v1874_v32  ;;  %2971 = vmatprep.subr.msk.bf16.mxu0 %vm1442_vm14, %v3048_v53  ;;  %v4524_v19 = vld [vmem:[#allocation8_spill] sm:$0xff] }
 0x145   : > { %v2709_v40 = vcombine.low %v3954_v63, %v3885_v33  ;;  %v896_v38 = vsel %vm3785_vm11, %v3603_v44, 0  ;;  %v893_v30 = vsel %vm3872_vm13, %v3581_v1, 0  ;;  %v3973_v9 = vsel %vm3667_vm6, %v906_v27, 0  ;;  %v3047_v44 = vld [vmem:[%s4484_s3 + $0x10] sm:$0x3f]   ;;  %v4523_v27 = vld [vmem:[#allocation7_spill] sm:$0xff] }
 0x146   : > { %v3976_v2 = vsel %vm1168_vm5, %v1970_v21, %v1972_v25  ;;  %v3980_v13 = vsel %vm1168_vm5, %v1972_v25, %v3832_v16  ;;  %v3982_v32 = vcombine.low %v895_v11, %v896_v38  ;;  %v1713_v20 = vsel %vm3872_vm13, %v3624_v5, 0  ;;  %v4525_v25 = vld [vmem:[#allocation5_spill] sm:$0xff]  ;;  %v4526_v38 = vld [vmem:[#allocation11_spill] sm:$0xff] }
 0x147   : > { %1109 = vrot.lane.b32.xlu1 %v1052_v43, %s3254_s7  ;;  %v3989_v43 = vor.u32 %v1886_v56, %v1883_v14  ;;  %v1714_v16 = vsel %vm3785_vm11, %v3639_v58, 0  ;;  %v3999_v48 = vcombine.low %v3902_v7, %v3910_v54  ;;  %v897_v24 = vsel %vm3872_vm13, %v3616_v22, 0  ;;  %v4522_v14 = vld [vmem:[#allocation6_spill] sm:$0xff] }
 0x148   : > { %1107 = vrot.lane.b32.xlu0 %v3853_v57, %s3254_s7  ;;  %v4001_v28 = vcombine.low %v1713_v20, %v1714_v16  ;;  %v1444_v57 = vsel %vm1442_vm14, %v3046_v35, 0  ;;  %v1879_v5 = vsel %vm862_vm7, %v3900_v8, %v1878_v41  ;;  %v898_v61 = vsel %vm3785_vm11, %v3657_v45, 0  ;;  %v4527_v20 = vld [vmem:[#allocation10_spill] sm:$0xff] }
 0x149   : > { %v1888_v58 = vsel %vm862_vm7, %v1878_v41, %v3989_v43  ;;  %2916 = vmatpush3.bf16.msra.mxu1 %v1444_v57  ;;  %v899_v21 = vsel %vm3872_vm13, %v3661_v12, 0  ;;  %v4020_v22 = vcombine.low %v897_v24, %v898_v61  ;;  %v900_v8 = vsel %vm3785_vm11, %v3663_v59, 0  ;;  %v4528_v61 = vld [vmem:[#allocation4_spill] sm:$0xff] }
 0x14a   : > { %v1711_v6 = vsel %vm3872_vm13, %v3566_v42, 0  ;;  %v1712_v45 = vsel %vm3785_vm11, %v3631_v15, 0  ;;  %2972 = vmatprep.subr.msk.bf16.mxu1 %vm1442_vm14, %v3047_v44  ;;  %v4033_v12 = vcombine.low %v899_v21, %v900_v8  ;;  %v901_v59 = vsel %vm3872_vm13, %v3679_v51, 0 }
 0x14b   : > { %1904 = vrot.lane.b32.xlu1 %v1861_v4, %s3254_s7  ;;  %v4035_v4 = vcombine.low %v1711_v6, %v1712_v45  ;;  %v902_v42 = vsel %vm3785_vm11, %v3722_v52, 0  ;;  %v4046_v15 = vsel %vm1442_vm14, %v3047_v44, 0  ;;  %v903_v56 = vsel %vm3872_vm13, %v4522_v14, 0 }
 0x14c   : > { %1906 = vrot.lane.b32.xlu0 %v1870_v49, %s3254_s7  ;;  %v4043_v31 = vcombine.low %v901_v59, %v902_v42  ;;  %v4051_v49 = vsel %vm888_vm9, %v3720_v47, 0  ;;  %v1890_v51 = vshrl.u32 %v3999_v48, 16  ;;  %v904_v52 = vsel %vm3785_vm11, %v4523_v27, 0 }
 0x14d   : > { %v1256_v35 = vsel %vm3872_vm13, %v4524_v19, 0  ;;  %v1257_v11 = vsel %vm3785_vm11, %v4525_v25, 0  ;;  %v4067_v47 = vcombine.low %v903_v56, %v904_v52  ;;  %v891_v44 = vsel %vm3872_vm13, %v4526_v38, 0 }
 0x14e   : > { %v4069_v41 = vcombine.low %v1256_v35, %v1257_v11  ;;  %v890_v16 = vsel %vm3785_vm11, %v4527_v20, 0  ;;  %v4079_v57 = vcombine.low %v891_v44, %v3885_v33  ;;  %v1715_v21 = vsel %vm3872_vm13, %v4528_v61, 0  ;;  %v4531_v11 = vld [vmem:[#allocation3_spill] sm:$0xff] }
 0x14f   : > { %1982 = vrot.lane.b32.xlu1 %v1965_v17, %s3253_s18  ;;  %v4082_v24 = vcombine.low %v3845_v23, %v890_v16  ;;  %v1593_v17 = vsel %vm1442_vm14, %v3048_v53, 0  ;;  %v1716_v8 = vsel %vm3785_vm11, %v3813_v37, 0  ;;  %v1718_v23 = vsel %vm3785_vm11, %v3815_v50, 0 }
 0x150   : > { %1984 = vrot.lane.b32.xlu0 %v1967_v18, %s3253_s18  ;;  %2934 = vmatpush3.bf16.msra.mxu0 %v1593_v17  ;;  %v1717_v18 = vsel %vm3872_vm13, %v3797_v26, 0  ;;  %v1719_v53 = vsel %vm3872_vm13, %v3799_v29, 0  ;;  %v4100_v6 = vcombine.low %v1715_v21, %v1716_v8  ;;  %v1720_v37 = vsel %vm3785_vm11, %v3851_v46, 0 }
 0x151   : > { %v4102_v45 = vcombine.low %v1717_v18, %v1718_v23  ;;  %v1721_v26 = vsel %vm3872_vm13, %v3838_v55, 0  ;;  %v4111_v59 = vcombine.low %v1719_v53, %v1720_v37  ;;  %v1722_v29 = vsel %vm3785_vm11, %v3880_v3, 0 }
 0x152   : > { %v4119_v50 = vsel %vm888_vm9, %v4524_v19, 0  ;;  %v1723_v46 = vsel %vm3872_vm13, %v3855_v60, 0  ;;  %v1893_v55 = vshll.u32 %v3999_v48, 16  ;;  %v1724_v42 = vsel %vm3785_vm11, %v3902_v7, 0  ;;  %v4529_v7 = vld [vmem:[#allocation12_spill] sm:$0xff] }
 0x153   : > { %1908 = vrot.lane.b32.xlu1 %v1879_v5, %s3254_s7  ;;  %v4126_v5 = vcombine.low %v1721_v26, %v1722_v29  ;;  %v4134_v3 = vsel %vm888_vm9, %v3910_v54, 0  ;;  %v2708_v14 = vcombine.low %v3973_v9, %v3973_v9  ;;  %v4138_v56 = vcombine.low %v1723_v46, %v1724_v42 }
 0x154   : > { %1910 = vrot.lane.b32.xlu0 %v1888_v58, %s3254_s7  ;;  %v1892_v60 = vrot.slane %v1890_v51, 4  ;;  %v1895_v48 = vrot.slane %v1893_v55, 5  ;;  %vm1417_vm0 = vcmask 97280  }
 0x155   : > { %v1184_v58 = vrot.slane %v2708_v14, 5 }
 0x156   : > { %v1896_v9 = vor.u32 %v1895_v48, %v1892_v60 }
 0x157   : > { %1986 = vrot.lane.b32.xlu1 %v3933_v0, %s3253_s18  ;;  %v1185_v54 = vsel %vm1168_vm5, %v4530_v34, %v1184_v58 }
 0x158   : > { %1988 = vrot.lane.b32.xlu0 %v3939_v10, %s3253_s18  ;;  %v1897_v27 = vsel %vm862_vm7, %v3989_v43, %v1896_v9  ;;  %vm1231_vm7 = vcmask 64512  }
 0x15b   : > { %1123 = vrot.lane.b32.xlu1 %v4529_v7, %s3254_s7 }
 0x15c   : > { %1202 = vrot.lane.b32.xlu0 %v1185_v54, %s3253_s18 }
 0x15f   : > { %1912 = vrot.lane.b32.xlu1 %v1897_v27, %s3254_s7 }
 0x160   : > { %1914 = vrot.lane.b32.xlu0 %v1896_v9, %s3254_s7 }
 0x163   : > { %1990 = vrot.lane.b32.xlu1 %v3976_v2, %s3253_s18 }
 0x164   : > { %1992 = vrot.lane.b32.xlu0 %v3980_v13, %s3253_s18  ;;  %v894_v13 = vsel %vm3785_vm11, %v4531_v11, 0 }
 0x165   : > { %v2685_v16 = vcombine.low %v893_v30, %v894_v13 }
 0x181   : > { %v4157_v0 = vpop.permute.xlu0 %1976 }
 0x183   : > { %v1313_v10 = vpop.permute.xlu1 %1312 }
 0x186   : > { %v1315_v51 = vpop.permute.xlu0 %1314 }
 0x189   : > { %v4159_v52 = vpop.permute.xlu1 %1898 }
 0x18a   : > { %v1191_v19 = vpop.permute.xlu0 %1190 }
 0x18d   : > { %v1193_v35 = vpop.permute.xlu1 %1192 }
 0x18e   : > { %v1290_v25 = vpop.permute.xlu0 %1289 }
 0x18f   : > { %v1322_v43 = vsel %vm321_vm2, %v2709_v40, %v1290_v25 }
 0x190   : > { %v1330_v2 = vsel %vm1231_vm7, %v1322_v43, %v1313_v10 }
 0x191   : > { %v1341_v38 = vshrl.u32 %v1330_v2, 16  ;;  %v1344_v44 = vshll.u32 %v1330_v2, 16  ;;  %v1114_v20 = vpop.permute.xlu1 %1113 }
 0x192   : > { %v1215_v17 = vsel %vm321_vm2, %v3982_v32, %v1114_v20  ;;  %v1112_v33 = vpop.permute.xlu0 %1111 }
 0x193   : > { %v1343_v63 = vrot.slane %v1341_v38, 3  ;;  %v1239_v40 = vsel %vm1231_vm7, %v1215_v17, %v1193_v35  ;;  %v1212_v61 = vsel %vm321_vm2, %v2685_v16, %v1112_v33  ;;  %v1346_v23 = vrot.slane %v1344_v44, 4 }
 0x194   : > { %v1356_v21 = vshrl.u32 %v1239_v40, 16  ;;  %v1359_v62 = vshll.u32 %v1239_v40, 16  ;;  %v1237_v8 = vsel %vm1231_vm7, %v1212_v61, %v1191_v19  ;;  %v1332_v18 = vsel %vm1231_vm7, %v1212_v61, %v1315_v51 }
 0x195   : > { %v1348_v39 = vshrl.u32 %v1332_v18, 16  ;;  %v1351_v53 = vshll.u32 %v1332_v18, 16  ;;  %v1558_v1 = vshrl.u32 %v1237_v8, 16  ;;  %v4179_v30 = vpop.permute.xlu1 %1902  ;;  %v1561_v26 = vshll.u32 %v1237_v8, 16 }
 0x196   : > { %v1358_v37 = vrot.slane %v1356_v21, 3  ;;  %v1361_v32 = vrot.slane %v1359_v62, 4  ;;  %v1195_v29 = vpop.permute.xlu0 %1194  ;;  %v1347_v48 = vor.u32 %v1346_v23, %v1343_v63 }
 0x197   : > { %v1350_v46 = vrot.slane %v1348_v39, 3  ;;  %v1353_v55 = vrot.slane %v1351_v53, 4  ;;  %v1560_v42 = vrot.slane %v1558_v1, 3  ;;  %v1563_v60 = vrot.slane %v1561_v26, 4 }
 0x198   : > { %v1362_v14 = vor.u32 %v1361_v32, %v1358_v37 }
 0x199   : > { %v1354_v58 = vor.u32 %v1353_v55, %v1350_v46  ;;  %v1197_v7 = vpop.permute.xlu1 %1196  ;;  %v4181_v34 = vor.u32 %v1563_v60, %v1560_v42 }
 0x19a   : > { %v1116_v54 = vpop.permute.xlu0 %1115 }
 0x19b   : > { %v1218_v9 = vsel %vm321_vm2, %v4020_v22, %v1116_v54  ;;  %v1355_v27 = vsel %vm1340_vm15, %v1347_v48, %v1354_v58  ;;  %v1363_v10 = vsel %vm1340_vm15, %v1354_v58, %v1362_v14  ;;  %v4191_v19 = vsel %vm1340_vm15, %v4181_v34, %v1362_v14 }
 0x19c   : > { %v1241_v51 = vsel %vm1231_vm7, %v1218_v9, %v1195_v29  ;;  %2917 = vmatprep.mubr.msk.bf16.mxu1 %vm1417_vm0, %v1355_v27 }
 0x19d   : > { %v1364_v35 = vshrl.u32 %v1241_v51, 16  ;;  %v1367_v25 = vshll.u32 %v1241_v51, 16  ;;  %v1118_v43 = vpop.permute.xlu1 %1117  ;;  %2918 = vmatmul.mubr.msk.bf16.vlgmr.msra.gmra.mxu1 %vm1417_vm0, %v1363_v10 }
 0x19e   : > { %v1221_v22 = vsel %vm321_vm2, %v4033_v12, %v1118_v43  ;;  %v1901_v2 = vpop.permute.xlu0 %1900  ;;  %2952 = vmatpush3.bf16.msra.mxu1 %v4046_v15  ;;  %v1996_v12 = vsel %vm321_vm2, %v3945_v36, %v4159_v52  ;;  %v2711_v36 = vcombine.low %v4051_v49, %v4051_v49 }
 0x19f   : > { %v1366_v11 = vrot.slane %v1364_v35, 3  ;;  %v1369_v13 = vrot.slane %v1367_v25, 4  ;;  %v1243_v38 = vsel %vm1231_vm7, %v1221_v22, %v1197_v7  ;;  %v2022_v23 = vsel %vm1231_vm7, %v1996_v12, %v4157_v0 }
 0x1a0   : > { %v1372_v44 = vshrl.u32 %v1243_v38, 16  ;;  %v1375_v20 = vshll.u32 %v1243_v38, 16  ;;  %v2042_v32 = vshrl.u32 %v2022_v23, 16  ;;  %v2045_v46 = vshll.u32 %v2022_v23, 16 }
 0x1a1   : > { %v1370_v16 = vor.u32 %v1369_v13, %v1366_v11  ;;  %v1319_v17 = vpop.permute.xlu1 %1318  ;;  %v2002_v0 = vsel %vm321_vm2, %v4001_v28, %v4179_v30  ;;  %v1999_v28 = vsel %vm321_vm2, %v4035_v4, %v1901_v2 }
 0x1a2   : > { %v1374_v33 = vrot.slane %v1372_v44, 3  ;;  %v1377_v63 = vrot.slane %v1375_v20, 4  ;;  %v1199_v40 = vpop.permute.xlu0 %1198  ;;  %v2044_v48 = vrot.slane %v2042_v32, 3  ;;  %v2047_v9 = vrot.slane %v2045_v46, 4 }
 0x1a3   : > { %v4199_v61 = vsel %vm1340_vm15, %v1362_v14, %v1370_v16 }
 0x1a4   : > { %v1378_v21 = vor.u32 %v1377_v63, %v1374_v33  ;;  %2921 = vmatprep.mubr.msk.bf16.mxu1 %vm1417_vm0, %v4199_v61  ;;  %v2048_v12 = vor.u32 %v2047_v9, %v2044_v48 }
 0x1a5   : > { %v1201_v15 = vpop.permute.xlu1 %1200 }
 0x1a6   : > { %v1120_v62 = vpop.permute.xlu0 %1119  ;;  %v4207_v8 = vsel %vm1340_vm15, %v1370_v16, %v1378_v21 }
 0x1a7   : > { %v1224_v18 = vsel %vm321_vm2, %v4043_v31, %v1120_v62  ;;  %2922 = vmatmul.mubr.msk.bf16.gmra.mxu1 %vm1417_vm0, %v4207_v8 }
 0x1a8   : > { %v1245_v39 = vsel %vm1231_vm7, %v1224_v18, %v1199_v40 }
 0x1a9   : > { %v1380_v53 = vshrl.u32 %v1245_v39, 16  ;;  %v1383_v1 = vshll.u32 %v1245_v39, 16  ;;  %v1294_v52 = vpop.permute.xlu1 %1293 }
 0x1aa   : > { %v1317_v37 = vpop.permute.xlu0 %1316  ;;  %v1328_v31 = vsel %vm321_vm2, %v2711_v36, %v1294_v52 }
 0x1ab   : > { %v1382_v26 = vrot.slane %v1380_v53, 3  ;;  %v1385_v29 = vrot.slane %v1383_v1, 4  ;;  %v1336_v14 = vsel %vm1231_vm7, %v1328_v31, %v1319_v17 }
 0x1ac   : > { %v1407_v30 = vshll.u32 %v1336_v14, 16 }
 0x1ad   : > { %v1386_v55 = vor.u32 %v1385_v29, %v1382_v26  ;;  %v1122_v42 = vpop.permute.xlu1 %1121 }
 0x1ae   : > { %v1227_v60 = vsel %vm321_vm2, %v4067_v47, %v1122_v42  ;;  %v1981_v49 = vpop.permute.xlu0 %1980  ;;  %v1404_v47 = vshrl.u32 %v1336_v14, 16  ;;  %v1409_v39 = vrot.slane %v1407_v30, 4 }
 0x1af   : > { %v1247_v58 = vsel %vm1231_vm7, %v1227_v60, %v1201_v15  ;;  %v2026_v7 = vsel %vm1231_vm7, %v2002_v0, %v1981_v49  ;;  %v4228_v54 = vsel %vm1340_vm15, %v1378_v21, %v1386_v55 }
 0x1b0   : > { %v1388_v27 = vshrl.u32 %v1247_v58, 16  ;;  %v1391_v10 = vshll.u32 %v1247_v58, 16  ;;  %v2057_v51 = vshrl.u32 %v2026_v7, 16  ;;  %2925 = vmatprep.mubr.msk.bf16.mxu1 %vm1417_vm0, %v4228_v54  ;;  %v2060_v35 = vshll.u32 %v2026_v7, 16 }
 0x1b1   : > { %v1979_v25 = vpop.permute.xlu1 %1978  ;;  %v1406_v15 = vrot.slane %v1404_v47, 3 }
 0x1b2   : > { %v1390_v43 = vrot.slane %v1388_v27, 3  ;;  %v1393_v22 = vrot.slane %v1391_v10, 4  ;;  %v2059_v11 = vrot.slane %v2057_v51, 3  ;;  %v2024_v13 = vsel %vm1231_vm7, %v1999_v28, %v1979_v25  ;;  %v1292_v38 = vpop.permute.xlu0 %1291 }
 0x1b3   : > { %v2062_v44 = vrot.slane %v2060_v35, 4  ;;  %v2049_v20 = vshrl.u32 %v2024_v13, 16  ;;  %v2052_v16 = vshll.u32 %v2024_v13, 16  ;;  %v1325_v17 = vsel %vm321_vm2, %v4069_v41, %v1292_v38 }
 0x1b4   : > { %v4237_v33 = vor.u32 %v1393_v22, %v1390_v43  ;;  %v1334_v4 = vsel %vm1231_vm7, %v1325_v17, %v1317_v37  ;;  %v1410_v46 = vor.u32 %v1409_v39, %v1406_v15 }
 0x1b5   : > { %v2051_v2 = vrot.slane %v2049_v20, 3  ;;  %v2054_v63 = vrot.slane %v2052_v16, 4  ;;  %v1396_v40 = vshrl.u32 %v1334_v4, 16  ;;  %v1189_v21 = vpop.permute.xlu1 %1188  ;;  %v1399_v62 = vshll.u32 %v1334_v4, 16 }
 0x1b6   : > { %v1187_v18 = vpop.permute.xlu0 %1186  ;;  %v4242_v23 = vsel %vm1340_vm15, %v1386_v55, %v4237_v33  ;;  %v2063_v53 = vor.u32 %v2062_v44, %v2059_v11 }
 0x1b7   : > { %v2055_v1 = vor.u32 %v2054_v63, %v2051_v2  ;;  %v1398_v41 = vrot.slane %v1396_v40, 3  ;;  %2926 = vmatmul.mubr.msk.bf16.gmra.mxu1 %vm1417_vm0, %v4242_v23  ;;  %v1401_v36 = vrot.slane %v1399_v62, 4 }
 0x1b9   : > { %v1110_v52 = vpop.permute.xlu1 %1109  ;;  %v2056_v37 = vsel %vm1340_vm15, %v2048_v12, %v2055_v1  ;;  %v2064_v32 = vsel %vm1340_vm15, %v2055_v1, %v2063_v53  ;;  %v1402_v26 = vor.u32 %v1401_v36, %v1398_v41 }
 0x1ba   : > { %v1209_v29 = vsel %vm321_vm2, %v4079_v57, %v1110_v52  ;;  %v1108_v31 = vpop.permute.xlu0 %1107 }
 0x1bb   : > { %v1235_v55 = vsel %vm1231_vm7, %v1209_v29, %v1189_v21  ;;  %v1206_v42 = vsel %vm321_vm2, %v4082_v24, %v1108_v31  ;;  %v1403_v49 = vsel %vm1340_vm15, %v4237_v33, %v1402_v26  ;;  %v1411_v57 = vsel %vm1340_vm15, %v1402_v26, %v1410_v46 }
 0x1bc   : > { %v1550_v0 = vshrl.u32 %v1235_v55, 16  ;;  %v1553_v14 = vshll.u32 %v1235_v55, 16  ;;  %v1233_v60 = vsel %vm1231_vm7, %v1206_v42, %v1187_v18  ;;  %2929 = vmatprep.mubr.msk.bf16.mxu1 %vm1417_vm0, %v1403_v49 }
 0x1bd   : > { %v1543_v48 = vshrl.u32 %v1233_v60, 16  ;;  %v1546_v58 = vshll.u32 %v1233_v60, 16  ;;  %v1905_v7 = vpop.permute.xlu1 %1904 }
 0x1be   : > { %v1552_v9 = vrot.slane %v1550_v0, 3  ;;  %v1555_v27 = vrot.slane %v1553_v14, 4  ;;  %v1907_v10 = vpop.permute.xlu0 %1906  ;;  %v2005_v30 = vsel %vm321_vm2, %v4100_v6, %v1905_v7 }
 0x1bf   : > { %v1545_v51 = vrot.slane %v1543_v48, 3  ;;  %v1548_v28 = vrot.slane %v1546_v58, 4  ;;  %2930 = vmatmul.mubr.msk.bf16.gmra.mxu1 %vm1417_vm0, %v1411_v57  ;;  %v2008_v25 = vsel %vm321_vm2, %v4102_v45, %v1907_v10 }
 0x1c0   : > { %v1556_v24 = vor.u32 %v1555_v27, %v1552_v9  ;;  %2953 = vmatprep.mubr.msk.bf16.mxu1 %vm1417_vm0, %v2056_v37 }
 0x1c1   : > { %v1549_v47 = vor.u32 %v1548_v28, %v1545_v51  ;;  %v1983_v35 = vpop.permute.xlu1 %1982 }
 0x1c2   : > { %v2028_v43 = vsel %vm1231_vm7, %v2005_v30, %v1983_v35  ;;  %v1985_v22 = vpop.permute.xlu0 %1984  ;;  %v1565_v11 = vsel %vm1340_vm15, %v1556_v24, %v4181_v34 }
 0x1c3   : > { %v2065_v13 = vshrl.u32 %v2028_v43, 16  ;;  %v2068_v38 = vshll.u32 %v2028_v43, 16  ;;  %v2030_v44 = vsel %vm1231_vm7, %v2008_v25, %v1985_v22  ;;  %v1557_v20 = vsel %vm1340_vm15, %v1549_v47, %v1556_v24 }
 0x1c4   : > { %v2073_v16 = vshrl.u32 %v2030_v44, 16  ;;  %v2076_v17 = vshll.u32 %v2030_v44, 16  ;;  %2935 = vmatprep.mubr.msk.bf16.mxu0 %vm1417_vm0, %v1557_v20 }
 0x1c5   : > { %v2067_v6 = vrot.slane %v2065_v13, 3  ;;  %v2070_v4 = vrot.slane %v2068_v38, 4  ;;  %v1909_v2 = vpop.permute.xlu1 %1908  ;;  %2936 = vmatmul.mubr.msk.bf16.vlgmr.msra.gmra.mxu0 %vm1417_vm0, %v1565_v11 }
 0x1c6   : > { %v2075_v45 = vrot.slane %v2073_v16, 3  ;;  %v2078_v63 = vrot.slane %v2076_v17, 4  ;;  %v1911_v40 = vpop.permute.xlu0 %1910  ;;  %2939 = vmatprep.mubr.msk.bf16.mxu0 %vm1417_vm0, %v4191_v19  ;;  %v2011_v12 = vsel %vm321_vm2, %v4111_v59, %v1909_v2  ;;  %v2691_v59 = vcombine.low %v4119_v50, %v4119_v50 }
 0x1c7   : > { %v2071_v34 = vor.u32 %v2070_v4, %v2067_v6  ;;  %2954 = vmatmul.mubr.msk.bf16.vlgmr.msra.gmra.mxu1 %vm1417_vm0, %v2064_v32  ;;  %v2014_v18 = vsel %vm321_vm2, %v4126_v5, %v1911_v40 }
 0x1c8   : > { %v2079_v21 = vor.u32 %v2078_v63, %v2075_v45 }
 0x1c9   : > { %v1987_v15 = vpop.permute.xlu1 %1986  ;;  %v2072_v62 = vsel %vm1340_vm15, %v2063_v53, %v2071_v34 }
 0x1ca   : > { %v2032_v39 = vsel %vm1231_vm7, %v2011_v12, %v1987_v15  ;;  %v1989_v1 = vpop.permute.xlu0 %1988  ;;  %2957 = vmatprep.mubr.msk.bf16.mxu1 %vm1417_vm0, %v2072_v62  ;;  %v2080_v19 = vsel %vm1340_vm15, %v2071_v34, %v2079_v21 }
 0x1cb   : > { %v2081_v41 = vshrl.u32 %v2032_v39, 16  ;;  %v2084_v36 = vshll.u32 %v2032_v39, 16  ;;  %v2034_v52 = vsel %vm1231_vm7, %v2014_v18, %v1989_v1 }
 0x1cc   : > { %v2089_v37 = vshrl.u32 %v2034_v52, 16  ;;  %v2092_v32 = vshll.u32 %v2034_v52, 16 }
 0x1cd   : > { %v2083_v53 = vrot.slane %v2081_v41, 3  ;;  %v2086_v26 = vrot.slane %v2084_v36, 4  ;;  %v1124_v29 = vpop.permute.xlu1 %1123  ;;  %2940 = vmatmul.mubr.msk.bf16.gmra.mxu0 %vm1417_vm0, %v4199_v61  ;;  %v4331_v36 = vld [vmem:[%s4485_s4] ss:$0 sm:$0xff] }
 0x1ce   : > { %v2091_v5 = vrot.slane %v2089_v37, 3  ;;  %v2094_v31 = vrot.slane %v2092_v32, 4  ;;  %v1230_v46 = vsel %vm321_vm2, %v2691_v59, %v1124_v29  ;;  %v1203_v55 = vpop.permute.xlu0 %1202  ;;  %2943 = vmatprep.mubr.msk.bf16.mxu0 %vm1417_vm0, %v4207_v8  ;;  %v2744_v8 = vcombine.low %v4134_v3, %v4134_v3 }
 0x1cf   : > { %v2087_v42 = vor.u32 %v2086_v26, %v2083_v53  ;;  %v1249_v0 = vsel %vm1231_vm7, %v1230_v46, %v1203_v55  ;;  %2958 = vmatmul.mubr.msk.bf16.gmra.mxu1 %vm1417_vm0, %v2080_v19 }
 0x1d0   : > { %v2095_v50 = vor.u32 %v2094_v31, %v2091_v5  ;;  %v1567_v14 = vshrl.u32 %v1249_v0, 16  ;;  %v1570_v60 = vshll.u32 %v1249_v0, 16 }
 0x1d1   : > { %v1913_v49 = vpop.permute.xlu1 %1912  ;;  %v2088_v48 = vsel %vm1340_vm15, %v2079_v21, %v2087_v42 }
 0x1d2   : > { %v1569_v61 = vrot.slane %v1567_v14, 3  ;;  %v1572_v58 = vrot.slane %v1570_v60, 4  ;;  %v1915_v7 = vpop.permute.xlu0 %1914  ;;  %2961 = vmatprep.mubr.msk.bf16.mxu1 %vm1417_vm0, %v2088_v48  ;;  %v2096_v57 = vsel %vm1340_vm15, %v2087_v42, %v2095_v50  ;;  %v2017_v27 = vsel %vm321_vm2, %v4138_v56, %v1913_v49 }
 0x1d3   : > { %v2020_v51 = vsel %vm321_vm2, %v2744_v8, %v1915_v7 }
 0x1d4   : > { %v1573_v9 = vor.u32 %v1572_v58, %v1569_v61 }
 0x1d5   : > { %v1991_v10 = vpop.permute.xlu1 %1990  ;;  %2944 = vmatmul.mubr.msk.bf16.gmra.mxu0 %vm1417_vm0, %v4228_v54 }
 0x1d6   : > { %v2036_v28 = vsel %vm1231_vm7, %v2017_v27, %v1991_v10  ;;  %v1993_v24 = vpop.permute.xlu0 %1992  ;;  %2947 = vmatprep.mubr.msk.bf16.mxu0 %vm1417_vm0, %v4242_v23  ;;  %v1574_v47 = vsel %vm1340_vm15, %v4237_v33, %v1573_v9 }
 0x1d7   : > { %v2097_v30 = vshrl.u32 %v2036_v28, 16  ;;  %v2100_v3 = vshll.u32 %v2036_v28, 16  ;;  %v2038_v35 = vsel %vm1231_vm7, %v2020_v51, %v1993_v24  ;;  %2962 = vmatmul.mubr.msk.bf16.gmra.mxu1 %vm1417_vm0, %v2096_v57 }
 0x1d8   : > { %v2105_v56 = vshrl.u32 %v2038_v35, 16  ;;  %v2108_v25 = vshll.u32 %v2038_v35, 16 }
 0x1d9   : > { %v2099_v54 = vrot.slane %v2097_v30, 3  ;;  %v2102_v43 = vrot.slane %v2100_v3, 4 }
 0x1da   : > { %v2107_v22 = vrot.slane %v2105_v56, 3  ;;  %v2110_v11 = vrot.slane %v2108_v25, 4 }
 0x1db   : > { %v2103_v13 = vor.u32 %v2102_v43, %v2099_v54 }
 0x1dc   : > { %v2111_v38 = vor.u32 %v2110_v11, %v2107_v22 }
 0x1dd   : > { %2948 = vmatmul.mubr.msk.bf16.gmra.mxu0 %vm1417_vm0, %v1574_v47  ;;  %v2104_v23 = vsel %vm1340_vm15, %v2095_v50, %v2103_v13 }
 0x1de   : > { %2965 = vmatprep.mubr.msk.bf16.mxu1 %vm1417_vm0, %v2104_v23  ;;  %v2112_v33 = vsel %vm1340_vm15, %v2103_v13, %v2111_v38 }
 0x1df   : > { %2966 = vmatmul.mubr.msk.bf16.gmra.mxu1 %vm1417_vm0, %v2112_v33 }
 0x25d   : > { %v2919_v44 = vpop.f32.mrf.mxu1 }
 0x25f   : > { %v1480_v20 = vpop.f32.mrf.mxu1 }
 0x261   : > { %v2920_v16 = vpop.f32.mrf.mxu1 }
 0x263   : > { %v1483_v17 = vpop.f32.mrf.mxu1 }
 0x267   : > { %v2923_v6 = vpop.f32.mrf.mxu1 }
 0x269   : > { %v1496_v4 = vpop.f32.mrf.mxu1 }
 0x26b   : > { %v2924_v2 = vpop.f32.mrf.mxu1 }
 0x26d   : > { %v1499_v45 = vpop.f32.mrf.mxu1 }
 0x277   : > { %v2927_v63 = vpop.f32.mrf.mxu1 }
 0x279   : > { %v4314_v40 = vpop.f32.mrf.mxu1 }
 0x27b   : > { %v4316_v34 = vpop.f32.mrf.mxu1 }
 0x27d   : > { %v4318_v21 = vpop.f32.mrf.mxu1 }
 0x27f   : > { %v4320_v12 = vpop.f32.mrf.mxu1 }
 0x281   : > { %v4322_v15 = vpop.f32.mrf.mxu1 }
 0x283   : > { %v4324_v62 = vpop.f32.mrf.mxu1 }
 0x285   : > { %v4326_v18 = vpop.f32.mrf.mxu1  ;;  %v2937_v39 = vpop.f32.mrf.mxu0 }
 0x286   : > { %v1638_v1 = vadd.f32 %v2937_v39, %v2919_v44 }
 0x287   : > { %v1629_v19 = vpop.f32.mrf.mxu0  ;;  %v2955_v41 = vpop.f32.mrf.mxu1 }
 0x288   : > { %v1630_v52 = vadd.f32 %v1629_v19, %v1480_v20  ;;  %v2244_v37 = vadd.f32 %v2955_v41, %v1638_v1 }
 0x289   : > { %v2938_v32 = vpop.f32.mrf.mxu0  ;;  %v2179_v59 = vpop.f32.mrf.mxu1 }
 0x28a   : > { %v4334_v53 = vadd.f32 %v4331_v36, %v2244_v37  ;;  %v1641_v26 = vadd.f32 %v2938_v32, %v2920_v16  ;;  %v2242_v29 = vadd.f32 %v2179_v59, %v1630_v52 }
 0x28b   : > { %v1632_v5 = vpop.f32.mrf.mxu0  ;;  %v2956_v31 = vpop.f32.mrf.mxu1 }
 0x28c   : > { %v2776_v46 = vmul.f32 -1.442695, %v4334_v53  ;;  %v4338_v55 = vadd.f32 %v4331_v36, %v2242_v29  ;;  %v1633_v42 = vadd.f32 %v1632_v5, %v1483_v17  ;;  %v2245_v0 = vadd.f32 %v2956_v31, %v1641_v26 }
 0x28d   : > { %v2941_v50 = vpop.f32.mrf.mxu0  ;;  %v2182_v14 = vpop.f32.mrf.mxu1 }
 0x28e   : > { %3137 = vpow2.f32 %v2776_v46  ;;  %v2774_v60 = vmul.f32 -1.442695, %v4338_v55  ;;  %v4342_v49 = vadd.f32 %v4331_v36, %v2245_v0  ;;  %v1654_v48 = vadd.f32 %v2941_v50, %v2923_v6 }
 0x28f   : > { %v2243_v61 = vadd.f32 %v2182_v14, %v1633_v42  ;;  %v1645_v58 = vpop.f32.mrf.mxu0  ;;  %v2959_v7 = vpop.f32.mrf.mxu1 }
 0x290   : > { %3139 = vpow2.f32 %v2774_v60  ;;  %v2777_v57 = vmul.f32 -1.442695, %v4342_v49  ;;  %v1646_v9 = vadd.f32 %v1645_v58, %v1496_v4  ;;  %v2248_v8 = vadd.f32 %v2959_v7, %v1654_v48 }
 0x291   : > { %v4346_v27 = vadd.f32 %v4331_v36, %v2243_v61  ;;  %v2942_v10 = vpop.f32.mrf.mxu0  ;;  %v2195_v51 = vpop.f32.mrf.mxu1 }
 0x292   : > { %3141 = vpow2.f32 %v2777_v57  ;;  %v4349_v28 = vadd.f32 %v4331_v36, %v2248_v8  ;;  %v1657_v24 = vadd.f32 %v2942_v10, %v2924_v2  ;;  %v2246_v47 = vadd.f32 %v2195_v51, %v1646_v9 }
 0x293   : > { %v2775_v30 = vmul.f32 -1.442695, %v4346_v27  ;;  %v1648_v3 = vpop.f32.mrf.mxu0  ;;  %v2960_v35 = vpop.f32.mrf.mxu1 }
 0x294   : > { %v2780_v56 = vmul.f32 -1.442695, %v4349_v28  ;;  %v4354_v25 = vadd.f32 %v4331_v36, %v2246_v47  ;;  %v1649_v54 = vadd.f32 %v1648_v3, %v1499_v45  ;;  %v2249_v43 = vadd.f32 %v2960_v35, %v1657_v24 }
 0x295   : > { %3143 = vpow2.f32 %v2775_v30  ;;  %v2945_v22 = vpop.f32.mrf.mxu0  ;;  %v2198_v11 = vpop.f32.mrf.mxu1 }
 0x296   : > { %3145 = vpow2.f32 %v2780_v56  ;;  %v2778_v13 = vmul.f32 -1.442695, %v4354_v25  ;;  %v4358_v38 = vadd.f32 %v4331_v36, %v2249_v43  ;;  %v1670_v23 = vadd.f32 %v2945_v22, %v2927_v63 }
 0x297   : > { %v2247_v33 = vadd.f32 %v2198_v11, %v1649_v54  ;;  %v1661_v44 = vpop.f32.mrf.mxu0  ;;  %v2963_v20 = vpop.f32.mrf.mxu1 }
 0x298   : > { %3147 = vpow2.f32 %v2778_v13  ;;  %v2781_v16 = vmul.f32 -1.442695, %v4358_v38  ;;  %v1662_v17 = vadd.f32 %v1661_v44, %v4314_v40  ;;  %v2252_v6 = vadd.f32 %v2963_v20, %v1670_v23 }
 0x299   : > { %v4363_v4 = vadd.f32 %v4331_v36, %v2247_v33  ;;  %v2946_v2 = vpop.f32.mrf.mxu0  ;;  %v2211_v45 = vpop.f32.mrf.mxu1 }
 0x29a   : > { %3149 = vpow2.f32 %v2781_v16  ;;  %v4366_v39 = vadd.f32 %v4331_v36, %v2252_v6  ;;  %v1673_v63 = vadd.f32 %v2946_v2, %v4316_v34  ;;  %v2250_v1 = vadd.f32 %v2211_v45, %v1662_v17 }
 0x29b   : > { %v3138_v19 = vpop.eup %3137  ;;  %v2779_v41 = vmul.f32 -1.442695, %v4363_v4  ;;  %v1664_v52 = vpop.f32.mrf.mxu0 }
 0x29c   : > { %v2964_v37 = vpop.f32.mrf.mxu1  ;;  %v2331_v32 = vadd.f32 1.0, %v3138_v19  ;;  %v2784_v40 = vmul.f32 -1.442695, %v4366_v39  ;;  %v4372_v59 = vadd.f32 %v4331_v36, %v2250_v1  ;;  %v1665_v26 = vadd.f32 %v1664_v52, %v4318_v21 }
 0x29d   : > { %v3140_v29 = vpop.eup %3139  ;;  %3151 = vpow2.f32 %v2779_v41  ;;  %v2253_v5 = vadd.f32 %v2964_v37, %v1673_v63  ;;  %v2949_v31 = vpop.f32.mrf.mxu0  ;;  %v3201_v63 = vld [vmem:[%s3336_s12 + $0x8] sm:$0xff]  }
 0x29e   : > { %v2214_v46 = vpop.f32.mrf.mxu1  ;;  %3153 = vrcp.f32 %v2331_v32  ;;  %v2329_v34 = vadd.f32 1.0, %v3140_v29  ;;  %v2782_v42 = vmul.f32 -1.442695, %v4372_v59  ;;  %v1686_v0 = vadd.f32 %v2949_v31, %v4320_v12  ;;  %v3202_v32 = vld [vmem:[%s3336_s12] sm:$0xff]  }
 0x29f   : > { %v3142_v50 = vpop.eup %3141  ;;  %3155 = vpow2.f32 %v2784_v40  ;;  %v4378_v14 = vadd.f32 %v4331_v36, %v2253_v5  ;;  %v2251_v60 = vadd.f32 %v2214_v46, %v1665_v26  ;;  %v1677_v48 = vpop.f32.mrf.mxu0  ;;  %v2395_v1 = vunpack.c.l.bf16 %v3201_v63 }
 0x2a0   : > { %v2967_v61 = vpop.f32.mrf.mxu1  ;;  %3157 = vrcp.f32 %v2329_v34  ;;  %v2332_v21 = vadd.f32 1.0, %v3142_v50  ;;  %v1678_v58 = vadd.f32 %v1677_v48, %v4322_v15  ;;  %v2393_v40 = vunpack.c.l.bf16 %v3202_v32 }
 0x2a1   : > { %v2256_v7 = vadd.f32 %v2967_v61, %v1686_v0  ;;  %3159 = vpow2.f32 %v2782_v42  ;;  %v2785_v57 = vmul.f32 -1.442695, %v4378_v14  ;;  %v4383_v9 = vadd.f32 %v4331_v36, %v2251_v60  ;;  %v2950_v12 = vpop.f32.mrf.mxu0 }
 0x2a2   : > { %v2227_v8 = vpop.f32.mrf.mxu1  ;;  %v3144_v10 = vpop.eup %3143  ;;  %3161 = vrcp.f32 %v2332_v21  ;;  %v1689_v24 = vadd.f32 %v2950_v12, %v4324_v62  ;;  %v2396_v34 = vunpack.c.h.bf16 %v3201_v63  ;;  %v2394_v61 = vunpack.c.h.bf16 %v3202_v32 }
 0x2a3   : > { %v4386_v51 = vadd.f32 %v4331_v36, %v2256_v7  ;;  %v2254_v47 = vadd.f32 %v2227_v8, %v1678_v58  ;;  %v3146_v30 = vpop.eup %3145  ;;  %v2330_v3 = vadd.f32 1.0, %v3144_v10  ;;  %3163 = vpow2.f32 %v2785_v57  ;;  %v1680_v35 = vpop.f32.mrf.mxu0  ;;  %v3203_v57 = vld [vmem:[%s3336_s12 + $0x18] sm:$0xff]  }
 0x2a4   : > { %v2783_v15 = vmul.f32 -1.442695, %v4383_v9  ;;  %v2968_v56 = vpop.f32.mrf.mxu1  ;;  %v2335_v54 = vadd.f32 1.0, %v3146_v30  ;;  %v1681_v22 = vadd.f32 %v1680_v35, %v4326_v18  ;;  %v2399_v12 = vunpack.c.l.bf16 %v3203_v57  ;;  %v3204_v30 = vld [vmem:[%s3336_s12 + $0x10] sm:$0xff]  }
 0x2a5   : > { %v4391_v43 = vadd.f32 %v4331_v36, %v2254_v47  ;;  %v3148_v11 = vpop.eup %3147  ;;  %3165 = vrcp.f32 %v2330_v3  ;;  %v2788_v13 = vmul.f32 -1.442695, %v4386_v51  ;;  %v2257_v62 = vadd.f32 %v2968_v56, %v1689_v24 }
 0x2a6   : > { %v2230_v23 = vpop.f32.mrf.mxu1  ;;  %3167 = vrcp.f32 %v2335_v54  ;;  %v2333_v33 = vadd.f32 1.0, %v3148_v11  ;;  %v2397_v3 = vunpack.c.l.bf16 %v3204_v30 }
 0x2a7   : > { %v2255_v44 = vadd.f32 %v2230_v23, %v1681_v22  ;;  %v3150_v20 = vpop.eup %3149  ;;  %3169 = vpow2.f32 %v2783_v15  ;;  %v2786_v16 = vmul.f32 -1.442695, %v4391_v43  ;;  %v4397_v17 = vadd.f32 %v4331_v36, %v2257_v62 }
 0x2a8   : > { %3171 = vrcp.f32 %v2333_v33  ;;  %v2336_v18 = vadd.f32 1.0, %v3150_v20 }
 0x2a9   : > { %v4400_v6 = vadd.f32 %v4331_v36, %v2255_v44  ;;  %3173 = vpow2.f32 %v2788_v13  ;;  %v2789_v2 = vmul.f32 -1.442695, %v4397_v17 }
 0x2aa   : > { %v3152_v45 = vpop.eup %3151  ;;  %3175 = vrcp.f32 %v2336_v18  ;;  %v2398_v18 = vunpack.c.h.bf16 %v3204_v30 }
 0x2ab   : > { %v2787_v19 = vmul.f32 -1.442695, %v4400_v6  ;;  %v3154_v41 = vpop.eup %3153  ;;  %v2334_v52 = vadd.f32 1.0, %v3152_v45  ;;  %3177 = vpow2.f32 %v2786_v16 }
 0x2ac   : > { %v3156_v37 = vpop.eup %3155  ;;  %v2379_v26 = vmul.f32 %v3154_v41, %v4334_v53  ;;  %3179 = vpow2.f32 %v2789_v2 }
 0x2ad   : > { %v3158_v36 = vpop.eup %3157  ;;  %3181 = vrcp.f32 %v2334_v52  ;;  %v2339_v29 = vadd.f32 1.0, %v3156_v37  ;;  %v3205_v52 = vld [vmem:[%s3336_s12 + $0x28] sm:$0xff]  }
 0x2ae   : > { %v3160_v5 = vpop.eup %3159  ;;  %v2411_v31 = vadd.f32 %v2395_v1, %v2379_v26  ;;  %v2377_v46 = vmul.f32 %v3158_v36, %v4338_v55  ;;  %3183 = vpow2.f32 %v2787_v19 }
 0x2af   : > { %v3162_v42 = vpop.eup %3161  ;;  %3185 = vrcp.f32 %v2339_v29  ;;  %v2337_v53 = vadd.f32 1.0, %v3160_v5  ;;  %v3206_v29 = vld [vmem:[%s3336_s12 + $0x20] sm:$0xff]  }
 0x2b0   : > { %v3164_v0 = vpop.eup %3163  ;;  %v2831_v50 = vpack.c.bf16 %v2411_v31, %v2411_v31  ;;  %v2409_v60 = vadd.f32 %v2393_v40, %v2377_v46  ;;  %v2380_v48 = vmul.f32 %v3162_v42, %v4342_v49  ;;  %v2401_v5 = vunpack.c.l.bf16 %v3206_v29 }
 0x2b1   : > { %3187 = vrcp.f32 %v2337_v53  ;;  %v2340_v55 = vadd.f32 1.0, %v3164_v0  ;;  %v2404_v42 = vunpack.c.h.bf16 %v3205_v52 }
 0x2b2   : > { %v3166_v21 = vpop.eup %3165  ;;  %2491 = vst.msk [vmem:[%s4412_s27 + $0x8] sm:$0xf] %vm623_vm12, %v2831_v50  ;;  %v2829_v58 = vpack.c.bf16 %v2409_v60, %v2409_v60  ;;  %v2412_v7 = vadd.f32 %v2396_v34, %v2380_v48 }
 0x2b3   : > { %v3168_v8 = vpop.eup %3167  ;;  %v2378_v10 = vmul.f32 %v3166_v21, %v4346_v27  ;;  %3189 = vrcp.f32 %v2340_v55  ;;  %v2400_v27 = vunpack.c.h.bf16 %v3203_v57 }
 0x2b4   : > { %v3170_v24 = vpop.eup %3169  ;;  %2489 = vst.msk [vmem:[%s4412_s27] sm:$0xf] %vm623_vm12, %v2829_v58  ;;  %v2832_v49 = vpack.c.bf16 %v2412_v7, %v2412_v7  ;;  %v2383_v47 = vmul.f32 %v3168_v8, %v4349_v28  ;;  %v3207_v58 = vld [vmem:[%s3336_s12 + $0x38] sm:$0xff]   ;;  %v3208_v8 = vld [vmem:[%s3336_s12 + $0x30] sm:$0xff]  }
 0x2b5   : > { %v3172_v15 = vpop.eup %3171  ;;  %v2410_v35 = vadd.f32 %v2394_v61, %v2378_v10  ;;  %v2338_v56 = vadd.f32 1.0, %v3170_v24  ;;  %v2402_v61 = vunpack.c.h.bf16 %v3206_v29  ;;  %v2407_v7 = vunpack.c.l.bf16 %v3207_v58 }
 0x2b6   : > { %v3174_v54 = vpop.eup %3173  ;;  %2492 = vst.msk [vmem:[%s4412_s27 + $0xc] sm:$0xf] %vm623_vm12, %v2832_v49  ;;  %v2415_v22 = vadd.f32 %v2399_v12, %v2383_v47  ;;  %v2381_v11 = vmul.f32 %v3172_v15, %v4354_v25  ;;  %v2405_v10 = vunpack.c.l.bf16 %v3208_v8  ;;  %v2408_v49 = vunpack.c.h.bf16 %v3207_v58 }
 0x2b7   : > { %v3176_v13 = vpop.eup %3175  ;;  %v2830_v62 = vpack.c.bf16 %v2410_v35, %v2410_v35  ;;  %3191 = vrcp.f32 %v2338_v56  ;;  %v2343_v23 = vadd.f32 1.0, %v3174_v54  ;;  %v2406_v35 = vunpack.c.h.bf16 %v3208_v8 }
 0x2b8   : > { %v3178_v33 = vpop.eup %3177  ;;  %v2835_v28 = vpack.c.bf16 %v2415_v22, %v2415_v22  ;;  %v2413_v44 = vadd.f32 %v2397_v3, %v2381_v11  ;;  %v2384_v20 = vmul.f32 %v3176_v13, %v4358_v38  ;;  %v2403_v38 = vunpack.c.l.bf16 %v3205_v52 }
 0x2b9   : > { %v3180_v16 = vpop.eup %3179  ;;  %2490 = vst.msk [vmem:[%s4412_s27 + $0x4] sm:$0xf] %vm623_vm12, %v2830_v62  ;;  %3193 = vrcp.f32 %v2343_v23  ;;  %v2341_v2 = vadd.f32 1.0, %v3178_v33 }
 0x2ba   : > { %v3182_v25 = vpop.eup %3181  ;;  %2495 = vst.msk [vmem:[%s4412_s27 + $0x18] sm:$0xf] %vm623_vm12, %v2835_v28  ;;  %v2833_v45 = vpack.c.bf16 %v2413_v44, %v2413_v44  ;;  %v2416_v63 = vadd.f32 %v2400_v27, %v2384_v20  ;;  %v2344_v1 = vadd.f32 1.0, %v3180_v16 }
 0x2bb   : > { %v3184_v19 = vpop.eup %3183  ;;  %v2382_v41 = vmul.f32 %v3182_v25, %v4363_v4  ;;  %3195 = vrcp.f32 %v2341_v2 }
 0x2bc   : > { %v3186_v37 = vpop.eup %3185  ;;  %2493 = vst.msk [vmem:[%s4412_s27 + $0x10] sm:$0xf] %vm623_vm12, %v2833_v45  ;;  %v2836_v32 = vpack.c.bf16 %v2416_v63, %v2416_v63  ;;  %3197 = vrcp.f32 %v2344_v1  ;;  %v2342_v40 = vadd.f32 1.0, %v3184_v19 }
 0x2bd   : > { %v2414_v26 = vadd.f32 %v2398_v18, %v2382_v41  ;;  %v2387_v36 = vmul.f32 %v3186_v37, %v4366_v39 }
 0x2be   : > { %v3188_v31 = vpop.eup %3187  ;;  %2496 = vst.msk [vmem:[%s4412_s27 + $0x1c] sm:$0xf] %vm623_vm12, %v2836_v32  ;;  %3199 = vrcp.f32 %v2342_v40 }
 0x2bf   : > { %v2834_v4 = vpack.c.bf16 %v2414_v26, %v2414_v26  ;;  %v2419_v46 = vadd.f32 %v2403_v38, %v2387_v36  ;;  %v2385_v34 = vmul.f32 %v3188_v31, %v4372_v59 }
 0x2c0   : > { %v3190_v53 = vpop.eup %3189 }
 0x2c1   : > { %2494 = vst.msk [vmem:[%s4412_s27 + $0x14] sm:$0xf] %vm623_vm12, %v2834_v4  ;;  %v2839_v0 = vpack.c.bf16 %v2419_v46, %v2419_v46  ;;  %v2417_v50 = vadd.f32 %v2401_v5, %v2385_v34  ;;  %v2388_v39 = vmul.f32 %v3190_v53, %v4378_v14 }
 0x2c3   : > { %2499 = vst.msk [vmem:[%s4412_s27 + $0x28] sm:$0xf] %vm623_vm12, %v2839_v0  ;;  %v2837_v60 = vpack.c.bf16 %v2417_v50, %v2417_v50  ;;  %v2420_v48 = vadd.f32 %v2404_v42, %v2388_v39 }
 0x2c4   : > { %v3192_v55 = vpop.eup %3191 }
 0x2c5   : > { %2497 = vst.msk [vmem:[%s4412_s27 + $0x20] sm:$0xf] %vm623_vm12, %v2837_v60  ;;  %v2840_v21 = vpack.c.bf16 %v2420_v48, %v2420_v48  ;;  %v2386_v59 = vmul.f32 %v3192_v55, %v4383_v9 }
 0x2c6   : > { %v3194_v57 = vpop.eup %3193 }
 0x2c7   : > { %2500 = vst.msk [vmem:[%s4412_s27 + $0x2c] sm:$0xf] %vm623_vm12, %v2840_v21  ;;  %v2418_v12 = vadd.f32 %v2402_v61, %v2386_v59  ;;  %v2391_v14 = vmul.f32 %v3194_v57, %v4386_v51 }
 0x2c8   : > { %v3196_v24 = vpop.eup %3195 }
 0x2c9   : > { %v3198_v47 = vpop.eup %3197  ;;  %v2838_v30 = vpack.c.bf16 %v2418_v12, %v2418_v12  ;;  %v2423_v3 = vadd.f32 %v2407_v7, %v2391_v14  ;;  %v2389_v9 = vmul.f32 %v3196_v24, %v4391_v43 }
 0x2ca   : > { %v2392_v15 = vmul.f32 %v3198_v47, %v4397_v17 }
 0x2cb   : > { %v3200_v56 = vpop.eup %3199  ;;  %2498 = vst.msk [vmem:[%s4412_s27 + $0x24] sm:$0xf] %vm623_vm12, %v2838_v30  ;;  %v2843_v51 = vpack.c.bf16 %v2423_v3, %v2423_v3  ;;  %v2421_v54 = vadd.f32 %v2405_v10, %v2389_v9 }
 0x2cc   : > { %v2424_v22 = vadd.f32 %v2408_v49, %v2392_v15  ;;  %v2390_v11 = vmul.f32 %v3200_v56, %v4400_v6 }
 0x2cd   : > { %2503 = vst.msk [vmem:[%s4412_s27 + $0x38] sm:$0xf] %vm623_vm12, %v2843_v51  ;;  %v2841_v27 = vpack.c.bf16 %v2421_v54, %v2421_v54 }
 0x2ce   : > { %v2844_v13 = vpack.c.bf16 %v2424_v22, %v2424_v22  ;;  %v2422_v62 = vadd.f32 %v2406_v35, %v2390_v11 }
 0x2cf   : > { %2501 = vst.msk [vmem:[%s4412_s27 + $0x30] sm:$0xf] %vm623_vm12, %v2841_v27 }
 0x2d0   : > { %2504 = vst.msk [vmem:[%s4412_s27 + $0x3c] sm:$0xf] %vm623_vm12, %v2844_v13  ;;  %v2842_v43 = vpack.c.bf16 %v2422_v62, %v2422_v62 }
 0x2d2   : > { %2502 = vst.msk [vmem:[%s4412_s27 + $0x34] sm:$0xf] %vm623_vm12, %v2842_v43 }
 0x2d3 PF: > { %s15_s22 = sadd.s32 1, %s3247_s22   ;;  %s4532_s18 = smov %s3239_s20 }
 0x2d4   : > { %p12_p11 = scmp.ge.s32.totalorder %s15_s22, 6   ;;  %s4533_s19 = smov %s3243_s21 }
 0x2d5   : > { %s4534_s20 = smov %s4537_s23  ;;  %s4535_s21 = smov %s4541_s24 }
 0x2d6   :  { %14 = sbr.rel (!%p12_p11) target bundleno = 3 (0x3), region = 75 }

</bundles_post_ra>
